<compile_context>
chip_gen: v5e
topology: v5e:2x2
jax: 0.10.0
libtpu: 0.0.40
codegen_flags: <defaults>
</compile_context>

<pallas_src>
import jax
import jax.numpy as jnp
from jax import lax
from jax.experimental import pallas as pl
from jax.experimental.pallas import tpu as pltpu


# ----------------------------------------------------------------------------
# Fused Pallas kernel (single grid point; every operand is one full-array VMEM
# block: largest is the 512 KiB bf16 block-diagonal conv1 weight).
# ----------------------------------------------------------------------------
def _disc_fused_kernel(p_ref, w1b_ref, w2m_ref, g_ref, b_ref,
                       wfc_ref, sel_ref, bfc_ref, o_ref):
    # --- conv1 (all 16 conv2 taps at once, block-diag GEMM) + LeakyReLU(0.2) --
    # bf16 [B*49, 256] @ bf16 [256, 1024] -> f32 [B*49, 1024]; zero patch rows
    # (conv2 padding of h1) stay exactly zero because LeakyReLU(0) == 0 and the
    # convolutions have no bias.
    h1 = jnp.dot(p_ref[...], w1b_ref[...], preferred_element_type=jnp.float32)
    h1 = jnp.where(h1 >= 0.0, h1, 0.2 * h1)

    # --- conv2 as one lane-dense GEMM: bf16 [B*49,1024] @ bf16 [1024,128] -----
    y = jnp.dot(h1.astype(jnp.bfloat16), w2m_ref[...],
                preferred_element_type=jnp.float32)

    # --- BatchNorm2d(128), training mode: stats over rows (B,H,W), biased var -
    mean = jnp.mean(y, axis=0, keepdims=True)
    diff = y - mean
    var = jnp.mean(diff * diff, axis=0, keepdims=True)
    z = diff * lax.rsqrt(var + 1e-5) * g_ref[...] + b_ref[...]
    h2 = jnp.where(z >= 0.0, z, 0.2 * z)                      # [B*49, 128] f32

    # --- Flatten (NCHW order folded into wfc) + Linear(6272->1) + Sigmoid -----
    t = (h2 * wfc_ref[...]).astype(jnp.bfloat16)              # [B*49, 128]
    u = jnp.dot(sel_ref[...], t, preferred_element_type=jnp.float32)  # [B, 128]
    logit = jnp.sum(u, axis=-1, keepdims=True) + bfc_ref[...]          # [B, 1]
    o_ref[...] = 1.0 / (1.0 + jnp.exp(-logit))                # exact sigmoid


def _vmem():
    return pl.BlockSpec(memory_space=pltpu.MemorySpace.VMEM)


def fused_discriminator(p_bf16, w1_block, w2_mat, gamma, beta,
                        wfc_tiled, sel, b_fc, batch):
    return pl.pallas_call(
        _disc_fused_kernel,
        out_shape=jax.ShapeDtypeStruct((batch, 1), jnp.float32),
        in_specs=[_vmem()] * 8,
        out_specs=_vmem(),
    )(p_bf16, w1_block, w2_mat, gamma, beta, wfc_tiled, sel, b_fc)


# ----------------------------------------------------------------------------
# One-time parameter preprocessing (hoisted out of the per-step forward, per
# perf review): kron block-diag conv1 weight, permuted conv2 / fc weights,
# batch-tiled fc weight and selector.  GEMM weights are stored in bf16.
# ----------------------------------------------------------------------------
def prepare_discriminator(params, batch):
    w1, w2, gamma, beta, w_fc, b_fc = params
    w1m = w1.reshape(64, 16).T                                         # [16(ka,kb), 64]
    w1_block = jnp.kron(jnp.eye(16, dtype=jnp.float32), w1m)           # [256, 1024]
    w2_mat = w2.transpose(2, 3, 1, 0).reshape(16 * 64, 128)            # [(ki,kj,ci), co]
    wfc = w_fc.reshape(128, 7, 7).transpose(1, 2, 0).reshape(49, 128)  # NCHW flatten folded
    wfc_tiled = jnp.tile(wfc, (batch, 1))                              # [B*49, 128]
    sel = jnp.repeat(jnp.eye(batch, dtype=jnp.float32), 49, axis=1)    # [B, B*49]
    return dict(
        w1_block=w1_block.astype(jnp.bfloat16),
        w2_mat=w2_mat.astype(jnp.bfloat16),
        gamma=gamma.reshape(1, 128).astype(jnp.float32),
        beta=beta.reshape(1, 128).astype(jnp.float32),
        wfc_tiled=wfc_tiled.astype(jnp.float32),
        sel=sel.astype(jnp.bfloat16),
        b_fc=b_fc.reshape(1, 1).astype(jnp.float32),
    )


# ----------------------------------------------------------------------------
# Per-call host-side (XLA) work: only the input super-patch extraction
# (im2col-like, depends on x) and the bf16 cast of the patches.
# ----------------------------------------------------------------------------
def _superpatches(x, k=4, s=2):
    """x: [B, 1, 28, 28] -> P [B*49, 256].

    Row order (b, oh2, ow2); column order (conv2 tap ki*4+kj) x (conv1 tap ka*4+kb).
    Rows whose conv1 position falls in conv2's zero padding of h1 are zeroed.
    """
    B = x.shape[0]
    xs = x[:, 0]                                              # [B, 28, 28]
    xp = jnp.pad(xs, ((0, 0), (1, 1), (1, 1)))                # conv1 padding
    oh1 = 14
    cols = [xp[:, ka:ka + s * oh1:s, kb:kb + s * oh1:s]       # [B, 14, 14]
            for ka in range(k) for kb in range(k)]
    p1 = jnp.stack(cols, axis=-1)                             # [B, 14, 14, 16]
    p1p = jnp.pad(p1, ((0, 0), (1, 1), (1, 1), (0, 0)))       # conv2 padding of h1
    oh2 = 7
    taps = [p1p[:, ki:ki + s * oh2:s, kj:kj + s * oh2:s, :]   # [B, 7, 7, 16]
            for ki in range(k) for kj in range(k)]
    p = jnp.stack(taps, axis=3)                               # [B, 7, 7, 16, 16]
    return p.reshape(B * oh2 * oh2, k * k * k * k)            # [B*49, 256]


def discriminator_forward(x, prepped):
    batch = x.shape[0]
    p_bf16 = _superpatches(x).astype(jnp.bfloat16)            # [B*49, 256]
    return fused_discriminator(
        p_bf16, prepped["w1_block"], prepped["w2_mat"],
        prepped["gamma"], prepped["beta"], prepped["wfc_tiled"],
        prepped["sel"], prepped["b_fc"], batch)               # [B, 1]


# ----------------------------------------------------------------------------
# References.
#  * reference_prepared: pure-JAX mirror of the kernel's exact algorithm
#    (same bf16 casts, f32 accumulation) -> tight 1e-3 check of the Pallas path.
#  * reference_forward: full-f32 lax.conv implementation of the torch module
#    -> loose sanity check that bf16 weights keep the module semantics.
# ----------------------------------------------------------------------------
def reference_prepared(x, prepped):
    hp = lax.Precision.HIGHEST
    p = _superpatches(x).astype(jnp.bfloat16).astype(jnp.float32)
    w1b = prepped["w1_block"].astype(jnp.float32)
    w2m = prepped["w2_mat"].astype(jnp.float32)
    h1 = jnp.dot(p, w1b, precision=hp)
    h1 = jnp.where(h1 >= 0, h1, 0.2 * h1)
    h1q = h1.astype(jnp.bfloat16).astype(jnp.float32)
    y = jnp.dot(h1q, w2m, precision=hp)
    mean = jnp.mean(y, axis=0, keepdims=True)
    diff = y - mean
    var = jnp.mean(diff * diff, axis=0, keepdims=True)
    z = diff * lax.rsqrt(var + 1e-5) * prepped["gamma"] + prepped["beta"]
    h2 = jnp.where(z >= 0, z, 0.2 * z)
    t = (h2 * prepped["wfc_tiled"]).astype(jnp.bfloat16).astype(jnp.float32)
    sel = prepped["sel"].astype(jnp.float32)
    u = jnp.dot(sel, t, precision=hp)
    logit = jnp.sum(u, axis=-1, keepdims=True) + prepped["b_fc"]
    return 1.0 / (1.0 + jnp.exp(-logit))


def reference_forward(x, params):
    w1, w2, gamma, beta, w_fc, b_fc = params
    dn = ('NCHW', 'OIHW', 'NCHW')
    h = lax.conv_general_dilated(x, w1, (2, 2), ((1, 1), (1, 1)),
                                 dimension_numbers=dn,
                                 precision=lax.Precision.HIGHEST)
    h = jnp.where(h >= 0, h, 0.2 * h)
    h = lax.conv_general_dilated(h, w2, (2, 2), ((1, 1), (1, 1)),
                                 dimension_numbers=dn,
                                 precision=lax.Precision.HIGHEST)
    mean = jnp.mean(h, axis=(0, 2, 3), keepdims=True)
    var = jnp.mean((h - mean) ** 2, axis=(0, 2, 3), keepdims=True)
    h = (h - mean) / jnp.sqrt(var + 1e-5)
    h = h * gamma.reshape(1, -1, 1, 1) + beta.reshape(1, -1, 1, 1)
    h = jnp.where(h >= 0, h, 0.2 * h)
    flat = h.reshape(h.shape[0], -1)
    z = flat @ w_fc.T + b_fc
    return jax.nn.sigmoid(z)


if __name__ == "__main__":
    key = jax.random.PRNGKey(0)
    kx, k1, k2, k3, k4, k5, k6 = jax.random.split(key, 7)

    # Deterministic synthetic parameters (shapes from the module's __init__).
    w1 = 0.02 * jax.random.normal(k1, (64, 1, 4, 4), jnp.float32)       # Conv2d(1,64,4)
    w2 = 0.02 * jax.random.normal(k2, (128, 64, 4, 4), jnp.float32)     # Conv2d(64,128,4)
    gamma = 1.0 + 0.1 * jax.random.normal(k3, (128,), jnp.float32)      # BN weight
    beta = 0.1 * jax.random.normal(k4, (128,), jnp.float32)             # BN bias
    w_fc = 0.02 * jax.random.normal(k5, (1, 128 * 7 * 7), jnp.float32)  # Linear weight
    b_fc = 0.02 * jax.random.normal(k6, (1,), jnp.float32)              # Linear bias
    params = (w1, w2, gamma, beta, w_fc, b_fc)

    # Linear(128*7*7, 1) fixes spatial size to 28x28 (MNIST); batch=2.
    x = jax.random.normal(kx, (2, 1, 28, 28), jnp.float32)

    # One-time weight preprocessing (hoisted out of the jitted per-step forward).
    prepped = prepare_discriminator(params, batch=x.shape[0])

    fwd = jax.jit(discriminator_forward)
    out = jax.block_until_ready(fwd(x, prepped))
    assert out.shape == (2, 1), out.shape

    # Tight check: same algorithm / same bf16 casts in pure JAX.
    ref_tight = reference_prepared(x, prepped)
    assert jnp.allclose(out, ref_tight, atol=1e-3, rtol=1e-3), (out, ref_tight)

    # Loose sanity check: full-f32 module semantics (bf16 weight quantization
    # plus MXU accumulation-order differences stay well inside this band).
    ref_f32 = reference_forward(x, params)
    assert jnp.allclose(out, ref_f32, atol=3e-2, rtol=3e-2), (out, ref_f32)

    print("KERNEL_OK")
</pallas_src>

<mosaic_0001>
module attributes {stable_mosaic.version = 11 : i64} {
  func.func @_disc_fused_kernel(%arg0: memref<98x256xbf16, #tpu.memory_space<vmem>>, %arg1: memref<256x1024xbf16, #tpu.memory_space<vmem>>, %arg2: memref<1024x128xbf16, #tpu.memory_space<vmem>>, %arg3: memref<1x128xf32, #tpu.memory_space<vmem>>, %arg4: memref<1x128xf32, #tpu.memory_space<vmem>>, %arg5: memref<98x128xf32, #tpu.memory_space<vmem>>, %arg6: memref<2x98xbf16, #tpu.memory_space<vmem>>, %arg7: memref<1x1xf32, #tpu.memory_space<vmem>>, %arg8: memref<2x1xf32, #tpu.memory_space<vmem>>) attributes {dimension_semantics = [], scalar_prefetch = 0 : i64, scratch_operands = 0 : i64, tpu.core_type = #tpu.core_type<tc>} {
    %c0 = arith.constant 0 : index
    %c0_0 = arith.constant 0 : index
    %0 = vector.load %arg0[%c0, %c0_0] : memref<98x256xbf16, #tpu.memory_space<vmem>>, vector<98x256xbf16>
    %c0_1 = arith.constant 0 : index
    %c0_2 = arith.constant 0 : index
    %1 = vector.load %arg1[%c0_1, %c0_2] : memref<256x1024xbf16, #tpu.memory_space<vmem>>, vector<256x1024xbf16>
    %cst = arith.constant dense<0.000000e+00> : vector<98x1024xf32>
    %2 = tpu.matmul %0, %1, %cst {dimension_numbers = #tpu.dot_dimension_numbers<[1], [0], [0], [1], [0, 0, 1, 1], [], []>} : vector<98x256xbf16>, vector<256x1024xbf16>, vector<98x1024xf32> -> vector<98x1024xf32>
    %cst_3 = arith.constant 0.000000e+00 : f32
    %3 = vector.broadcast %cst_3 : f32 to vector<98x1024xf32>
    %4 = arith.cmpf oge, %2, %3 : vector<98x1024xf32>
    %cst_4 = arith.constant 2.000000e-01 : f32
    %5 = vector.broadcast %cst_4 : f32 to vector<98x1024xf32>
    %6 = arith.mulf %5, %2 : vector<98x1024xf32>
    %7 = arith.select %4, %2, %6 : vector<98x1024xi1>, vector<98x1024xf32>
    %8 = arith.truncf %7 : vector<98x1024xf32> to vector<98x1024xbf16>
    %c0_5 = arith.constant 0 : index
    %c0_6 = arith.constant 0 : index
    %9 = vector.load %arg2[%c0_5, %c0_6] : memref<1024x128xbf16, #tpu.memory_space<vmem>>, vector<1024x128xbf16>
    %cst_7 = arith.constant dense<0.000000e+00> : vector<98x128xf32>
    %10 = tpu.matmul %8, %9, %cst_7 {dimension_numbers = #tpu.dot_dimension_numbers<[1], [0], [0], [1], [0, 0, 1, 1], [], []>} : vector<98x1024xbf16>, vector<1024x128xbf16>, vector<98x128xf32> -> vector<98x128xf32>
    %cst_8 = arith.constant dense<0.000000e+00> : vector<128xf32>
    %11 = vector.multi_reduction <add>, %10, %cst_8 [0] : vector<98x128xf32> to vector<128xf32>
    %12 = vector.shape_cast %11 : vector<128xf32> to vector<1x128xf32>
    %cst_9 = arith.constant 9.800000e+01 : f32
    %13 = vector.broadcast %cst_9 : f32 to vector<1x128xf32>
    %14 = arith.divf %12, %13 : vector<1x128xf32>
    %15 = vector.broadcast %14 : vector<1x128xf32> to vector<98x128xf32>
    %16 = arith.subf %10, %15 : vector<98x128xf32>
    %17 = arith.mulf %16, %16 : vector<98x128xf32>
    %cst_10 = arith.constant dense<0.000000e+00> : vector<128xf32>
    %18 = vector.multi_reduction <add>, %17, %cst_10 [0] : vector<98x128xf32> to vector<128xf32>
    %19 = vector.shape_cast %18 : vector<128xf32> to vector<1x128xf32>
    %cst_11 = arith.constant 9.800000e+01 : f32
    %20 = vector.broadcast %cst_11 : f32 to vector<1x128xf32>
    %21 = arith.divf %19, %20 : vector<1x128xf32>
    %cst_12 = arith.constant 9.99999974E-6 : f32
    %22 = vector.broadcast %cst_12 : f32 to vector<1x128xf32>
    %23 = arith.addf %21, %22 : vector<1x128xf32>
    %24 = math.rsqrt %23 : vector<1x128xf32>
    %25 = vector.broadcast %24 : vector<1x128xf32> to vector<98x128xf32>
    %26 = arith.mulf %16, %25 : vector<98x128xf32>
    %c0_13 = arith.constant 0 : index
    %c0_14 = arith.constant 0 : index
    %27 = vector.load %arg3[%c0_13, %c0_14] : memref<1x128xf32, #tpu.memory_space<vmem>>, vector<1x128xf32>
    %28 = vector.broadcast %27 : vector<1x128xf32> to vector<98x128xf32>
    %29 = arith.mulf %26, %28 : vector<98x128xf32>
    %c0_15 = arith.constant 0 : index
    %c0_16 = arith.constant 0 : index
    %30 = vector.load %arg4[%c0_15, %c0_16] : memref<1x128xf32, #tpu.memory_space<vmem>>, vector<1x128xf32>
    %31 = vector.broadcast %30 : vector<1x128xf32> to vector<98x128xf32>
    %32 = arith.addf %29, %31 : vector<98x128xf32>
    %cst_17 = arith.constant 0.000000e+00 : f32
    %33 = vector.broadcast %cst_17 : f32 to vector<98x128xf32>
    %34 = arith.cmpf oge, %32, %33 : vector<98x128xf32>
    %cst_18 = arith.constant 2.000000e-01 : f32
    %35 = vector.broadcast %cst_18 : f32 to vector<98x128xf32>
    %36 = arith.mulf %35, %32 : vector<98x128xf32>
    %37 = arith.select %34, %32, %36 : vector<98x128xi1>, vector<98x128xf32>
    %c0_19 = arith.constant 0 : index
    %c0_20 = arith.constant 0 : index
    %38 = vector.load %arg5[%c0_19, %c0_20] : memref<98x128xf32, #tpu.memory_space<vmem>>, vector<98x128xf32>
    %39 = arith.mulf %37, %38 : vector<98x128xf32>
    %40 = arith.truncf %39 : vector<98x128xf32> to vector<98x128xbf16>
    %c0_21 = arith.constant 0 : index
    %c0_22 = arith.constant 0 : index
    %41 = vector.load %arg6[%c0_21, %c0_22] : memref<2x98xbf16, #tpu.memory_space<vmem>>, vector<2x98xbf16>
    %cst_23 = arith.constant dense<0.000000e+00> : vector<2x128xf32>
    %42 = tpu.matmul %41, %40, %cst_23 {dimension_numbers = #tpu.dot_dimension_numbers<[1], [0], [0], [1], [0, 0, 1, 1], [], []>} : vector<2x98xbf16>, vector<98x128xbf16>, vector<2x128xf32> -> vector<2x128xf32>
    %cst_24 = arith.constant dense<0.000000e+00> : vector<2xf32>
    %43 = vector.multi_reduction <add>, %42, %cst_24 [1] : vector<2x128xf32> to vector<2xf32>
    %44 = vector.shape_cast %43 : vector<2xf32> to vector<2x1xf32>
    %c0_25 = arith.constant 0 : index
    %c0_26 = arith.constant 0 : index
    %45 = vector.load %arg7[%c0_25, %c0_26] : memref<1x1xf32, #tpu.memory_space<vmem>>, vector<1x1xf32>
    %46 = vector.broadcast %45 : vector<1x1xf32> to vector<2x1xf32>
    %47 = arith.addf %44, %46 : vector<2x1xf32>
    %cst_27 = arith.constant 0.000000e+00 : f32
    %48 = vector.broadcast %cst_27 : f32 to vector<2x1xf32>
    %49 = arith.subf %48, %47 : vector<2x1xf32>
    %50 = math.exp %49 : vector<2x1xf32>
    %cst_28 = arith.constant 1.000000e+00 : f32
    %51 = vector.broadcast %cst_28 : f32 to vector<2x1xf32>
    %52 = arith.addf %51, %50 : vector<2x1xf32>
    %cst_29 = arith.constant 1.000000e+00 : f32
    %53 = vector.broadcast %cst_29 : f32 to vector<2x1xf32>
    %54 = arith.divf %53, %52 : vector<2x1xf32>
    %c0_30 = arith.constant 0 : index
    %c0_31 = arith.constant 0 : index
    %55 = vector.load %arg8[%c0_30, %c0_31] : memref<2x1xf32, #tpu.memory_space<vmem>>, vector<2x1xf32>
    tpu.vector_store %arg8[%c0_30, %c0_31], %54 {strides = array<i32>} : memref<2x1xf32, #tpu.memory_space<vmem>>, vector<2x1xf32>,
    return
  }
}

</mosaic_0001>

<bundles_post_ra>
// kernel: discriminator_forward.1
= control target key start
LH: loop header
LB: loop body
LE: loop exit
PB: predicated region body
PF: predicated region fallthrough
CT: control target
= control target key end

     0   :  { %s6039_s1 = inlined_call_operand.vmem [shape: bf16[256,1024], index: 1, kind: input, shape index: {}]   ;;  %s6040_s0 = inlined_call_operand.vmem [shape: bf16[98,256], index: 0, kind: input, shape index: {}]   ;;  %s6041_s2 = inlined_call_operand.vmem [shape: bf16[1024,128], index: 2, kind: input, shape index: {}]   ;;  %s6042_s3 = inlined_call_operand.vmem [shape: f32[1,128], index: 3, kind: input, shape index: {}]   ;;  %s6043_s4 = inlined_call_operand.vmem [shape: f32[1,128], index: 4, kind: input, shape index: {}]   ;;  %s6044_s5 = inlined_call_operand.vmem [shape: f32[98,128], index: 5, kind: input, shape index: {}]   ;;  %s6045_s6 = inlined_call_operand.vmem [shape: bf16[2,98], index: 6, kind: input, shape index: {}]   ;;  %s6046_s7 = inlined_call_operand.<no memory space> [shape: f32[1,1], index: 7, kind: input, shape index: {}]   ;;  %s6047_s8 = inlined_call_operand.vmem [shape: f32[2,1], index: 8, kind: output, shape index: {}]  }
   0x1   :  { %v3325_v0 = vld [vmem:[%s6039_s1 + $0x1c0] sm:$0xf]  ;;  %v3936_v5 = vld [vmem:[%s6039_s1 + $0x1c4] sm:$0xf] }
   0x2   :  { %v3940_v1 = vld [vmem:[%s6039_s1 + $0x1dc] sm:$0xf0]  ;;  %v3327_v6 = vld [vmem:[%s6039_s1 + $0x1e0] sm:$0xf0] }
   0x3   :  { %v3581_v2 = vld [vmem:[%s6039_s1 + $0x3c0] sm:$0xf]  ;;  %v3326_v3 = vor.u32 %v3940_v1, %v3325_v0  ;;  %v3330_v8 = vor.u32 %v3936_v5, %v3327_v6  ;;  %v4000_v9 = vld [vmem:[%s6039_s1 + $0x3c4] sm:$0xf] }
   0x4   :  { %v4004_v4 = vld [vmem:[%s6039_s1 + $0x3dc] sm:$0xf0]  ;;  %v3583_v10 = vld [vmem:[%s6039_s1 + $0x3e0] sm:$0xf0] }
   0x5   :  { %v3582_v7 = vor.u32 %v4004_v4, %v3581_v2  ;;  %v3293_v11 = vld [vmem:[%s6039_s1 + $0x180] sm:$0xf]  ;;  %880 = vmatpush.bf16.msra.mxu0 %v3326_v3  ;;  %v3586_v12 = vor.u32 %v4000_v9, %v3583_v10  ;;  %966 = vmatpush.bf16.msra.mxu2 %v3330_v8  ;;  %v3928_v18 = vld [vmem:[%s6039_s1 + $0x184] sm:$0xf] }
   0x6   :  { %v3932_v13 = vld [vmem:[%s6039_s1 + $0x19c] sm:$0xf0]  ;;  %v3295_v19 = vld [vmem:[%s6039_s1 + $0x1a0] sm:$0xf0] }
   0x7   :  { %v3549_v14 = vld [vmem:[%s6039_s1 + $0x380] sm:$0xf]  ;;  %923 = vmatpush.bf16.msra.mxu1 %v3582_v7  ;;  %v3294_v16 = vor.u32 %v3932_v13, %v3293_v11  ;;  %v3992_v20 = vld [vmem:[%s6039_s1 + $0x384] sm:$0xf]  ;;  %1009 = vmatpush.bf16.msra.mxu3 %v3586_v12  ;;  %v3298_v21 = vor.u32 %v3928_v18, %v3295_v19 }
   0x8   :  { %v3996_v15 = vld [vmem:[%s6039_s1 + $0x39c] sm:$0xf0]  ;;  %v3551_v22 = vld [vmem:[%s6039_s1 + $0x3a0] sm:$0xf0] }
   0x9   :  { %v3550_v17 = vor.u32 %v3996_v15, %v3549_v14  ;;  %v3261_v23 = vld [vmem:[%s6039_s1 + $0x140] sm:$0xf]  ;;  %v3554_v25 = vor.u32 %v3992_v20, %v3551_v22  ;;  %v3920_v28 = vld [vmem:[%s6039_s1 + $0x144] sm:$0xf]  ;;  %881 = vmatpush.bf16.msra.mxu0 %v3294_v16  ;;  %967 = vmatpush.bf16.msra.mxu2 %v3298_v21 }
   0xa   :  { %v3924_v24 = vld [vmem:[%s6039_s1 + $0x15c] sm:$0xf0]  ;;  %v3263_v30 = vld [vmem:[%s6039_s1 + $0x160] sm:$0xf0] }
   0xb   :  { %v3517_v26 = vld [vmem:[%s6039_s1 + $0x340] sm:$0xf]  ;;  %v3262_v29 = vor.u32 %v3924_v24, %v3261_v23  ;;  %v3984_v31 = vld [vmem:[%s6039_s1 + $0x344] sm:$0xf]  ;;  %924 = vmatpush.bf16.msra.mxu1 %v3550_v17  ;;  %v3266_v34 = vor.u32 %v3920_v28, %v3263_v30  ;;  %1010 = vmatpush.bf16.msra.mxu3 %v3554_v25  ;;  %v3869_v30 = vld [vmem:[%s6040_s0 + $0x4] sm:$0xf0] }
   0xc   :  { %v3988_v27 = vld [vmem:[%s6039_s1 + $0x35c] sm:$0xf0]  ;;  %v3519_v32 = vld [vmem:[%s6039_s1 + $0x360] sm:$0xf0] }
   0xd   :  { %v3518_v33 = vor.u32 %v3988_v27, %v3517_v26  ;;  %v3229_v35 = vld [vmem:[%s6039_s1 + $0x100] sm:$0xf]  ;;  %v3522_v38 = vor.u32 %v3984_v31, %v3519_v32  ;;  %v3912_v40 = vld [vmem:[%s6039_s1 + $0x104] sm:$0xf]  ;;  %882 = vmatpush.bf16.msra.mxu0 %v3262_v29  ;;  %968 = vmatpush.bf16.msra.mxu2 %v3266_v34  ;;  %v3055_v34 = vld [vmem:[%s6040_s0 + $0x8] sm:$0xf0] }
   0xe   :  { %v3916_v36 = vld [vmem:[%s6039_s1 + $0x11c] sm:$0xf0]  ;;  %v3231_v41 = vld [vmem:[%s6039_s1 + $0x120] sm:$0xf0] }
   0xf   :  { %v3485_v37 = vld [vmem:[%s6039_s1 + $0x300] sm:$0xf]  ;;  %v3976_v42 = vld [vmem:[%s6039_s1 + $0x304] sm:$0xf]  ;;  %v3230_v44 = vor.u32 %v3916_v36, %v3229_v35  ;;  %925 = vmatpush.bf16.msra.mxu1 %v3518_v33  ;;  %v3234_v46 = vor.u32 %v3912_v40, %v3231_v41  ;;  %1011 = vmatpush.bf16.msra.mxu3 %v3522_v38  ;;  %v3061_v38 = vld [vmem:[%s6040_s0 + $0x10] sm:$0xf] }
  0x10   :  { %v3980_v39 = vld [vmem:[%s6039_s1 + $0x31c] sm:$0xf0]  ;;  %v3487_v43 = vld [vmem:[%s6039_s1 + $0x320] sm:$0xf0]  ;;  %v3870_v40 = vld [vmem:[%s6040_s0 + $0x14] sm:$0xf] }
  0x11   :  { %v3486_v45 = vor.u32 %v3980_v39, %v3485_v37  ;;  %v3197_v47 = vld [vmem:[%s6039_s1 + $0xc0] sm:$0xf]  ;;  %v3490_v50 = vor.u32 %v3976_v42, %v3487_v43  ;;  %v3904_v52 = vld [vmem:[%s6039_s1 + $0xc4] sm:$0xf]  ;;  %883 = vmatpush.bf16.msra.mxu0 %v3230_v44  ;;  %969 = vmatpush.bf16.msra.mxu2 %v3234_v46  ;;  %v3871_v39 = vld [vmem:[%s6040_s0 + $0x14] sm:$0xf0] }
  0x12   :  { %v3908_v48 = vld [vmem:[%s6039_s1 + $0xdc] sm:$0xf0]  ;;  %v3199_v53 = vld [vmem:[%s6039_s1 + $0xe0] sm:$0xf0]  ;;  %v3063_v41 = vld [vmem:[%s6040_s0 + $0x18] sm:$0xf0]  ;;  %v4354_v42 = vor.u32 %v3871_v39, %v3061_v38 }
  0x13   :  { %v3453_v49 = vld [vmem:[%s6039_s1 + $0x2c0] sm:$0xf]  ;;  %v3968_v54 = vld [vmem:[%s6039_s1 + $0x2c4] sm:$0xf]  ;;  %v3198_v56 = vor.u32 %v3908_v48, %v3197_v47  ;;  %926 = vmatpush.bf16.msra.mxu1 %v3486_v45  ;;  %v3202_v58 = vor.u32 %v3904_v52, %v3199_v53  ;;  %1012 = vmatpush.bf16.msra.mxu3 %v3490_v50  ;;  %v4356_v43 = vor.u32 %v3870_v40, %v3063_v41  ;;  %v3873_v45 = vld [vmem:[%s6040_s0 + $0x24] sm:$0xf0] }
  0x14   :  { %v3972_v51 = vld [vmem:[%s6039_s1 + $0x2dc] sm:$0xf0]  ;;  %v3455_v55 = vld [vmem:[%s6039_s1 + $0x2e0] sm:$0xf0]  ;;  %v3071_v47 = vld [vmem:[%s6040_s0 + $0x28] sm:$0xf0] }
  0x15   :  { %v3454_v57 = vor.u32 %v3972_v51, %v3453_v49  ;;  %v3165_v59 = vld [vmem:[%s6039_s1 + $0x80] sm:$0xf]  ;;  %v3458_v62 = vor.u32 %v3968_v54, %v3455_v55  ;;  %v3896_v0 = vld [vmem:[%s6039_s1 + $0x84] sm:$0xf]  ;;  %884 = vmatpush.bf16.msra.mxu0 %v3198_v56  ;;  %970 = vmatpush.bf16.msra.mxu2 %v3202_v58  ;;  %v3077_v50 = vld [vmem:[%s6040_s0 + $0x30] sm:$0xf] }
  0x16   :  { %v3900_v60 = vld [vmem:[%s6039_s1 + $0x9c] sm:$0xf0]  ;;  %v3167_v1 = vld [vmem:[%s6039_s1 + $0xa0] sm:$0xf0]  ;;  %v3875_v51 = vld [vmem:[%s6040_s0 + $0x34] sm:$0xf0] }
  0x17   :  { %v3421_v61 = vld [vmem:[%s6039_s1 + $0x280] sm:$0xf]  ;;  %v3960_v2 = vld [vmem:[%s6039_s1 + $0x284] sm:$0xf]  ;;  %v3166_v4 = vor.u32 %v3900_v60, %v3165_v59  ;;  %927 = vmatpush.bf16.msra.mxu1 %v3454_v57  ;;  %v3170_v6 = vor.u32 %v3896_v0, %v3167_v1  ;;  %1013 = vmatpush.bf16.msra.mxu3 %v3458_v62  ;;  %v3874_v52 = vld [vmem:[%s6040_s0 + $0x34] sm:$0xf]  ;;  %v4394_v54 = vor.u32 %v3875_v51, %v3077_v50 }
  0x18   :  { %v3964_v63 = vld [vmem:[%s6039_s1 + $0x29c] sm:$0xf0]  ;;  %v3423_v3 = vld [vmem:[%s6039_s1 + $0x2a0] sm:$0xf0]  ;;  %v3079_v53 = vld [vmem:[%s6040_s0 + $0x38] sm:$0xf0] }
  0x19   :  { %v3422_v5 = vor.u32 %v3964_v63, %v3421_v61  ;;  %v3133_v7 = vld [vmem:[%s6039_s1 + $0x40] sm:$0xf]  ;;  %v3426_v10 = vor.u32 %v3960_v2, %v3423_v3  ;;  %v3888_v12 = vld [vmem:[%s6039_s1 + $0x44] sm:$0xf]  ;;  %885 = vmatpush.bf16.msra.mxu0 %v3166_v4  ;;  %971 = vmatpush.bf16.msra.mxu2 %v3170_v6  ;;  %v4396_v55 = vor.u32 %v3874_v52, %v3079_v53  ;;  %v3333_v56 = vld [vmem:[%s6039_s1 + $0x1c8] sm:$0xf] }
  0x1a   :  { %v3892_v8 = vld [vmem:[%s6039_s1 + $0x5c] sm:$0xf0]  ;;  %v3135_v13 = vld [vmem:[%s6039_s1 + $0x60] sm:$0xf0]  ;;  %v3941_v57 = vld [vmem:[%s6039_s1 + $0x1e4] sm:$0xf0] }
  0x1b   :  { %v3389_v9 = vld [vmem:[%s6039_s1 + $0x240] sm:$0xf]  ;;  %v3952_v14 = vld [vmem:[%s6039_s1 + $0x244] sm:$0xf]  ;;  %v3134_v16 = vor.u32 %v3892_v8, %v3133_v7  ;;  %928 = vmatpush.bf16.msra.mxu1 %v3422_v5  ;;  %v3138_v18 = vor.u32 %v3888_v12, %v3135_v13  ;;  %1014 = vmatpush.bf16.msra.mxu3 %v3426_v10  ;;  %v3589_v58 = vld [vmem:[%s6039_s1 + $0x3c8] sm:$0xf]  ;;  %v3334_v59 = vor.u32 %v3941_v57, %v3333_v56 }
  0x1c   :  { %v3956_v11 = vld [vmem:[%s6039_s1 + $0x25c] sm:$0xf0]  ;;  %v3391_v15 = vld [vmem:[%s6039_s1 + $0x260] sm:$0xf0]  ;;  %v4005_v60 = vld [vmem:[%s6039_s1 + $0x3e4] sm:$0xf0] }
  0x1d   :  { %v3390_v17 = vor.u32 %v3956_v11, %v3389_v9  ;;  %v3101_v19 = vld [vmem:[%s6039_s1] sm:$0xf]  ;;  %v3394_v22 = vor.u32 %v3952_v14, %v3391_v15  ;;  %v3880_v24 = vld [vmem:[%s6039_s1 + $0x4] sm:$0xf]  ;;  %886 = vmatpush.bf16.msra.mxu0 %v3134_v16  ;;  %972 = vmatpush.bf16.msra.mxu2 %v3138_v18  ;;  %v3937_v61 = vld [vmem:[%s6039_s1 + $0x1cc] sm:$0xf]  ;;  %v3590_v63 = vor.u32 %v4005_v60, %v3589_v58 }
  0x1e   :  { %v3884_v20 = vld [vmem:[%s6039_s1 + $0x1c] sm:$0xf0]  ;;  %v3103_v25 = vld [vmem:[%s6039_s1 + $0x20] sm:$0xf0]  ;;  %v3335_v62 = vld [vmem:[%s6039_s1 + $0x1e8] sm:$0xf0] }
  0x1f   :  { %v3357_v21 = vld [vmem:[%s6039_s1 + $0x200] sm:$0xf]  ;;  %v3944_v26 = vld [vmem:[%s6039_s1 + $0x204] sm:$0xf]  ;;  %v3102_v28 = vor.u32 %v3884_v20, %v3101_v19  ;;  %929 = vmatpush.bf16.msra.mxu1 %v3390_v17  ;;  %v3106_v32 = vor.u32 %v3880_v24, %v3103_v25  ;;  %1015 = vmatpush.bf16.msra.mxu3 %v3394_v22  ;;  %v3338_v0 = vor.u32 %v3937_v61, %v3335_v62  ;;  %v4001_v1 = vld [vmem:[%s6039_s1 + $0x3cc] sm:$0xf] }
  0x20   :  { %v3948_v23 = vld [vmem:[%s6039_s1 + $0x21c] sm:$0xf0]  ;;  %v3359_v27 = vld [vmem:[%s6039_s1 + $0x220] sm:$0xf0]  ;;  %v3591_v2 = vld [vmem:[%s6039_s1 + $0x3e8] sm:$0xf0] }
  0x21   :  { %v3053_v29 = vld [vmem:[%s6040_s0] sm:$0xf]  ;;  %v3358_v31 = vor.u32 %v3948_v23, %v3357_v21  ;;  %v3868_v33 = vld [vmem:[%s6040_s0 + $0x4] sm:$0xf]  ;;  %v3362_v35 = vor.u32 %v3944_v26, %v3359_v27  ;;  %887 = vmatpush.bf16.msra.mxu0 %v3102_v28  ;;  %973 = vmatpush.bf16.msra.mxu2 %v3106_v32  ;;  %v3301_v3 = vld [vmem:[%s6039_s1 + $0x188] sm:$0xf]  ;;  %v3594_v4 = vor.u32 %v4001_v1, %v3591_v2 }
  0x22   :  { %v4334_v36 = vor.u32 %v3869_v30, %v3053_v29  ;;  %v4336_v37 = vor.u32 %v3868_v33, %v3055_v34  ;;  %v3069_v44 = vld [vmem:[%s6040_s0 + $0x20] sm:$0xf]  ;;  %v3872_v46 = vld [vmem:[%s6040_s0 + $0x24] sm:$0xf]  ;;  %v3933_v5 = vld [vmem:[%s6039_s1 + $0x1a4] sm:$0xf0] }
  0x23   :  { %930 = vmatpush.bf16.msra.mxu1 %v3358_v31  ;;  %1016 = vmatpush.bf16.msra.mxu3 %v3362_v35  ;;  %v4374_v48 = vor.u32 %v3873_v45, %v3069_v44  ;;  %v4376_v49 = vor.u32 %v3872_v46, %v3071_v47  ;;  %v3557_v6 = vld [vmem:[%s6039_s1 + $0x388] sm:$0xf]  ;;  %v3302_v8 = vor.u32 %v3933_v5, %v3301_v3  ;;  %v3929_v10 = vld [vmem:[%s6039_s1 + $0x18c] sm:$0xf]  ;;  %v3085_v25 = vld [vmem:[%s6040_s0 + $0x40] sm:$0xf] }
  0x24   :  { %888 = vmatmul.bf16.vlgmr.msra.gmra.mxu0 %v4334_v36  ;;  %974 = vmatmul.bf16.vlgmr.msra.gmra.mxu2 %v4334_v36  ;;  %v3997_v7 = vld [vmem:[%s6039_s1 + $0x3a4] sm:$0xf0]  ;;  %v3303_v11 = vld [vmem:[%s6039_s1 + $0x1a8] sm:$0xf0]  ;;  %v3876_v34 = vld [vmem:[%s6040_s0 + $0x44] sm:$0xf] }
  0x25   :  { %1052 = vmatpush.bf16.msrb.mxu0 %v3334_v59  ;;  %1138 = vmatpush.bf16.msrb.mxu2 %v3338_v0  ;;  %v3558_v9 = vor.u32 %v3997_v7, %v3557_v6  ;;  %v3993_v12 = vld [vmem:[%s6039_s1 + $0x38c] sm:$0xf]  ;;  %v3306_v13 = vor.u32 %v3929_v10, %v3303_v11  ;;  %v3269_v15 = vld [vmem:[%s6039_s1 + $0x148] sm:$0xf] }
  0x26   :  { %931 = vmatmul.bf16.vlgmr.msra.gmra.mxu1 %v4336_v37  ;;  %1017 = vmatmul.bf16.vlgmr.msra.gmra.mxu3 %v4336_v37  ;;  %v3559_v14 = vld [vmem:[%s6039_s1 + $0x3a8] sm:$0xf0]  ;;  %v3925_v16 = vld [vmem:[%s6039_s1 + $0x164] sm:$0xf0] }
  0x27   :  { %1095 = vmatpush.bf16.msrb.mxu1 %v3590_v63  ;;  %1181 = vmatpush.bf16.msrb.mxu3 %v3594_v4  ;;  %v3562_v17 = vor.u32 %v3993_v12, %v3559_v14  ;;  %v3525_v18 = vld [vmem:[%s6039_s1 + $0x348] sm:$0xf]  ;;  %v3921_v20 = vld [vmem:[%s6039_s1 + $0x14c] sm:$0xf]  ;;  %v3270_v21 = vor.u32 %v3925_v16, %v3269_v15 }
  0x28   :  { %v3989_v19 = vld [vmem:[%s6039_s1 + $0x364] sm:$0xf0]  ;;  %v3271_v22 = vld [vmem:[%s6039_s1 + $0x168] sm:$0xf0] }
  0x29   :  { %1053 = vmatpush.bf16.msrb.mxu0 %v3302_v8  ;;  %v3985_v23 = vld [vmem:[%s6039_s1 + $0x34c] sm:$0xf]  ;;  %1139 = vmatpush.bf16.msrb.mxu2 %v3306_v13  ;;  %v3526_v26 = vor.u32 %v3989_v19, %v3525_v18  ;;  %v3274_v27 = vor.u32 %v3921_v20, %v3271_v22  ;;  %v3237_v28 = vld [vmem:[%s6039_s1 + $0x108] sm:$0xf] }
  0x2a   :  { %v3527_v24 = vld [vmem:[%s6039_s1 + $0x368] sm:$0xf0]  ;;  %v3917_v29 = vld [vmem:[%s6039_s1 + $0x124] sm:$0xf0] }
  0x2b   :  { %1096 = vmatpush.bf16.msrb.mxu1 %v3558_v9  ;;  %v3877_v30 = vld [vmem:[%s6040_s0 + $0x44] sm:$0xf0]  ;;  %1182 = vmatpush.bf16.msrb.mxu3 %v3562_v17  ;;  %v3530_v31 = vor.u32 %v3985_v23, %v3527_v24  ;;  %v3087_v35 = vld [vmem:[%s6040_s0 + $0x48] sm:$0xf0]  ;;  %v3238_v38 = vor.u32 %v3917_v29, %v3237_v28  ;;  %v3093_v17 = vld [vmem:[%s6040_s0 + $0x50] sm:$0xf] }
  0x2c   :  { %v3493_v32 = vld [vmem:[%s6039_s1 + $0x308] sm:$0xf]  ;;  %v3913_v39 = vld [vmem:[%s6039_s1 + $0x10c] sm:$0xf]  ;;  %v4504_v41 = vor.u32 %v3877_v30, %v3085_v25  ;;  %v4512_v47 = vor.u32 %v3876_v34, %v3087_v35  ;;  %v3878_v30 = vld [vmem:[%s6040_s0 + $0x54] sm:$0xf] }
  0x2d   :  { %v3981_v33 = vld [vmem:[%s6039_s1 + $0x324] sm:$0xf0]  ;;  %1054 = vmatpush.bf16.msrb.mxu0 %v3270_v21  ;;  %v3239_v40 = vld [vmem:[%s6039_s1 + $0x128] sm:$0xf0]  ;;  %1140 = vmatpush.bf16.msrb.mxu2 %v3274_v27  ;;  %v3879_v27 = vld [vmem:[%s6040_s0 + $0x54] sm:$0xf0] }
  0x2e   :  { %v3494_v44 = vor.u32 %v3981_v33, %v3493_v32  ;;  %v3977_v45 = vld [vmem:[%s6039_s1 + $0x30c] sm:$0xf]  ;;  %v3242_v50 = vor.u32 %v3913_v39, %v3239_v40  ;;  %v3205_v52 = vld [vmem:[%s6039_s1 + $0xc8] sm:$0xf]  ;;  %v4620_v39 = vor.u32 %v3879_v27, %v3093_v17 }
  0x2f   :  { %1097 = vmatpush.bf16.msrb.mxu1 %v3526_v26  ;;  %v3495_v46 = vld [vmem:[%s6039_s1 + $0x328] sm:$0xf0]  ;;  %1183 = vmatpush.bf16.msrb.mxu3 %v3530_v31  ;;  %v3909_v53 = vld [vmem:[%s6039_s1 + $0xe4] sm:$0xf0]  ;;  %v3095_v31 = vld [vmem:[%s6040_s0 + $0x58] sm:$0xf0] }
  0x30   :  { %v3498_v51 = vor.u32 %v3977_v45, %v3495_v46  ;;  %v3461_v56 = vld [vmem:[%s6039_s1 + $0x2c8] sm:$0xf]  ;;  %v3206_v57 = vor.u32 %v3909_v53, %v3205_v52  ;;  %v3905_v59 = vld [vmem:[%s6039_s1 + $0xcc] sm:$0xf]  ;;  %v4628_v46 = vor.u32 %v3878_v30, %v3095_v31  ;;  %v44_v52 = vld [vmem:[%s6040_s0 + $0x60] sm:$0x11] }
  0x31   :  { %1055 = vmatpush.bf16.msrb.mxu0 %v3238_v38  ;;  %v3973_v58 = vld [vmem:[%s6039_s1 + $0x2e4] sm:$0xf0]  ;;  %v3207_v60 = vld [vmem:[%s6039_s1 + $0xe8] sm:$0xf0]  ;;  %1141 = vmatpush.bf16.msrb.mxu2 %v3242_v50  ;;  %v210_v53 = vunpack.c.l.b16 %v44_v52 }
  0x32   :  { %v3462_v61 = vor.u32 %v3973_v58, %v3461_v56  ;;  %v3210_v62 = vor.u32 %v3905_v59, %v3207_v60  ;;  %v3969_v63 = vld [vmem:[%s6039_s1 + $0x2cc] sm:$0xf]  ;;  %v3173_v1 = vld [vmem:[%s6039_s1 + $0x88] sm:$0xf]  ;;  %v211_v56 = vunpack.c.h.b16 %v44_v52  ;;  %v3597_v52 = vld [vmem:[%s6039_s1 + $0x3d0] sm:$0xf] }
  0x33   :  { %1098 = vmatpush.bf16.msrb.mxu1 %v3494_v44  ;;  %v3463_v0 = vld [vmem:[%s6039_s1 + $0x2e8] sm:$0xf0]  ;;  %1184 = vmatpush.bf16.msrb.mxu3 %v3498_v51  ;;  %v3901_v3 = vld [vmem:[%s6039_s1 + $0xa4] sm:$0xf0] }
  0x34   :  { %893 = vmatmul.bf16.gmra.mxu0 %v4354_v42  ;;  %979 = vmatmul.bf16.gmra.mxu2 %v4354_v42  ;;  %v3466_v2 = vor.u32 %v3969_v63, %v3463_v0  ;;  %v3429_v4 = vld [vmem:[%s6039_s1 + $0x288] sm:$0xf]  ;;  %v3174_v6 = vor.u32 %v3901_v3, %v3173_v1  ;;  %v3897_v8 = vld [vmem:[%s6039_s1 + $0x8c] sm:$0xf]  ;;  %v4639_v58 = vpack.c.b16 %v211_v56, %v211_v56  ;;  %v3938_v56 = vld [vmem:[%s6039_s1 + $0x1d4] sm:$0xf] }
  0x35   :  { %1056 = vmatpush.bf16.msrb.mxu0 %v3206_v57  ;;  %v3965_v5 = vld [vmem:[%s6039_s1 + $0x2a4] sm:$0xf0]  ;;  %v3175_v9 = vld [vmem:[%s6039_s1 + $0xa8] sm:$0xf0]  ;;  %1142 = vmatpush.bf16.msrb.mxu2 %v3210_v62  ;;  %v4637_v57 = vpack.c.b16 %v210_v53, %v210_v53  ;;  %v4006_v53 = vld [vmem:[%s6039_s1 + $0x3ec] sm:$0xf0] }
  0x36   :  { %936 = vmatmul.bf16.gmra.mxu1 %v4356_v43  ;;  %1022 = vmatmul.bf16.gmra.mxu3 %v4356_v43  ;;  %v3430_v7 = vor.u32 %v3965_v5, %v3429_v4  ;;  %v3961_v10 = vld [vmem:[%s6039_s1 + $0x28c] sm:$0xf]  ;;  %v3141_v12 = vld [vmem:[%s6039_s1 + $0x48] sm:$0xf]  ;;  %v3178_v14 = vor.u32 %v3897_v8, %v3175_v9 }
  0x37   :  { %1099 = vmatpush.bf16.msrb.mxu1 %v3462_v61  ;;  %v3431_v11 = vld [vmem:[%s6039_s1 + $0x2a8] sm:$0xf0]  ;;  %v3893_v13 = vld [vmem:[%s6039_s1 + $0x64] sm:$0xf0]  ;;  %1185 = vmatpush.bf16.msrb.mxu3 %v3466_v2 }
  0x38   :  { %v3397_v15 = vld [vmem:[%s6039_s1 + $0x248] sm:$0xf]  ;;  %v3434_v18 = vor.u32 %v3961_v10, %v3431_v11  ;;  %v3142_v19 = vor.u32 %v3893_v13, %v3141_v12  ;;  %v3889_v20 = vld [vmem:[%s6039_s1 + $0x4c] sm:$0xf] }
  0x39   :  { %v3957_v16 = vld [vmem:[%s6039_s1 + $0x264] sm:$0xf0]  ;;  %1057 = vmatpush.bf16.msrb.mxu0 %v3174_v6  ;;  %v3143_v21 = vld [vmem:[%s6039_s1 + $0x68] sm:$0xf0]  ;;  %1143 = vmatpush.bf16.msrb.mxu2 %v3178_v14 }
  0x3a   :  { %v3953_v22 = vld [vmem:[%s6039_s1 + $0x24c] sm:$0xf]  ;;  %v3398_v23 = vor.u32 %v3957_v16, %v3397_v15  ;;  %v3109_v25 = vld [vmem:[%s6039_s1 + $0x8] sm:$0xf]  ;;  %v3146_v32 = vor.u32 %v3889_v20, %v3143_v21 }
  0x3b   :  { %1100 = vmatpush.bf16.msrb.mxu1 %v3430_v7  ;;  %v3399_v24 = vld [vmem:[%s6039_s1 + $0x268] sm:$0xf0]  ;;  %v3885_v26 = vld [vmem:[%s6039_s1 + $0x24] sm:$0xf0]  ;;  %1186 = vmatpush.bf16.msrb.mxu3 %v3434_v18 }
  0x3c   :  { %v3365_v28 = vld [vmem:[%s6039_s1 + $0x208] sm:$0xf]  ;;  %v3402_v33 = vor.u32 %v3953_v22, %v3399_v24  ;;  %v3110_v34 = vor.u32 %v3885_v26, %v3109_v25  ;;  %v3881_v35 = vld [vmem:[%s6039_s1 + $0xc] sm:$0xf] }
  0x3d   :  { %v3949_v29 = vld [vmem:[%s6039_s1 + $0x224] sm:$0xf0]  ;;  %1058 = vmatpush.bf16.msrb.mxu0 %v3142_v19  ;;  %v3111_v38 = vld [vmem:[%s6039_s1 + $0x28] sm:$0xf0]  ;;  %1144 = vmatpush.bf16.msrb.mxu2 %v3146_v32 }
  0x3e   :  { %v3366_v40 = vor.u32 %v3949_v29, %v3365_v28  ;;  %v3945_v44 = vld [vmem:[%s6039_s1 + $0x20c] sm:$0xf]  ;;  %v3114_v50 = vor.u32 %v3881_v35, %v3111_v38 }
  0x3f   :  { %1101 = vmatpush.bf16.msrb.mxu1 %v3398_v23  ;;  %v3367_v45 = vld [vmem:[%s6039_s1 + $0x228] sm:$0xf0]  ;;  %1187 = vmatpush.bf16.msrb.mxu3 %v3402_v33 }
  0x40   :  { %v3370_v51 = vor.u32 %v3945_v44, %v3367_v45  ;;  %v3341_v45 = vld [vmem:[%s6039_s1 + $0x1d0] sm:$0xf] }
  0x41   :  { %1059 = vmatpush.bf16.msrb.mxu0 %v3110_v34  ;;  %1145 = vmatpush.bf16.msrb.mxu2 %v3114_v50  ;;  %v3942_v50 = vld [vmem:[%s6039_s1 + $0x1ec] sm:$0xf0] }
  0x43   :  { %1102 = vmatpush.bf16.msrb.mxu1 %v3366_v40  ;;  %1188 = vmatpush.bf16.msrb.mxu3 %v3370_v51  ;;  %v3342_v51 = vor.u32 %v3942_v50, %v3341_v45  ;;  %v3922_v45 = vld [vmem:[%s6039_s1 + $0x154] sm:$0xf] }
  0x44   :  { %898 = vmatmul.bf16.gmra.mxu0 %v4374_v48  ;;  %984 = vmatmul.bf16.gmra.mxu2 %v4374_v48 }
  0x45   :  { %1224 = vmatpush.bf16.msra.mxu0 %v3342_v51  ;;  %v3279_v51 = vld [vmem:[%s6039_s1 + $0x170] sm:$0xf0] }
  0x46   :  { %941 = vmatmul.bf16.gmra.mxu1 %v4376_v49  ;;  %1027 = vmatmul.bf16.gmra.mxu3 %v4376_v49 }
  0x54   :  { %903 = vmatmul.bf16.gmra.mxu0 %v4394_v54  ;;  %989 = vmatmul.bf16.gmra.mxu2 %v4394_v54 }
  0x56   :  { %946 = vmatmul.bf16.gmra.mxu1 %v4396_v55  ;;  %1032 = vmatmul.bf16.gmra.mxu3 %v4396_v55 }
  0x64   :  { %908 = vmatmul.bf16.gmra.mxu0 %v4504_v41  ;;  %994 = vmatmul.bf16.gmra.mxu2 %v4504_v41 }
  0x66   :  { %951 = vmatmul.bf16.gmra.mxu1 %v4512_v47  ;;  %1037 = vmatmul.bf16.gmra.mxu3 %v4512_v47 }
  0x74   :  { %913 = vmatmul.bf16.gmra.mxu0 %v4620_v39  ;;  %999 = vmatmul.bf16.gmra.mxu2 %v4620_v39 }
  0x76   :  { %956 = vmatmul.bf16.gmra.mxu1 %v4628_v46  ;;  %1042 = vmatmul.bf16.gmra.mxu3 %v4628_v46 }
  0x84   :  { %918 = vmatmul.bf16.gmra.mxu0 %v4637_v57  ;;  %1004 = vmatmul.bf16.gmra.mxu2 %v4637_v57 }
  0x86   :  { %961 = vmatmul.bf16.gmra.mxu1 %v4639_v58  ;;  %1047 = vmatmul.bf16.gmra.mxu3 %v4639_v58 }
  0x94   :  { %1060 = vmatmul.bf16.vlgmr.msrb.gmra.mxu0 %v4334_v36  ;;  %1146 = vmatmul.bf16.vlgmr.msrb.gmra.mxu2 %v4334_v36 }
  0x96   :  { %1103 = vmatmul.bf16.vlgmr.msrb.gmra.mxu1 %v4336_v37  ;;  %1189 = vmatmul.bf16.vlgmr.msrb.gmra.mxu3 %v4336_v37 }
  0xa1   :  { %v889_v59 = vpop.f32.mrf.mxu0 }
  0xa3   :  { %v932_v60 = vpop.f32.mrf.mxu1 }
  0xa4   :  { %v933_v61 = vadd.f32 %v932_v60, %v889_v59  ;;  %1065 = vmatmul.bf16.gmra.mxu0 %v4354_v42  ;;  %1151 = vmatmul.bf16.gmra.mxu2 %v4354_v42 }
  0xa6   :  { %1108 = vmatmul.bf16.gmra.mxu1 %v4356_v43  ;;  %1194 = vmatmul.bf16.gmra.mxu3 %v4356_v43  ;;  %v1672_v3 = vmul.f32 0.2, %v933_v61  ;;  %vm1568_vm0 = vcmp.ge.f32.partialorder %v933_v61, 0.0 }
  0xa7   :  { %v975_v62 = vpop.f32.mrf.mxu2 }
  0xa8   :  { %v4653_v6 = vsel %vm1568_vm0, %v933_v61, %v1672_v3  ;;  %v3598_v61 = vor.u32 %v4006_v53, %v3597_v52  ;;  %v3986_v52 = vld [vmem:[%s6039_s1 + $0x354] sm:$0xf] }
  0xa9   :  { %v1018_v63 = vpop.f32.mrf.mxu3  ;;  %v891_v0 = vpop.f32.mrf.mxu0  ;;  %v3535_v53 = vld [vmem:[%s6039_s1 + $0x370] sm:$0xf0] }
  0xaa   :  { %v1019_v1 = vadd.f32 %v1018_v63, %v975_v62  ;;  %v3343_v62 = vld [vmem:[%s6039_s1 + $0x1f0] sm:$0xf0]  ;;  %1267 = vmatpush.bf16.msra.mxu1 %v3598_v61 }
  0xab   :  { %v934_v2 = vpop.f32.mrf.mxu1  ;;  %v4002_v63 = vld [vmem:[%s6039_s1 + $0x3d4] sm:$0xf]  ;;  %v3346_v3 = vor.u32 %v3938_v56, %v3343_v62 }
  0xac   :  { %v935_v4 = vadd.f32 %v934_v2, %v891_v0  ;;  %v1673_v12 = vmul.f32 0.2, %v1019_v1  ;;  %vm1569_vm2 = vcmp.ge.f32.partialorder %v1019_v1, 0.0  ;;  %v3599_v0 = vld [vmem:[%s6039_s1 + $0x3f0] sm:$0xf0] }
  0xad   :  { %1310 = vmatpush.bf16.msra.mxu2 %v3346_v3  ;;  %v3918_v3 = vld [vmem:[%s6039_s1 + $0x12c] sm:$0xf0] }
  0xae   :  { %vm1576_vm1 = vcmp.ge.f32.partialorder %v935_v4, 0.0  ;;  %v1680_v5 = vmul.f32 0.2, %v935_v4  ;;  %v4662_v17 = vsel %vm1569_vm2, %v1019_v1, %v1673_v12 }
  0xaf   :  { %v977_v9 = vpop.f32.mrf.mxu2 }
  0xb0   :  { %v4655_v7 = vsel %vm1576_vm1, %v935_v4, %v1680_v5  ;;  %v3602_v4 = vor.u32 %v4002_v63, %v3599_v0  ;;  %v3309_v5 = vld [vmem:[%s6039_s1 + $0x190] sm:$0xf]  ;;  %v3282_v63 = vor.u32 %v3922_v45, %v3279_v51  ;;  %v3538_v0 = vor.u32 %v3986_v52, %v3535_v53  ;;  %v3215_v51 = vld [vmem:[%s6039_s1 + $0xf0] sm:$0xf0] }
  0xb1   :  { %v1020_v10 = vpop.f32.mrf.mxu3  ;;  %v894_v11 = vpop.f32.mrf.mxu0  ;;  %v3970_v52 = vld [vmem:[%s6039_s1 + $0x2d4] sm:$0xf] }
  0xb2   :  { %v1021_v13 = vadd.f32 %v1020_v10, %v977_v9  ;;  %v3934_v9 = vld [vmem:[%s6039_s1 + $0x1ac] sm:$0xf0]  ;;  %1353 = vmatpush.bf16.msra.mxu3 %v3602_v4  ;;  %v3471_v53 = vld [vmem:[%s6039_s1 + $0x2f0] sm:$0xf0] }
  0xb3   :  { %v937_v14 = vpop.f32.mrf.mxu1  ;;  %v3565_v10 = vld [vmem:[%s6039_s1 + $0x390] sm:$0xf] }
  0xb4   :  { %v938_v15 = vadd.f32 %v937_v14, %v894_v11  ;;  %vm1577_vm3 = vcmp.ge.f32.partialorder %v1021_v13, 0.0  ;;  %v1681_v16 = vmul.f32 0.2, %v1021_v13  ;;  %1070 = vmatmul.bf16.gmra.mxu0 %v4374_v48  ;;  %1156 = vmatmul.bf16.gmra.mxu2 %v4374_v48  ;;  %v3998_v14 = vld [vmem:[%s6039_s1 + $0x3ac] sm:$0xf0] }
  0xb5   :  { %v3501_v4 = vld [vmem:[%s6039_s1 + $0x310] sm:$0xf] }
  0xb6   :  { %1113 = vmatmul.bf16.gmra.mxu1 %v4376_v49  ;;  %v4664_v18 = vsel %vm1577_vm3, %v1021_v13, %v1681_v16  ;;  %1199 = vmatmul.bf16.gmra.mxu3 %v4376_v49  ;;  %v1688_v25 = vmul.f32 0.2, %v938_v15  ;;  %vm1584_vm4 = vcmp.ge.f32.partialorder %v938_v15, 0.0  ;;  %v3310_v13 = vor.u32 %v3934_v9, %v3309_v5  ;;  %v3311_v16 = vld [vmem:[%s6039_s1 + $0x1b0] sm:$0xf0] }
  0xb7   :  { %v980_v20 = vpop.f32.mrf.mxu2 }
  0xb8   :  { %v4669_v28 = vsel %vm1584_vm4, %v938_v15, %v1688_v25  ;;  %v3930_v15 = vld [vmem:[%s6039_s1 + $0x194] sm:$0xf]  ;;  %1225 = vmatpush.bf16.msra.mxu0 %v3310_v13 }
  0xb9   :  { %v1023_v21 = vpop.f32.mrf.mxu3  ;;  %v896_v22 = vpop.f32.mrf.mxu0  ;;  %v3567_v25 = vld [vmem:[%s6039_s1 + $0x3b0] sm:$0xf0] }
  0xba   :  { %v1024_v23 = vadd.f32 %v1023_v21, %v980_v20 }
  0xbb   :  { %v939_v24 = vpop.f32.mrf.mxu1 }
  0xbc   :  { %v940_v26 = vadd.f32 %v939_v24, %v896_v22  ;;  %v1689_v34 = vmul.f32 0.2, %v1024_v23  ;;  %vm1585_vm6 = vcmp.ge.f32.partialorder %v1024_v23, 0.0  ;;  %v3566_v22 = vor.u32 %v3998_v14, %v3565_v10  ;;  %v3994_v24 = vld [vmem:[%s6039_s1 + $0x394] sm:$0xf] }
  0xbd   :  { %v3982_v10 = vld [vmem:[%s6039_s1 + $0x32c] sm:$0xf0] }
  0xbe   :  { %vm1592_vm5 = vcmp.ge.f32.partialorder %v940_v26, 0.0  ;;  %v1696_v27 = vmul.f32 0.2, %v940_v26  ;;  %v4696_v59 = vsel %vm1585_vm6, %v1024_v23, %v1689_v34  ;;  %v3314_v23 = vor.u32 %v3930_v15, %v3311_v16  ;;  %1268 = vmatpush.bf16.msra.mxu1 %v3566_v22  ;;  %v3926_v34 = vld [vmem:[%s6039_s1 + $0x16c] sm:$0xf0] }
  0xbf   :  { %v982_v30 = vpop.f32.mrf.mxu2  ;;  %v3503_v22 = vld [vmem:[%s6039_s1 + $0x330] sm:$0xf0] }
  0xc0   :  { %v4671_v29 = vsel %vm1592_vm5, %v940_v26, %v1696_v27  ;;  %1311 = vmatpush.bf16.msra.mxu2 %v3314_v23 }
  0xc1   :  { %v1025_v32 = vpop.f32.mrf.mxu3  ;;  %v899_v33 = vpop.f32.mrf.mxu0 }
  0xc2   :  { %v1026_v35 = vadd.f32 %v1025_v32, %v982_v30  ;;  %v3570_v30 = vor.u32 %v3994_v24, %v3567_v25  ;;  %v3277_v32 = vld [vmem:[%s6039_s1 + $0x150] sm:$0xf]  ;;  %v3502_v24 = vor.u32 %v3982_v10, %v3501_v4 }
  0xc3   :  { %v942_v38 = vpop.f32.mrf.mxu1  ;;  %v3437_v4 = vld [vmem:[%s6039_s1 + $0x290] sm:$0xf] }
  0xc4   :  { %v4675_v40 = vadd.f32 %v942_v38, %v899_v33  ;;  %vm1593_vm7 = vcmp.ge.f32.partialorder %v1026_v35, 0.0  ;;  %v1697_v44 = vmul.f32 0.2, %v1026_v35  ;;  %1075 = vmatmul.bf16.gmra.mxu0 %v4394_v54  ;;  %1161 = vmatmul.bf16.gmra.mxu2 %v4394_v54  ;;  %v3533_v38 = vld [vmem:[%s6039_s1 + $0x350] sm:$0xf] }
  0xc5   :  { %1354 = vmatpush.bf16.msra.mxu3 %v3570_v30  ;;  %1312 = vmatpush.bf16.msra.mxu2 %v3282_v63  ;;  %v3213_v30 = vld [vmem:[%s6039_s1 + $0xd0] sm:$0xf] }
  0xc6   :  { %1118 = vmatmul.bf16.gmra.mxu1 %v4396_v55  ;;  %1204 = vmatmul.bf16.gmra.mxu3 %v4396_v55  ;;  %v4698_v60 = vsel %vm1593_vm7, %v1026_v35, %v1697_v44  ;;  %v1704_v26 = vmul.f32 0.2, %v4675_v40  ;;  %vm1600_vm8 = vcmp.ge.f32.partialorder %v4675_v40, 0.0  ;;  %v3278_v35 = vor.u32 %v3926_v34, %v3277_v32  ;;  %v3990_v44 = vld [vmem:[%s6039_s1 + $0x36c] sm:$0xf0] }
  0xc7   :  { %v985_v2 = vpop.f32.mrf.mxu2  ;;  %v3534_v50 = vor.u32 %v3990_v44, %v3533_v38  ;;  %v3910_v32 = vld [vmem:[%s6039_s1 + $0xec] sm:$0xf0]  ;;  %v3906_v38 = vld [vmem:[%s6039_s1 + $0xd4] sm:$0xf] }
  0xc8   :  { %v4766_v56 = vsel %vm1600_vm8, %v4675_v40, %v1704_v26  ;;  %1226 = vmatpush.bf16.msra.mxu0 %v3278_v35  ;;  %v3469_v34 = vld [vmem:[%s6039_s1 + $0x2d0] sm:$0xf]  ;;  %v3218_v63 = vor.u32 %v3906_v38, %v3215_v51 }
  0xc9   :  { %v1028_v11 = vpop.f32.mrf.mxu3  ;;  %v901_v12 = vpop.f32.mrf.mxu0  ;;  %1269 = vmatpush.bf16.msra.mxu1 %v3534_v50  ;;  %1355 = vmatpush.bf16.msra.mxu3 %v3538_v0  ;;  %v3974_v35 = vld [vmem:[%s6039_s1 + $0x2ec] sm:$0xf0]  ;;  %v3474_v0 = vor.u32 %v3970_v52, %v3471_v53  ;;  %v3151_v52 = vld [vmem:[%s6039_s1 + $0x70] sm:$0xf0] }
  0xca   :  { %v4729_v20 = vadd.f32 %v1028_v11, %v985_v2  ;;  %v3245_v2 = vld [vmem:[%s6039_s1 + $0x110] sm:$0xf]  ;;  %v3914_v11 = vld [vmem:[%s6039_s1 + $0x114] sm:$0xf]  ;;  %v3470_v50 = vor.u32 %v3974_v35, %v3469_v34 }
  0xcb   :  { %v944_v21 = vpop.f32.mrf.mxu1  ;;  %v3246_v16 = vor.u32 %v3918_v3, %v3245_v2  ;;  %v3181_v2 = vld [vmem:[%s6039_s1 + $0x90] sm:$0xf]  ;;  %v3954_v53 = vld [vmem:[%s6039_s1 + $0x254] sm:$0xf] }
  0xcc   :  { %v945_v27 = vadd.f32 %v944_v21, %v901_v12  ;;  %v3247_v12 = vld [vmem:[%s6039_s1 + $0x130] sm:$0xf0]  ;;  %v1705_v13 = vmul.f32 0.2, %v4729_v20  ;;  %vm1601_vm10 = vcmp.ge.f32.partialorder %v4729_v20, 0.0 }
  0xcd   :  { %v3978_v21 = vld [vmem:[%s6039_s1 + $0x314] sm:$0xf]  ;;  %v3250_v25 = vor.u32 %v3914_v11, %v3247_v12  ;;  %1227 = vmatpush.bf16.msra.mxu0 %v3246_v16  ;;  %1270 = vmatpush.bf16.msra.mxu1 %v3502_v24  ;;  %v3902_v3 = vld [vmem:[%s6039_s1 + $0xac] sm:$0xf0] }
  0xce   :  { %vm1608_vm9 = vcmp.ge.f32.partialorder %v945_v27, 0.0  ;;  %v1712_v33 = vmul.f32 0.2, %v945_v27  ;;  %v4822_v44 = vsel %vm1601_vm10, %v4729_v20, %v1705_v13  ;;  %v3966_v10 = vld [vmem:[%s6039_s1 + $0x2ac] sm:$0xf0] }
  0xcf   :  { %v987_v62 = vpop.f32.mrf.mxu2  ;;  %1313 = vmatpush.bf16.msra.mxu2 %v3250_v25  ;;  %v3898_v11 = vld [vmem:[%s6039_s1 + $0x94] sm:$0xf]  ;;  %v3438_v25 = vor.u32 %v3966_v10, %v3437_v4  ;;  %v3405_v35 = vld [vmem:[%s6039_s1 + $0x250] sm:$0xf] }
  0xd0   :  { %v4768_v61 = vsel %vm1608_vm9, %v945_v27, %v1712_v33  ;;  %v3506_v27 = vor.u32 %v3978_v21, %v3503_v22  ;;  %v3214_v33 = vor.u32 %v3910_v32, %v3213_v30  ;;  %v3183_v12 = vld [vmem:[%s6039_s1 + $0xb0] sm:$0xf0]  ;;  %v3149_v30 = vld [vmem:[%s6039_s1 + $0x50] sm:$0xf] }
  0xd1   :  { %v1030_v5 = vpop.f32.mrf.mxu3  ;;  %v904_v9 = vpop.f32.mrf.mxu0  ;;  %v3962_v16 = vld [vmem:[%s6039_s1 + $0x294] sm:$0xf]  ;;  %1271 = vmatpush.bf16.msra.mxu1 %v3470_v50  ;;  %v3958_v38 = vld [vmem:[%s6039_s1 + $0x26c] sm:$0xf0] }
  0xd2   :  { %v1031_v14 = vadd.f32 %v1030_v5, %v987_v62  ;;  %1356 = vmatpush.bf16.msra.mxu3 %v3506_v27  ;;  %1228 = vmatpush.bf16.msra.mxu0 %v3214_v33  ;;  %v3439_v21 = vld [vmem:[%s6039_s1 + $0x2b0] sm:$0xf0]  ;;  %v3894_v33 = vld [vmem:[%s6039_s1 + $0x6c] sm:$0xf0]  ;;  %v3406_v51 = vor.u32 %v3958_v38, %v3405_v35 }
  0xd3   :  { %v947_v15 = vpop.f32.mrf.mxu1  ;;  %1314 = vmatpush.bf16.msra.mxu2 %v3218_v63  ;;  %v3442_v27 = vor.u32 %v3962_v16, %v3439_v21  ;;  %v3150_v34 = vor.u32 %v3894_v33, %v3149_v30  ;;  %v3890_v50 = vld [vmem:[%s6039_s1 + $0x54] sm:$0xf]  ;;  %v3373_v10 = vld [vmem:[%s6039_s1 + $0x210] sm:$0xf] }
  0xd4   :  { %v4798_v23 = vadd.f32 %v947_v15, %v904_v9  ;;  %vm1609_vm11 = vcmp.ge.f32.partialorder %v1031_v14, 0.0  ;;  %v1713_v26 = vmul.f32 0.2, %v1031_v14  ;;  %1080 = vmatmul.bf16.gmra.mxu0 %v4504_v41  ;;  %1166 = vmatmul.bf16.gmra.mxu2 %v4504_v41  ;;  %v3182_v15 = vor.u32 %v3902_v3, %v3181_v2  ;;  %v3119_v16 = vld [vmem:[%s6039_s1 + $0x30] sm:$0xf0] }
  0xd5   :  { %1272 = vmatpush.bf16.msra.mxu1 %v3438_v25  ;;  %v3154_v3 = vor.u32 %v3890_v50, %v3151_v52 }
  0xd6   :  { %1123 = vmatmul.bf16.gmra.mxu1 %v4512_v47  ;;  %1209 = vmatmul.bf16.gmra.mxu3 %v4512_v47  ;;  %v4824_v45 = vsel %vm1609_vm11, %v1031_v14, %v1713_v26  ;;  %v1720_v22 = vmul.f32 0.2, %v4798_v23  ;;  %v3186_v26 = vor.u32 %v3898_v11, %v3183_v12  ;;  %vm1616_vm12 = vcmp.ge.f32.partialorder %v4798_v23, 0.0 }
  0xd7   :  { %v990_v62 = vpop.f32.mrf.mxu2  ;;  %1357 = vmatpush.bf16.msra.mxu3 %v3474_v0  ;;  %1229 = vmatpush.bf16.msra.mxu0 %v3182_v15  ;;  %v3882_v15 = vld [vmem:[%s6039_s1 + $0x14] sm:$0xf] }
  0xd8   :  { %1315 = vmatpush.bf16.msra.mxu2 %v3186_v26  ;;  %v4892_v63 = vsel %vm1616_vm12, %v4798_v23, %v1720_v22  ;;  %v3946_v26 = vld [vmem:[%s6039_s1 + $0x214] sm:$0xf]  ;;  %v3122_v33 = vor.u32 %v3882_v15, %v3119_v16 }
  0xd9   :  { %v1033_v5 = vpop.f32.mrf.mxu3  ;;  %v906_v9 = vpop.f32.mrf.mxu0  ;;  %1273 = vmatpush.bf16.msra.mxu1 %v3406_v51 }
  0xda   :  { %v4855_v13 = vadd.f32 %v1033_v5, %v990_v62  ;;  %v3407_v62 = vld [vmem:[%s6039_s1 + $0x270] sm:$0xf0]  ;;  %v3117_v5 = vld [vmem:[%s6039_s1 + $0x10] sm:$0xf] }
  0xdb   :  { %v949_v14 = vpop.f32.mrf.mxu1  ;;  %1358 = vmatpush.bf16.msra.mxu3 %v3442_v27  ;;  %v3410_v4 = vor.u32 %v3954_v53, %v3407_v62  ;;  %1230 = vmatpush.bf16.msra.mxu0 %v3150_v34  ;;  %v3375_v27 = vld [vmem:[%s6039_s1 + $0x230] sm:$0xf0] }
  0xdc   :  { %v950_v24 = vadd.f32 %v949_v14, %v906_v9  ;;  %v3886_v9 = vld [vmem:[%s6039_s1 + $0x2c] sm:$0xf0]  ;;  %v1721_v21 = vmul.f32 0.2, %v4855_v13  ;;  %vm1617_vm14 = vcmp.ge.f32.partialorder %v4855_v13, 0.0  ;;  %1316 = vmatpush.bf16.msra.mxu2 %v3154_v3  ;;  %v3378_v34 = vor.u32 %v3946_v26, %v3375_v27 }
  0xdd   :  { %v3950_v14 = vld [vmem:[%s6039_s1 + $0x22c] sm:$0xf0]  ;;  %v3118_v25 = vor.u32 %v3886_v9, %v3117_v5 }
  0xde   :  { %vm1624_vm13 = vcmp.ge.f32.partialorder %v950_v24, 0.0  ;;  %v1728_v32 = vmul.f32 0.2, %v950_v24  ;;  %v4929_v38 = vsel %vm1617_vm14, %v4855_v13, %v1721_v21 }
  0xdf   :  { %v992_v2 = vpop.f32.mrf.mxu2  ;;  %1359 = vmatpush.bf16.msra.mxu3 %v3410_v4  ;;  %1231 = vmatpush.bf16.msra.mxu0 %v3118_v25  ;;  %6074 = vst [vmem:[#allocation3_spill] sm:$0xff] %v4929_v38 }
  0xe0   :  { %v4894_v0 = vsel %vm1624_vm13, %v950_v24, %v1728_v32  ;;  %v3374_v32 = vor.u32 %v3950_v14, %v3373_v10  ;;  %1317 = vmatpush.bf16.msra.mxu2 %v3122_v33 }
  0xe1   :  { %v1035_v11 = vpop.f32.mrf.mxu3  ;;  %v909_v12 = vpop.f32.mrf.mxu0 }
  0xe2   :  { %v1036_v22 = vadd.f32 %v1035_v11, %v992_v2  ;;  %1274 = vmatpush.bf16.msra.mxu1 %v3374_v32 }
  0xe3   :  { %v952_v24 = vpop.f32.mrf.mxu1  ;;  %1360 = vmatpush.bf16.msra.mxu3 %v3378_v34 }
  0xe4   :  { %v953_v30 = vadd.f32 %v952_v24, %v909_v12  ;;  %vm1625_vm15 = vcmp.ge.f32.partialorder %v1036_v22, 0.0  ;;  %v1729_v35 = vmul.f32 0.2, %v1036_v22  ;;  %1085 = vmatmul.bf16.gmra.mxu0 %v4620_v39  ;;  %1171 = vmatmul.bf16.gmra.mxu2 %v4620_v39 }
  0xe6   :  { %1128 = vmatmul.bf16.gmra.mxu1 %v4628_v46  ;;  %1214 = vmatmul.bf16.gmra.mxu3 %v4628_v46  ;;  %v4931_v50 = vsel %vm1625_vm15, %v1036_v22, %v1729_v35  ;;  %v1736_v4 = vmul.f32 0.2, %v953_v30  ;;  %vm1632_vm0 = vcmp.ge.f32.partialorder %v953_v30, 0.0 }
  0xe7   :  { %v995_v52 = vpop.f32.mrf.mxu2 }
  0xe8   :  { %v4935_v13 = vsel %vm1632_vm0, %v953_v30, %v1736_v4 }
  0xe9   :  { %v1038_v53 = vpop.f32.mrf.mxu3  ;;  %v911_v62 = vpop.f32.mrf.mxu0  ;;  %6075 = vst [vmem:[#allocation4_spill] sm:$0xff] %v4935_v13 }
  0xea   :  { %v1039_v2 = vadd.f32 %v1038_v53, %v995_v52 }
  0xeb   :  { %v954_v3 = vpop.f32.mrf.mxu1 }
  0xec   :  { %v955_v5 = vadd.f32 %v954_v3, %v911_v62  ;;  %v1737_v16 = vmul.f32 0.2, %v1039_v2  ;;  %vm1633_vm2 = vcmp.ge.f32.partialorder %v1039_v2, 0.0 }
  0xee   :  { %vm1640_vm1 = vcmp.ge.f32.partialorder %v955_v5, 0.0  ;;  %v1744_v9 = vmul.f32 0.2, %v955_v5  ;;  %v4945_v26 = vsel %vm1633_vm2, %v1039_v2, %v1737_v16 }
  0xef   :  { %v997_v11 = vpop.f32.mrf.mxu2  ;;  %6077 = vst [vmem:[#allocation6_spill] sm:$0xff] %v4945_v26 }
  0xf0   :  { %v4937_v10 = vsel %vm1640_vm1, %v955_v5, %v1744_v9 }
  0xf1   :  { %6076 = vst [vmem:[#allocation5_spill] sm:$0xff] %v4937_v10  ;;  %v1040_v14 = vpop.f32.mrf.mxu3  ;;  %v914_v15 = vpop.f32.mrf.mxu0 }
  0xf2   :  { %v1041_v21 = vadd.f32 %v1040_v14, %v997_v11 }
  0xf3   :  { %v957_v22 = vpop.f32.mrf.mxu1 }
  0xf4   :  { %v958_v24 = vadd.f32 %v957_v22, %v914_v15  ;;  %vm1641_vm3 = vcmp.ge.f32.partialorder %v1041_v21, 0.0  ;;  %v1745_v25 = vmul.f32 0.2, %v1041_v21  ;;  %1090 = vmatmul.bf16.gmra.mxu0 %v4637_v57  ;;  %1176 = vmatmul.bf16.gmra.mxu2 %v4637_v57 }
  0xf6   :  { %1133 = vmatmul.bf16.gmra.mxu1 %v4639_v58  ;;  %1219 = vmatmul.bf16.gmra.mxu3 %v4639_v58  ;;  %v4947_v27 = vsel %vm1641_vm3, %v1041_v21, %v1745_v25  ;;  %v1752_v53 = vmul.f32 0.2, %v958_v24  ;;  %vm1648_vm4 = vcmp.ge.f32.partialorder %v958_v24, 0.0 }
  0xf7   :  { %6078 = vst [vmem:[#allocation7_spill] sm:$0xff] %v4947_v27  ;;  %v1000_v32 = vpop.f32.mrf.mxu2 }
  0xf8   :  { %v4951_v4 = vsel %vm1648_vm4, %v958_v24, %v1752_v53 }
  0xf9   :  { %v1043_v33 = vpop.f32.mrf.mxu3  ;;  %v916_v35 = vpop.f32.mrf.mxu0  ;;  %6079 = vst [vmem:[#allocation8_spill] sm:$0xff] %v4951_v4 }
  0xfa   :  { %v1044_v34 = vadd.f32 %v1043_v33, %v1000_v32 }
  0xfb   :  { %v959_v52 = vpop.f32.mrf.mxu1 }
  0xfc   :  { %v960_v62 = vadd.f32 %v959_v52, %v916_v35  ;;  %v1753_v15 = vmul.f32 0.2, %v1044_v34  ;;  %vm1649_vm6 = vcmp.ge.f32.partialorder %v1044_v34, 0.0 }
  0xfe   :  { %vm1656_vm5 = vcmp.ge.f32.partialorder %v960_v62, 0.0  ;;  %v1760_v3 = vmul.f32 0.2, %v960_v62  ;;  %v4963_v24 = vsel %vm1649_vm6, %v1044_v34, %v1753_v15 }
  0xff   :  { %v1002_v2 = vpop.f32.mrf.mxu2  ;;  %6082 = vst [vmem:[#allocation11_spill] sm:$0xff] %v4963_v24 }
 0x100   :  { %v4953_v5 = vsel %vm1656_vm5, %v960_v62, %v1760_v3 }
 0x101   :  { %6080 = vst [vmem:[#allocation9_spill] sm:$0xff] %v4953_v5  ;;  %v1045_v11 = vpop.f32.mrf.mxu3  ;;  %v919_v14 = vpop.f32.mrf.mxu0 }
 0x102   :  { %v1046_v16 = vadd.f32 %v1045_v11, %v1002_v2 }
 0x103   :  { %v962_v21 = vpop.f32.mrf.mxu1 }
 0x104   :  { %v4957_v22 = vadd.f32 %v962_v21, %v919_v14  ;;  %vm1657_vm7 = vcmp.ge.f32.partialorder %v1046_v16, 0.0  ;;  %v1761_v25 = vmul.f32 0.2, %v1046_v16  ;;  %1232 = vmatmul.bf16.vlgmr.msra.gmra.mxu0 %v4334_v36  ;;  %1318 = vmatmul.bf16.vlgmr.msra.gmra.mxu2 %v4334_v36 }
 0x106   :  { %6081 = vst [vmem:[#allocation10_spill] sm:$0xff] %v4957_v22  ;;  %1275 = vmatmul.bf16.vlgmr.msra.gmra.mxu1 %v4336_v37  ;;  %1361 = vmatmul.bf16.vlgmr.msra.gmra.mxu3 %v4336_v37  ;;  %v4965_v32 = vsel %vm1657_vm7, %v1046_v16, %v1761_v25 }
 0x107   :  { %6083 = vst [vmem:[#allocation12_spill] sm:$0xff] %v4965_v32  ;;  %v1005_v35 = vpop.f32.mrf.mxu2 }
 0x109   :  { %v1048_v52 = vpop.f32.mrf.mxu3  ;;  %v921_v53 = vpop.f32.mrf.mxu0 }
 0x10a   :  { %v4969_v62 = vadd.f32 %v1048_v52, %v1005_v35 }
 0x10b   :  { %v964_v3 = vpop.f32.mrf.mxu1 }
 0x10c   :  { %6084 = vst [vmem:[#allocation13_spill] sm:$0xff] %v4969_v62 }
 0x10f   :  { %v1007_v2 = vpop.f32.mrf.mxu2 }
 0x111   :  { %v1050_v11 = vpop.f32.mrf.mxu3  ;;  %v1061_v14 = vpop.f32.mrf.mxu0 }
 0x113   :  { %v1104_v21 = vpop.f32.mrf.mxu1 }
 0x114   :  { %v1105_v9 = vadd.f32 %v1104_v21, %v1061_v14  ;;  %1237 = vmatmul.bf16.gmra.mxu0 %v4354_v42  ;;  %1323 = vmatmul.bf16.gmra.mxu2 %v4354_v42 }
 0x116   :  { %1280 = vmatmul.bf16.gmra.mxu1 %v4356_v43  ;;  %1366 = vmatmul.bf16.gmra.mxu3 %v4356_v43  ;;  %v1674_v52 = vmul.f32 0.2, %v1105_v9  ;;  %vm1570_vm8 = vcmp.ge.f32.partialorder %v1105_v9, 0.0 }
 0x117   :  { %v1147_v34 = vpop.f32.mrf.mxu2 }
 0x118   :  { %v4975_v2 = vsel %vm1570_vm8, %v1105_v9, %v1674_v52 }
 0x119   :  { %v1190_v15 = vpop.f32.mrf.mxu3  ;;  %v1063_v16 = vpop.f32.mrf.mxu0 }
 0x11a   :  { %v1191_v25 = vadd.f32 %v1190_v15, %v1147_v34 }
 0x11b   :  { %v1106_v35 = vpop.f32.mrf.mxu1 }
 0x11c   :  { %v1107_v53 = vadd.f32 %v1106_v35, %v1063_v16  ;;  %v1675_v12 = vmul.f32 0.2, %v1191_v25  ;;  %vm1571_vm10 = vcmp.ge.f32.partialorder %v1191_v25, 0.0 }
 0x11e   :  { %vm1578_vm9 = vcmp.ge.f32.partialorder %v1107_v53, 0.0  ;;  %v1682_v3 = vmul.f32 0.2, %v1107_v53  ;;  %v4984_v9 = vsel %vm1571_vm10, %v1191_v25, %v1675_v12 }
 0x11f   :  { %v1149_v21 = vpop.f32.mrf.mxu2 }
 0x120   :  { %v4977_v11 = vsel %vm1578_vm9, %v1107_v53, %v1682_v3 }
 0x121   :  { %v1192_v33 = vpop.f32.mrf.mxu3  ;;  %v1066_v30 = vpop.f32.mrf.mxu0 }
 0x122   :  { %v1193_v51 = vadd.f32 %v1192_v33, %v1149_v21 }
 0x123   :  { %v1109_v23 = vpop.f32.mrf.mxu1 }
 0x124   :  { %v1110_v34 = vadd.f32 %v1109_v23, %v1066_v30  ;;  %vm1579_vm11 = vcmp.ge.f32.partialorder %v1193_v51, 0.0  ;;  %v1683_v15 = vmul.f32 0.2, %v1193_v51  ;;  %1242 = vmatmul.bf16.gmra.mxu0 %v4374_v48  ;;  %1328 = vmatmul.bf16.gmra.mxu2 %v4374_v48 }
 0x126   :  { %1285 = vmatmul.bf16.gmra.mxu1 %v4376_v49  ;;  %v4986_v16 = vsel %vm1579_vm11, %v1193_v51, %v1683_v15  ;;  %1371 = vmatmul.bf16.gmra.mxu3 %v4376_v49  ;;  %v1690_v3 = vmul.f32 0.2, %v1110_v34  ;;  %vm1586_vm12 = vcmp.ge.f32.partialorder %v1110_v34, 0.0 }
 0x127   :  { %v1152_v35 = vpop.f32.mrf.mxu2 }
 0x128   :  { %v4991_v40 = vsel %vm1586_vm12, %v1110_v34, %v1690_v3  ;;  %v3943_v34 = vld [vmem:[%s6039_s1 + $0x1f4] sm:$0xf0] }
 0x129   :  { %v1195_v52 = vpop.f32.mrf.mxu3  ;;  %v1068_v23 = vpop.f32.mrf.mxu0 }
 0x12a   :  { %v1196_v30 = vadd.f32 %v1195_v52, %v1152_v35 }
 0x12b   :  { %v1111_v53 = vpop.f32.mrf.mxu1 }
 0x12c   :  { %v1112_v21 = vadd.f32 %v1111_v53, %v1068_v23  ;;  %v1691_v31 = vmul.f32 0.2, %v1196_v30  ;;  %vm1587_vm14 = vcmp.ge.f32.partialorder %v1196_v30, 0.0  ;;  %v4007_v23 = vld [vmem:[%s6039_s1 + $0x3f4] sm:$0xf0] }
 0x12d   :  { %v3939_v53 = vld [vmem:[%s6039_s1 + $0x1dc] sm:$0xf] }
 0x12e   :  { %vm1594_vm13 = vcmp.ge.f32.partialorder %v1112_v21, 0.0  ;;  %v1698_v20 = vmul.f32 0.2, %v1112_v21  ;;  %v5018_v3 = vsel %vm1587_vm14, %v1196_v30, %v1691_v31 }
 0x12f   :  { %v1154_v51 = vpop.f32.mrf.mxu2 }
 0x130   :  { %v4993_v12 = vsel %vm1594_vm13, %v1112_v21, %v1698_v20  ;;  %v3349_v20 = vld [vmem:[%s6039_s1 + $0x1d8] sm:$0xf] }
 0x131   :  { %v1197_v15 = vpop.f32.mrf.mxu3  ;;  %v1071_v1 = vpop.f32.mrf.mxu0 }
 0x132   :  { %v1198_v33 = vadd.f32 %v1197_v15, %v1154_v51  ;;  %v3351_v15 = vld [vmem:[%s6039_s1 + $0x1f8] sm:$0xf0] }
 0x133   :  { %v1114_v14 = vpop.f32.mrf.mxu1 }
 0x134   :  { %v4997_v35 = vadd.f32 %v1114_v14, %v1071_v1  ;;  %vm1595_vm15 = vcmp.ge.f32.partialorder %v1198_v33, 0.0  ;;  %v1699_v52 = vmul.f32 0.2, %v1198_v33  ;;  %1247 = vmatmul.bf16.gmra.mxu0 %v4394_v54  ;;  %1333 = vmatmul.bf16.gmra.mxu2 %v4394_v54  ;;  %v3350_v1 = vor.u32 %v3943_v34, %v3349_v20  ;;  %v3605_v14 = vld [vmem:[%s6039_s1 + $0x3d8] sm:$0xf] }
 0x135   :  { %v3606_v51 = vor.u32 %v4007_v23, %v3605_v14  ;;  %v4003_v20 = vld [vmem:[%s6039_s1 + $0x3dc] sm:$0xf]  ;;  %v3935_v14 = vld [vmem:[%s6039_s1 + $0x1b4] sm:$0xf0] }
 0x136   :  { %1290 = vmatmul.bf16.gmra.mxu1 %v4396_v55  ;;  %1376 = vmatmul.bf16.gmra.mxu3 %v4396_v55  ;;  %v5020_v21 = vsel %vm1595_vm15, %v1198_v33, %v1699_v52  ;;  %v3607_v34 = vld [vmem:[%s6039_s1 + $0x3f8] sm:$0xf0]  ;;  %v3354_v33 = vor.u32 %v3939_v53, %v3351_v15  ;;  %v3317_v52 = vld [vmem:[%s6039_s1 + $0x198] sm:$0xf]  ;;  %v1706_v22 = vmul.f32 0.2, %v4997_v35 }
 0x137   :  { %v1157_v31 = vpop.f32.mrf.mxu2  ;;  %1396 = vmatpush.bf16.msrb.mxu0 %v3350_v1  ;;  %v3610_v30 = vor.u32 %v4003_v20, %v3607_v34  ;;  %v3573_v23 = vld [vmem:[%s6039_s1 + $0x398] sm:$0xf]  ;;  %1439 = vmatpush.bf16.msrb.mxu1 %v3606_v51  ;;  %v3318_v25 = vor.u32 %v3935_v14, %v3317_v52  ;;  %v3931_v53 = vld [vmem:[%s6039_s1 + $0x19c] sm:$0xf]  ;;  %vm1602_vm0 = vcmp.ge.f32.partialorder %v4997_v35, 0.0 }
 0x138   :  { %v3999_v1 = vld [vmem:[%s6039_s1 + $0x3b4] sm:$0xf0]  ;;  %v3319_v15 = vld [vmem:[%s6039_s1 + $0x1b8] sm:$0xf0]  ;;  %1482 = vmatpush.bf16.msrb.mxu2 %v3354_v33 }
 0x139   :  { %v1200_v19 = vpop.f32.mrf.mxu3  ;;  %v1073_v8 = vpop.f32.mrf.mxu0  ;;  %1525 = vmatpush.bf16.msrb.mxu3 %v3610_v30  ;;  %v3574_v62 = vor.u32 %v3999_v1, %v3573_v23  ;;  %v3322_v51 = vor.u32 %v3931_v53, %v3319_v15  ;;  %v3995_v52 = vld [vmem:[%s6039_s1 + $0x39c] sm:$0xf]  ;;  %v3927_v33 = vld [vmem:[%s6039_s1 + $0x174] sm:$0xf0]  ;;  %v5088_v15 = vsel %vm1602_vm0, %v4997_v35, %v1706_v22 }
 0x13a   :  { %v5051_v20 = vadd.f32 %v1200_v19, %v1157_v31  ;;  %v3575_v14 = vld [vmem:[%s6039_s1 + $0x3b8] sm:$0xf0]  ;;  %v3285_v19 = vld [vmem:[%s6039_s1 + $0x158] sm:$0xf] }
 0x13b   :  { %v1116_v34 = vpop.f32.mrf.mxu1  ;;  %v3578_v32 = vor.u32 %v3995_v52, %v3575_v14  ;;  %1397 = vmatpush.bf16.msrb.mxu0 %v3318_v25  ;;  %1440 = vmatpush.bf16.msrb.mxu1 %v3574_v62  ;;  %v3286_v30 = vor.u32 %v3927_v33, %v3285_v19  ;;  %v3991_v25 = vld [vmem:[%s6039_s1 + $0x374] sm:$0xf0]  ;;  %v3923_v23 = vld [vmem:[%s6039_s1 + $0x15c] sm:$0xf] }
 0x13c   :  { %v1117_v24 = vadd.f32 %v1116_v34, %v1073_v8  ;;  %1483 = vmatpush.bf16.msrb.mxu2 %v3322_v51  ;;  %v3541_v8 = vld [vmem:[%s6039_s1 + $0x358] sm:$0xf]  ;;  %v3287_v1 = vld [vmem:[%s6039_s1 + $0x178] sm:$0xf0]  ;;  %vm1603_vm2 = vcmp.ge.f32.partialorder %v5051_v20, 0.0 }
 0x13d   :  { %1526 = vmatpush.bf16.msrb.mxu3 %v3578_v32  ;;  %v3542_v62 = vor.u32 %v3991_v25, %v3541_v8  ;;  %v3987_v32 = vld [vmem:[%s6039_s1 + $0x35c] sm:$0xf]  ;;  %v3290_v52 = vor.u32 %v3923_v23, %v3287_v1  ;;  %v3253_v19 = vld [vmem:[%s6039_s1 + $0x118] sm:$0xf]  ;;  %v1707_v23 = vmul.f32 0.2, %v5051_v20 }
 0x13e   :  { %vm1610_vm1 = vcmp.ge.f32.partialorder %v1117_v24, 0.0  ;;  %v1714_v31 = vmul.f32 0.2, %v1117_v24  ;;  %v3543_v53 = vld [vmem:[%s6039_s1 + $0x378] sm:$0xf0] }
 0x13f   :  { %v1159_v51 = vpop.f32.mrf.mxu2  ;;  %1398 = vmatpush.bf16.msrb.mxu0 %v3286_v30  ;;  %v3546_v14 = vor.u32 %v3987_v32, %v3543_v53  ;;  %v3919_v33 = vld [vmem:[%s6039_s1 + $0x134] sm:$0xf0]  ;;  %1441 = vmatpush.bf16.msrb.mxu1 %v3542_v62  ;;  %v3915_v30 = vld [vmem:[%s6039_s1 + $0x11c] sm:$0xf] }
 0x140   :  { %v5090_v34 = vsel %vm1610_vm1, %v1117_v24, %v1714_v31  ;;  %v3509_v8 = vld [vmem:[%s6039_s1 + $0x318] sm:$0xf]  ;;  %v3255_v25 = vld [vmem:[%s6039_s1 + $0x138] sm:$0xf0]  ;;  %1484 = vmatpush.bf16.msrb.mxu2 %v3290_v52  ;;  %v3254_v53 = vor.u32 %v3919_v33, %v3253_v19 }
 0x141   :  { %v1202_v24 = vpop.f32.mrf.mxu3  ;;  %v1076_v35 = vpop.f32.mrf.mxu0  ;;  %v3983_v31 = vld [vmem:[%s6039_s1 + $0x334] sm:$0xf0]  ;;  %1527 = vmatpush.bf16.msrb.mxu3 %v3546_v14  ;;  %v3979_v62 = vld [vmem:[%s6039_s1 + $0x31c] sm:$0xf]  ;;  %v3258_v26 = vor.u32 %v3915_v30, %v3255_v25 }
 0x142   :  { %v1203_v1 = vadd.f32 %v1202_v24, %v1159_v51  ;;  %v3511_v22 = vld [vmem:[%s6039_s1 + $0x338] sm:$0xf0]  ;;  %v3510_v5 = vor.u32 %v3983_v31, %v3509_v8  ;;  %v3221_v14 = vld [vmem:[%s6039_s1 + $0xd8] sm:$0xf] }
 0x143   :  { %v1119_v32 = vpop.f32.mrf.mxu1  ;;  %v3514_v52 = vor.u32 %v3979_v62, %v3511_v22  ;;  %v3911_v19 = vld [vmem:[%s6039_s1 + $0xf4] sm:$0xf0]  ;;  %1399 = vmatpush.bf16.msrb.mxu0 %v3254_v53  ;;  %v3907_v24 = vld [vmem:[%s6039_s1 + $0xdc] sm:$0xf] }
 0x144   :  { %v5120_v4 = vadd.f32 %v1119_v32, %v1076_v35  ;;  %vm1611_vm3 = vcmp.ge.f32.partialorder %v1203_v1, 0.0  ;;  %v1715_v51 = vmul.f32 0.2, %v1203_v1  ;;  %1252 = vmatmul.bf16.gmra.mxu0 %v4504_v41  ;;  %1338 = vmatmul.bf16.gmra.mxu2 %v4504_v41  ;;  %v3222_v33 = vor.u32 %v3911_v19, %v3221_v14  ;;  %v3477_v8 = vld [vmem:[%s6039_s1 + $0x2d8] sm:$0xf] }
 0x145   :  { %v3975_v22 = vld [vmem:[%s6039_s1 + $0x2f4] sm:$0xf0]  ;;  %v5144_v35 = vsel %vm1603_vm2, %v5051_v20, %v1707_v23  ;;  %1442 = vmatpush.bf16.msrb.mxu1 %v3510_v5  ;;  %1485 = vmatpush.bf16.msrb.mxu2 %v3258_v26  ;;  %v3223_v25 = vld [vmem:[%s6039_s1 + $0xf8] sm:$0xf0] }
 0x146   :  { %1295 = vmatmul.bf16.gmra.mxu1 %v4512_v47  ;;  %1381 = vmatmul.bf16.gmra.mxu3 %v4512_v47  ;;  %v5146_v31 = vsel %vm1611_vm3, %v1203_v1, %v1715_v51  ;;  %v3478_v30 = vor.u32 %v3975_v22, %v3477_v8  ;;  %v3971_v32 = vld [vmem:[%s6039_s1 + $0x2dc] sm:$0xf]  ;;  %v3226_v5 = vor.u32 %v3907_v24, %v3223_v25  ;;  %v3189_v1 = vld [vmem:[%s6039_s1 + $0x98] sm:$0xf]  ;;  %v1722_v27 = vmul.f32 0.2, %v5120_v4 }
 0x147   :  { %v3479_v53 = vld [vmem:[%s6039_s1 + $0x2f8] sm:$0xf0]  ;;  %v1162_v23 = vpop.f32.mrf.mxu2  ;;  %1528 = vmatpush.bf16.msrb.mxu3 %v3514_v52  ;;  %v3903_v62 = vld [vmem:[%s6039_s1 + $0xb4] sm:$0xf0]  ;;  %1400 = vmatpush.bf16.msrb.mxu0 %v3222_v33  ;;  %vm1618_vm4 = vcmp.ge.f32.partialorder %v5120_v4, 0.0 }
 0x148   :  { %v3482_v26 = vor.u32 %v3971_v32, %v3479_v53  ;;  %v3445_v51 = vld [vmem:[%s6039_s1 + $0x298] sm:$0xf]  ;;  %v3899_v8 = vld [vmem:[%s6039_s1 + $0x9c] sm:$0xf]  ;;  %v3190_v32 = vor.u32 %v3903_v62, %v3189_v1 }
 0x149   :  { %v1205_v14 = vpop.f32.mrf.mxu3  ;;  %v1078_v19 = vpop.f32.mrf.mxu0  ;;  %v3967_v52 = vld [vmem:[%s6039_s1 + $0x2b4] sm:$0xf0]  ;;  %v3191_v22 = vld [vmem:[%s6039_s1 + $0xb8] sm:$0xf0]  ;;  %1443 = vmatpush.bf16.msrb.mxu1 %v3478_v30  ;;  %1486 = vmatpush.bf16.msrb.mxu2 %v3226_v5 }
 0x14a   :  { %v5177_v24 = vadd.f32 %v1205_v14, %v1162_v23  ;;  %v3963_v53 = vld [vmem:[%s6039_s1 + $0x29c] sm:$0xf]  ;;  %v3446_v10 = vor.u32 %v3967_v52, %v3445_v51  ;;  %v3194_v38 = vor.u32 %v3899_v8, %v3191_v22  ;;  %v3157_v23 = vld [vmem:[%s6039_s1 + $0x58] sm:$0xf]  ;;  %v5214_v8 = vsel %vm1618_vm4, %v5120_v4, %v1722_v27 }
 0x14b   :  { %v1121_v25 = vpop.f32.mrf.mxu1  ;;  %v3447_v20 = vld [vmem:[%s6039_s1 + $0x2b8] sm:$0xf0]  ;;  %1529 = vmatpush.bf16.msrb.mxu3 %v3482_v26  ;;  %v3895_v62 = vld [vmem:[%s6039_s1 + $0x74] sm:$0xf0]  ;;  %1401 = vmatpush.bf16.msrb.mxu0 %v3190_v32  ;;  %6085 = vst [vmem:[#allocation14_spill] sm:$0xff] %v5214_v8 }
 0x14c   :  { %v1122_v13 = vadd.f32 %v1121_v25, %v1078_v19  ;;  %v3450_v33 = vor.u32 %v3963_v53, %v3447_v20  ;;  %v3158_v14 = vor.u32 %v3895_v62, %v3157_v23  ;;  %v3413_v30 = vld [vmem:[%s6039_s1 + $0x258] sm:$0xf]  ;;  %v3891_v5 = vld [vmem:[%s6039_s1 + $0x5c] sm:$0xf]  ;;  %vm1619_vm6 = vcmp.ge.f32.partialorder %v5177_v24, 0.0 }
 0x14d   :  { %v3959_v20 = vld [vmem:[%s6039_s1 + $0x274] sm:$0xf0]  ;;  %1444 = vmatpush.bf16.msrb.mxu1 %v3446_v10  ;;  %1487 = vmatpush.bf16.msrb.mxu2 %v3194_v38  ;;  %v3159_v51 = vld [vmem:[%s6039_s1 + $0x78] sm:$0xf0] }
 0x14e   :  { %vm1626_vm5 = vcmp.ge.f32.partialorder %v1122_v13, 0.0  ;;  %v1730_v1 = vmul.f32 0.2, %v1122_v13  ;;  %v3414_v26 = vor.u32 %v3959_v20, %v3413_v30  ;;  %v3955_v19 = vld [vmem:[%s6039_s1 + $0x25c] sm:$0xf]  ;;  %v3162_v22 = vor.u32 %v3891_v5, %v3159_v51 }
 0x14f   :  { %v3415_v52 = vld [vmem:[%s6039_s1 + $0x278] sm:$0xf0]  ;;  %v1164_v38 = vpop.f32.mrf.mxu2  ;;  %1530 = vmatpush.bf16.msrb.mxu3 %v3450_v33  ;;  %v3125_v32 = vld [vmem:[%s6039_s1 + $0x18] sm:$0xf]  ;;  %v1723_v30 = vmul.f32 0.2, %v5177_v24  ;;  %1402 = vmatpush.bf16.msrb.mxu0 %v3158_v14 }
 0x150   :  { %v5216_v10 = vsel %vm1626_vm5, %v1122_v13, %v1730_v1  ;;  %v3418_v25 = vor.u32 %v3955_v19, %v3415_v52  ;;  %v3887_v53 = vld [vmem:[%s6039_s1 + $0x34] sm:$0xf0]  ;;  %v3883_v1 = vld [vmem:[%s6039_s1 + $0x1c] sm:$0xf] }
 0x151   :  { %6086 = vst [vmem:[#allocation15_spill] sm:$0xff] %v5216_v10  ;;  %v3381_v23 = vld [vmem:[%s6039_s1 + $0x218] sm:$0xf]  ;;  %v1207_v27 = vpop.f32.mrf.mxu3  ;;  %v1081_v4 = vpop.f32.mrf.mxu0  ;;  %v3127_v62 = vld [vmem:[%s6039_s1 + $0x38] sm:$0xf0]  ;;  %v3126_v51 = vor.u32 %v3887_v53, %v3125_v32  ;;  %1445 = vmatpush.bf16.msrb.mxu1 %v3414_v26  ;;  %1488 = vmatpush.bf16.msrb.mxu2 %v3162_v22  ;;  %v5251_v32 = vsel %vm1619_vm6, %v5177_v24, %v1723_v30 }
 0x152   :  { %v3951_v33 = vld [vmem:[%s6039_s1 + $0x234] sm:$0xf0]  ;;  %v1208_v20 = vadd.f32 %v1207_v27, %v1164_v38  ;;  %v3947_v19 = vld [vmem:[%s6039_s1 + $0x21c] sm:$0xf]  ;;  %v3130_v10 = vor.u32 %v3883_v1, %v3127_v62 }
 0x153   :  { %v1124_v5 = vpop.f32.mrf.mxu1  ;;  %v3383_v52 = vld [vmem:[%s6039_s1 + $0x238] sm:$0xf0]  ;;  %v3382_v8 = vor.u32 %v3951_v33, %v3381_v23  ;;  %1531 = vmatpush.bf16.msrb.mxu3 %v3418_v25  ;;  %1403 = vmatpush.bf16.msrb.mxu0 %v3126_v51 }
 0x154   :  { %v1125_v13 = vadd.f32 %v1124_v5, %v1081_v4  ;;  %vm1627_vm7 = vcmp.ge.f32.partialorder %v1208_v20, 0.0  ;;  %v1731_v38 = vmul.f32 0.2, %v1208_v20  ;;  %1257 = vmatmul.bf16.gmra.mxu0 %v4620_v39  ;;  %v3386_v14 = vor.u32 %v3947_v19, %v3383_v52  ;;  %1343 = vmatmul.bf16.gmra.mxu2 %v4620_v39 }
 0x155   :  { %1446 = vmatpush.bf16.msrb.mxu1 %v3382_v8  ;;  %1489 = vmatpush.bf16.msrb.mxu2 %v3130_v10 }
 0x156   :  { %1300 = vmatmul.bf16.gmra.mxu1 %v4628_v46  ;;  %1386 = vmatmul.bf16.gmra.mxu3 %v4628_v46  ;;  %v5253_v26 = vsel %vm1627_vm7, %v1208_v20, %v1731_v38  ;;  %v1738_v33 = vmul.f32 0.2, %v1125_v13  ;;  %vm1634_vm8 = vcmp.ge.f32.partialorder %v1125_v13, 0.0 }
 0x157   :  { %v1167_v53 = vpop.f32.mrf.mxu2  ;;  %1532 = vmatpush.bf16.msrb.mxu3 %v3386_v14 }
 0x158   :  { %v5257_v24 = vsel %vm1634_vm8, %v1125_v13, %v1738_v33 }
 0x159   :  { %v1210_v25 = vpop.f32.mrf.mxu3  ;;  %v1083_v23 = vpop.f32.mrf.mxu0 }
 0x15a   :  { %v1211_v27 = vadd.f32 %v1210_v25, %v1167_v53 }
 0x15b   :  { %v1126_v4 = vpop.f32.mrf.mxu1 }
 0x15c   :  { %v1127_v1 = vadd.f32 %v1126_v4, %v1083_v23  ;;  %v1739_v51 = vmul.f32 0.2, %v1211_v27  ;;  %vm1635_vm10 = vcmp.ge.f32.partialorder %v1211_v27, 0.0 }
 0x15e   :  { %vm1642_vm9 = vcmp.ge.f32.partialorder %v1127_v1, 0.0  ;;  %v1746_v62 = vmul.f32 0.2, %v1127_v1  ;;  %v5267_v13 = vsel %vm1635_vm10, %v1211_v27, %v1739_v51 }
 0x15f   :  { %v1169_v8 = vpop.f32.mrf.mxu2  ;;  %6087 = vst [vmem:[#allocation16_spill] sm:$0xff] %v5267_v13 }
 0x160   :  { %v5259_v30 = vsel %vm1642_vm9, %v1127_v1, %v1746_v62 }
 0x161   :  { %v1212_v20 = vpop.f32.mrf.mxu3  ;;  %v1086_v5 = vpop.f32.mrf.mxu0 }
 0x162   :  { %v1213_v19 = vadd.f32 %v1212_v20, %v1169_v8 }
 0x163   :  { %v1129_v52 = vpop.f32.mrf.mxu1 }
 0x164   :  { %v1130_v38 = vadd.f32 %v1129_v52, %v1086_v5  ;;  %vm1643_vm11 = vcmp.ge.f32.partialorder %v1213_v19, 0.0  ;;  %v1747_v14 = vmul.f32 0.2, %v1213_v19  ;;  %1262 = vmatmul.bf16.gmra.mxu0 %v4637_v57  ;;  %1348 = vmatmul.bf16.gmra.mxu2 %v4637_v57 }
 0x166   :  { %1305 = vmatmul.bf16.gmra.mxu1 %v4639_v58  ;;  %1391 = vmatmul.bf16.gmra.mxu3 %v4639_v58  ;;  %v5269_v53 = vsel %vm1643_vm11, %v1213_v19, %v1747_v14  ;;  %v1754_v8 = vmul.f32 0.2, %v1130_v38  ;;  %vm1650_vm12 = vcmp.ge.f32.partialorder %v1130_v38, 0.0 }
 0x167   :  { %v1172_v23 = vpop.f32.mrf.mxu2 }
 0x168   :  { %v5273_v52 = vsel %vm1650_vm12, %v1130_v38, %v1754_v8 }
 0x169   :  { %v1215_v4 = vpop.f32.mrf.mxu3  ;;  %v1088_v33 = vpop.f32.mrf.mxu0 }
 0x16a   :  { %v1216_v1 = vadd.f32 %v1215_v4, %v1172_v23 }
 0x16b   :  { %v1131_v62 = vpop.f32.mrf.mxu1 }
 0x16c   :  { %v1132_v20 = vadd.f32 %v1131_v62, %v1088_v33  ;;  %v1755_v25 = vmul.f32 0.2, %v1216_v1  ;;  %vm1651_vm14 = vcmp.ge.f32.partialorder %v1216_v1, 0.0 }
 0x16e   :  { %vm1658_vm13 = vcmp.ge.f32.partialorder %v1132_v20, 0.0  ;;  %v1762_v5 = vmul.f32 0.2, %v1132_v20  ;;  %v5285_v38 = vsel %vm1651_vm14, %v1216_v1, %v1755_v25 }
 0x16f   :  { %v1174_v27 = vpop.f32.mrf.mxu2 }
 0x170   :  { %v5275_v10 = vsel %vm1658_vm13, %v1132_v20, %v1762_v5 }
 0x171   :  { %v1217_v19 = vpop.f32.mrf.mxu3  ;;  %v1091_v14 = vpop.f32.mrf.mxu0 }
 0x172   :  { %v1218_v22 = vadd.f32 %v1217_v19, %v1174_v27 }
 0x173   :  { %v1134_v13 = vpop.f32.mrf.mxu1 }
 0x174   :  { %v5279_v23 = vadd.f32 %v1134_v13, %v1091_v14  ;;  %vm1659_vm15 = vcmp.ge.f32.partialorder %v1218_v22, 0.0  ;;  %v1763_v4 = vmul.f32 0.2, %v1218_v22  ;;  %1404 = vmatmul.bf16.vlgmr.msrb.gmra.mxu0 %v4334_v36  ;;  %1490 = vmatmul.bf16.vlgmr.msrb.gmra.mxu2 %v4334_v36 }
 0x176   :  { %6088 = vst [vmem:[#allocation17_spill] sm:$0xff] %v5279_v23  ;;  %1447 = vmatmul.bf16.vlgmr.msrb.gmra.mxu1 %v4336_v37  ;;  %1533 = vmatmul.bf16.vlgmr.msrb.gmra.mxu3 %v4336_v37  ;;  %v5287_v33 = vsel %vm1659_vm15, %v1218_v22, %v1763_v4 }
 0x177   :  { %v1177_v8 = vpop.f32.mrf.mxu2 }
 0x179   :  { %v1220_v13 = vpop.f32.mrf.mxu3  ;;  %v1093_v20 = vpop.f32.mrf.mxu0 }
 0x17a   :  { %v5291_v5 = vadd.f32 %v1220_v13, %v1177_v8 }
 0x17b   :  { %v1136_v27 = vpop.f32.mrf.mxu1 }
 0x17c   :  { %6089 = vst [vmem:[#allocation18_spill] sm:$0xff] %v5291_v5 }
 0x17f   :  { %v1179_v19 = vpop.f32.mrf.mxu2 }
 0x181   :  { %v1222_v14 = vpop.f32.mrf.mxu3  ;;  %v1233_v51 = vpop.f32.mrf.mxu0 }
 0x183   :  { %v1276_v23 = vpop.f32.mrf.mxu1 }
 0x184   :  { %v1277_v36 = vadd.f32 %v1276_v23, %v1233_v51  ;;  %1409 = vmatmul.bf16.gmra.mxu0 %v4354_v42  ;;  %1495 = vmatmul.bf16.gmra.mxu2 %v4354_v42 }
 0x186   :  { %1452 = vmatmul.bf16.gmra.mxu1 %v4356_v43  ;;  %1538 = vmatmul.bf16.gmra.mxu3 %v4356_v43  ;;  %v1676_v8 = vmul.f32 0.2, %v1277_v36  ;;  %vm1572_vm0 = vcmp.ge.f32.partialorder %v1277_v36, 0.0 }
 0x187   :  { %v1319_v37 = vpop.f32.mrf.mxu2 }
 0x188   :  { %v5297_v27 = vsel %vm1572_vm0, %v1277_v36, %v1676_v8 }
 0x189   :  { %v1362_v22 = vpop.f32.mrf.mxu3  ;;  %v1235_v25 = vpop.f32.mrf.mxu0 }
 0x18a   :  { %v1363_v1 = vadd.f32 %v1362_v22, %v1319_v37 }
 0x18b   :  { %v1278_v4 = vpop.f32.mrf.mxu1 }
 0x18c   :  { %v1279_v13 = vadd.f32 %v1278_v4, %v1235_v25  ;;  %v1677_v14 = vmul.f32 0.2, %v1363_v1  ;;  %vm1573_vm2 = vcmp.ge.f32.partialorder %v1363_v1, 0.0 }
 0x18e   :  { %vm1580_vm1 = vcmp.ge.f32.partialorder %v1279_v13, 0.0  ;;  %v1684_v20 = vmul.f32 0.2, %v1279_v13  ;;  %v5306_v36 = vsel %vm1573_vm2, %v1363_v1, %v1677_v14 }
 0x18f   :  { %v1321_v42 = vpop.f32.mrf.mxu2  ;;  %6090 = vst [vmem:[#allocation19_spill] sm:$0xff] %v5306_v36 }
 0x190   :  { %v5299_v51 = vsel %vm1580_vm1, %v1279_v13, %v1684_v20 }
 0x191   :  { %v1364_v19 = vpop.f32.mrf.mxu3  ;;  %v1238_v43 = vpop.f32.mrf.mxu0 }
 0x192   :  { %v1365_v62 = vadd.f32 %v1364_v19, %v1321_v42 }
 0x193   :  { %v1281_v5 = vpop.f32.mrf.mxu1 }
 0x194   :  { %v1282_v37 = vadd.f32 %v1281_v5, %v1238_v43  ;;  %vm1581_vm3 = vcmp.ge.f32.partialorder %v1365_v62, 0.0  ;;  %v1685_v22 = vmul.f32 0.2, %v1365_v62  ;;  %1414 = vmatmul.bf16.gmra.mxu0 %v4374_v48  ;;  %1500 = vmatmul.bf16.gmra.mxu2 %v4374_v48 }
 0x196   :  { %1457 = vmatmul.bf16.gmra.mxu1 %v4376_v49  ;;  %v5308_v25 = vsel %vm1581_vm3, %v1365_v62, %v1685_v22  ;;  %1543 = vmatmul.bf16.gmra.mxu3 %v4376_v49  ;;  %v1692_v19 = vmul.f32 0.2, %v1282_v37  ;;  %vm1588_vm4 = vcmp.ge.f32.partialorder %v1282_v37, 0.0  ;;  %v4012_v49 = vld [vmem:[%s6041_s2 + $0x20] sm:$0xff] }
 0x197   :  { %6091 = vst [vmem:[#allocation20_spill] sm:$0xff] %v5308_v25  ;;  %v1324_v8 = vpop.f32.mrf.mxu2 }
 0x198   :  { %v5313_v48 = vsel %vm1588_vm4, %v1282_v37, %v1692_v19  ;;  %v4023_v37 = vld [vmem:[%s6041_s2 + $0x78] sm:$0xff] }
 0x199   :  { %v1367_v13 = vpop.f32.mrf.mxu3  ;;  %v1240_v5 = vpop.f32.mrf.mxu0  ;;  %2491 = vmatpush.bf16.msra.mxu1 %v4023_v37 }
 0x19a   :  { %v1368_v20 = vadd.f32 %v1367_v13, %v1324_v8 }
 0x19b   :  { %v1283_v42 = vpop.f32.mrf.mxu1 }
 0x19c   :  { %v1284_v43 = vadd.f32 %v1283_v42, %v1240_v5  ;;  %v1693_v4 = vmul.f32 0.2, %v1368_v20  ;;  %vm1589_vm6 = vcmp.ge.f32.partialorder %v1368_v20, 0.0  ;;  %v4039_v5 = vld [vmem:[%s6041_s2 + $0xf8] sm:$0xff] }
 0x19d   :  { %2577 = vmatpush.bf16.msra.mxu3 %v4039_v5  ;;  %v4013_v5 = vld [vmem:[%s6041_s2 + $0x28] sm:$0xff] }
 0x19e   :  { %vm1596_vm5 = vcmp.ge.f32.partialorder %v1284_v43, 0.0  ;;  %v1700_v23 = vmul.f32 0.2, %v1284_v43  ;;  %v5335_v42 = vsel %vm1589_vm6, %v1368_v20, %v1693_v4  ;;  %v4022_v4 = vld [vmem:[%s6041_s2 + $0x70] sm:$0xff] }
 0x19f   :  { %v1326_v62 = vpop.f32.mrf.mxu2  ;;  %2492 = vmatpush.bf16.msra.mxu1 %v4022_v4 }
 0x1a0   :  { %v5315_v1 = vsel %vm1596_vm5, %v1284_v43, %v1700_v23  ;;  %v4015_v23 = vld [vmem:[%s6041_s2 + $0x38] sm:$0xff] }
 0x1a1   :  { %v1369_v14 = vpop.f32.mrf.mxu3  ;;  %v1243_v22 = vpop.f32.mrf.mxu0  ;;  %2448 = vmatpush.bf16.msra.mxu0 %v4015_v23 }
 0x1a2   :  { %v1370_v36 = vadd.f32 %v1369_v14, %v1326_v62 }
 0x1a3   :  { %v1286_v25 = vpop.f32.mrf.mxu1 }
 0x1a4   :  { %v1287_v8 = vadd.f32 %v1286_v25, %v1243_v22  ;;  %vm1597_vm7 = vcmp.ge.f32.partialorder %v1370_v36, 0.0  ;;  %v1701_v13 = vmul.f32 0.2, %v1370_v36  ;;  %1419 = vmatmul.bf16.gmra.mxu0 %v4394_v54  ;;  %1505 = vmatmul.bf16.gmra.mxu2 %v4394_v54  ;;  %v4031_v25 = vld [vmem:[%s6041_s2 + $0xb8] sm:$0xff] }
 0x1a5   :  { %2534 = vmatpush.bf16.msra.mxu2 %v4031_v25 }
 0x1a6   :  { %1462 = vmatmul.bf16.gmra.mxu1 %v4396_v55  ;;  %1548 = vmatmul.bf16.gmra.mxu3 %v4396_v55  ;;  %v5337_v54 = vsel %vm1597_vm7, %v1370_v36, %v1701_v13  ;;  %v4014_v55 = vld [vmem:[%s6041_s2 + $0x30] sm:$0xff]  ;;  %v1708_v23 = vmul.f32 0.2, %v1287_v8  ;;  %vm1604_vm8 = vcmp.ge.f32.partialorder %v1287_v8, 0.0 }
 0x1a7   :  { %v1329_v43 = vpop.f32.mrf.mxu2  ;;  %v4030_v36 = vld [vmem:[%s6041_s2 + $0xb0] sm:$0xff]  ;;  %2449 = vmatpush.bf16.msra.mxu0 %v4014_v55 }
 0x1a8   :  { %v4038_v13 = vld [vmem:[%s6041_s2 + $0xf0] sm:$0xff]  ;;  %v5365_v55 = vsel %vm1604_vm8, %v1287_v8, %v1708_v23  ;;  %v4028_v8 = vld [vmem:[%s6041_s2 + $0xa0] sm:$0xff] }
 0x1a9   :  { %v1372_v62 = vpop.f32.mrf.mxu3  ;;  %v1245_v14 = vpop.f32.mrf.mxu0  ;;  %2535 = vmatpush.bf16.msra.mxu2 %v4030_v36  ;;  %2578 = vmatpush.bf16.msra.mxu3 %v4038_v13  ;;  %6092 = vst [vmem:[#allocation21_spill] sm:$0xff] %v5365_v55 }
 0x1aa   :  { %v1373_v20 = vadd.f32 %v1372_v62, %v1329_v43  ;;  %v4021_v43 = vld [vmem:[%s6041_s2 + $0x68] sm:$0xff] }
 0x1ab   :  { %v1288_v22 = vpop.f32.mrf.mxu1  ;;  %v4029_v62 = vld [vmem:[%s6041_s2 + $0xa8] sm:$0xff]  ;;  %2450 = vmatpush.bf16.msra.mxu0 %v4013_v5  ;;  %2493 = vmatpush.bf16.msra.mxu1 %v4021_v43  ;;  %v4020_v5 = vld [vmem:[%s6041_s2 + $0x60] sm:$0xff] }
 0x1ac   :  { %v1289_v37 = vadd.f32 %v1288_v22, %v1245_v14  ;;  %v4037_v14 = vld [vmem:[%s6041_s2 + $0xe8] sm:$0xff]  ;;  %v1709_v23 = vmul.f32 0.2, %v1373_v20  ;;  %vm1605_vm10 = vcmp.ge.f32.partialorder %v1373_v20, 0.0 }
 0x1ad   :  { %2536 = vmatpush.bf16.msra.mxu2 %v4029_v62  ;;  %2579 = vmatpush.bf16.msra.mxu3 %v4037_v14  ;;  %v4036_v62 = vld [vmem:[%s6041_s2 + $0xe0] sm:$0xff] }
 0x1ae   :  { %vm1612_vm9 = vcmp.ge.f32.partialorder %v1289_v37, 0.0  ;;  %v1716_v25 = vmul.f32 0.2, %v1289_v37 }
 0x1af   :  { %v1331_v36 = vpop.f32.mrf.mxu2  ;;  %2451 = vmatpush.bf16.msra.mxu0 %v4012_v49  ;;  %2494 = vmatpush.bf16.msra.mxu1 %v4020_v5  ;;  %v4019_v49 = vld [vmem:[%s6041_s2 + $0x58] sm:$0xff] }
 0x1b0   :  { %v5367_v4 = vsel %vm1612_vm9, %v1289_v37, %v1716_v25 }
 0x1b1   :  { %v1374_v13 = vpop.f32.mrf.mxu3  ;;  %v1248_v19 = vpop.f32.mrf.mxu0  ;;  %2537 = vmatpush.bf16.msra.mxu2 %v4028_v8  ;;  %2580 = vmatpush.bf16.msra.mxu3 %v4036_v62  ;;  %v4009_v8 = vld [vmem:[%s6041_s2 + $0x8] sm:$0xff] }
 0x1b2   :  { %v1375_v37 = vadd.f32 %v1374_v13, %v1331_v36  ;;  %v4011_v36 = vld [vmem:[%s6041_s2 + $0x18] sm:$0xff]  ;;  %v5396_v13 = vsel %vm1605_vm10, %v1373_v20, %v1709_v23  ;;  %v4018_v20 = vld [vmem:[%s6041_s2 + $0x50] sm:$0xff] }
 0x1b3   :  { %v1291_v25 = vpop.f32.mrf.mxu1  ;;  %6093 = vst [vmem:[#allocation22_spill] sm:$0xff] %v5396_v13  ;;  %2452 = vmatpush.bf16.msra.mxu0 %v4011_v36  ;;  %2495 = vmatpush.bf16.msra.mxu1 %v4019_v49  ;;  %v4026_v23 = vld [vmem:[%s6041_s2 + $0x90] sm:$0xff] }
 0x1b4   :  { %v1292_v43 = vadd.f32 %v1291_v25, %v1248_v19  ;;  %vm1613_vm11 = vcmp.ge.f32.partialorder %v1375_v37, 0.0  ;;  %v1717_v14 = vmul.f32 0.2, %v1375_v37  ;;  %1424 = vmatmul.bf16.gmra.mxu0 %v4504_v41  ;;  %1510 = vmatmul.bf16.gmra.mxu2 %v4504_v41  ;;  %v4027_v19 = vld [vmem:[%s6041_s2 + $0x98] sm:$0xff]  ;;  %v4034_v49 = vld [vmem:[%s6041_s2 + $0xd0] sm:$0xff] }
 0x1b5   :  { %v4035_v41 = vld [vmem:[%s6041_s2 + $0xd8] sm:$0xff]  ;;  %2538 = vmatpush.bf16.msra.mxu2 %v4027_v19 }
 0x1b6   :  { %1467 = vmatmul.bf16.gmra.mxu1 %v4512_v47  ;;  %1553 = vmatmul.bf16.gmra.mxu3 %v4512_v47  ;;  %v5398_v5 = vsel %vm1613_vm11, %v1375_v37, %v1717_v14  ;;  %v4010_v47 = vld [vmem:[%s6041_s2 + $0x10] sm:$0xff]  ;;  %v1724_v14 = vmul.f32 0.2, %v1292_v43  ;;  %vm1620_vm12 = vcmp.ge.f32.partialorder %v1292_v43, 0.0 }
 0x1b7   :  { %6094 = vst [vmem:[#allocation23_spill] sm:$0xff] %v5398_v5  ;;  %v1334_v25 = vpop.f32.mrf.mxu2  ;;  %2581 = vmatpush.bf16.msra.mxu3 %v4035_v41  ;;  %2453 = vmatpush.bf16.msra.mxu0 %v4010_v47  ;;  %v4033_v41 = vld [vmem:[%s6041_s2 + $0xc8] sm:$0xff] }
 0x1b8   :  { %2496 = vmatpush.bf16.msra.mxu1 %v4018_v20 }
 0x1b9   :  { %v1377_v22 = vpop.f32.mrf.mxu3  ;;  %v1250_v55 = vpop.f32.mrf.mxu0  ;;  %2539 = vmatpush.bf16.msra.mxu2 %v4026_v23 }
 0x1ba   :  { %v1378_v37 = vadd.f32 %v1377_v22, %v1334_v25  ;;  %v4017_v22 = vld [vmem:[%s6041_s2 + $0x48] sm:$0xff]  ;;  %v5429_v25 = vsel %vm1620_vm12, %v1292_v43, %v1724_v14 }
 0x1bb   :  { %v1293_v62 = vpop.f32.mrf.mxu1  ;;  %2582 = vmatpush.bf16.msra.mxu3 %v4034_v49  ;;  %2454 = vmatpush.bf16.msra.mxu0 %v4009_v8  ;;  %6095 = vst [vmem:[#allocation24_spill] sm:$0xff] %v5429_v25  ;;  %v4008_v8 = vld [vmem:[%s6041_s2] sm:$0xff] }
 0x1bc   :  { %v1294_v36 = vadd.f32 %v1293_v62, %v1250_v55  ;;  %v4025_v55 = vld [vmem:[%s6041_s2 + $0x88] sm:$0xff]  ;;  %2497 = vmatpush.bf16.msra.mxu1 %v4017_v22  ;;  %v4016_v49 = vld [vmem:[%s6041_s2 + $0x40] sm:$0xff]  ;;  %v1725_v43 = vmul.f32 0.2, %v1378_v37  ;;  %vm1621_vm14 = vcmp.ge.f32.partialorder %v1378_v37, 0.0 }
 0x1bd   :  { %2540 = vmatpush.bf16.msra.mxu2 %v4025_v55  ;;  %v4032_v55 = vld [vmem:[%s6041_s2 + $0xc0] sm:$0xff] }
 0x1be   :  { %vm1628_vm13 = vcmp.ge.f32.partialorder %v1294_v36, 0.0  ;;  %v1732_v19 = vmul.f32 0.2, %v1294_v36 }
 0x1bf   :  { %v1336_v20 = vpop.f32.mrf.mxu2  ;;  %2583 = vmatpush.bf16.msra.mxu3 %v4033_v41  ;;  %2455 = vmatpush.bf16.msra.mxu0 %v4008_v8 }
 0x1c0   :  { %v5431_v47 = vsel %vm1628_vm13, %v1294_v36, %v1732_v19  ;;  %v4024_v19 = vld [vmem:[%s6041_s2 + $0x80] sm:$0xff]  ;;  %2498 = vmatpush.bf16.msra.mxu1 %v4016_v49 }
 0x1c1   :  { %6096 = vst [vmem:[#allocation25_spill] sm:$0xff] %v5431_v47  ;;  %v1379_v62 = vpop.f32.mrf.mxu3  ;;  %v1253_v13 = vpop.f32.mrf.mxu0  ;;  %2541 = vmatpush.bf16.msra.mxu2 %v4024_v19 }
 0x1c2   :  { %v1380_v14 = vadd.f32 %v1379_v62, %v1336_v20  ;;  %v5451_v20 = vsel %vm1621_vm14, %v1378_v37, %v1725_v43 }
 0x1c3   :  { %v1296_v36 = vpop.f32.mrf.mxu1  ;;  %6097 = vst [vmem:[#allocation26_spill] sm:$0xff] %v5451_v20  ;;  %2584 = vmatpush.bf16.msra.mxu3 %v4032_v55 }
 0x1c4   :  { %v1297_v22 = vadd.f32 %v1296_v36, %v1253_v13  ;;  %vm1629_vm15 = vcmp.ge.f32.partialorder %v1380_v14, 0.0  ;;  %v1733_v23 = vmul.f32 0.2, %v1380_v14  ;;  %1429 = vmatmul.bf16.gmra.mxu0 %v4620_v39  ;;  %1515 = vmatmul.bf16.gmra.mxu2 %v4620_v39 }
 0x1c6   :  { %1472 = vmatmul.bf16.gmra.mxu1 %v4628_v46  ;;  %1558 = vmatmul.bf16.gmra.mxu3 %v4628_v46  ;;  %v5453_v13 = vsel %vm1629_vm15, %v1380_v14, %v1733_v23  ;;  %v1740_v47 = vmul.f32 0.2, %v1297_v22  ;;  %vm1636_vm0 = vcmp.ge.f32.partialorder %v1297_v22, 0.0 }
 0x1c7   :  { %v1339_v62 = vpop.f32.mrf.mxu2 }
 0x1c8   :  { %v5457_v46 = vsel %vm1636_vm0, %v1297_v22, %v1740_v47 }
 0x1c9   :  { %v1382_v8 = vpop.f32.mrf.mxu3  ;;  %v1255_v36 = vpop.f32.mrf.mxu0 }
 0x1ca   :  { %v1383_v25 = vadd.f32 %v1382_v8, %v1339_v62 }
 0x1cb   :  { %v1298_v49 = vpop.f32.mrf.mxu1 }
 0x1cc   :  { %v1299_v5 = vadd.f32 %v1298_v49, %v1255_v36  ;;  %v1741_v55 = vmul.f32 0.2, %v1383_v25  ;;  %vm1637_vm2 = vcmp.ge.f32.partialorder %v1383_v25, 0.0 }
 0x1ce   :  { %vm1644_vm1 = vcmp.ge.f32.partialorder %v1299_v5, 0.0  ;;  %v1748_v39 = vmul.f32 0.2, %v1299_v5 }
 0x1cf   :  { %v1341_v23 = vpop.f32.mrf.mxu2 }
 0x1d0   :  { %v5459_v37 = vsel %vm1644_vm1, %v1299_v5, %v1748_v39  ;;  %v5467_v5 = vsel %vm1637_vm2, %v1383_v25, %v1741_v55 }
 0x1d1   :  { %v1384_v14 = vpop.f32.mrf.mxu3  ;;  %v1258_v19 = vpop.f32.mrf.mxu0  ;;  %6098 = vst [vmem:[#allocation27_spill] sm:$0xff] %v5467_v5 }
 0x1d2   :  { %v1385_v41 = vadd.f32 %v1384_v14, %v1341_v23 }
 0x1d3   :  { %v1301_v20 = vpop.f32.mrf.mxu1 }
 0x1d4   :  { %v1302_v62 = vadd.f32 %v1301_v20, %v1258_v19  ;;  %vm1645_vm3 = vcmp.ge.f32.partialorder %v1385_v41, 0.0  ;;  %v1749_v8 = vmul.f32 0.2, %v1385_v41  ;;  %1434 = vmatmul.bf16.gmra.mxu0 %v4637_v57  ;;  %1520 = vmatmul.bf16.gmra.mxu2 %v4637_v57 }
 0x1d6   :  { %1477 = vmatmul.bf16.gmra.mxu1 %v4639_v58  ;;  %1563 = vmatmul.bf16.gmra.mxu3 %v4639_v58  ;;  %v5469_v47 = vsel %vm1645_vm3, %v1385_v41, %v1749_v8  ;;  %v1756_v14 = vmul.f32 0.2, %v1302_v62  ;;  %vm1652_vm4 = vcmp.ge.f32.partialorder %v1302_v62, 0.0 }
 0x1d7   :  { %6099 = vst [vmem:[#allocation28_spill] sm:$0xff] %v5469_v47  ;;  %v1344_v36 = vpop.f32.mrf.mxu2 }
 0x1d8   :  { %v5473_v57 = vsel %vm1652_vm4, %v1302_v62, %v1756_v14  ;;  %v6100_v62 = vpack.c.bf16 %v4655_v7, %v4653_v6 }
 0x1d9   :  { %v1387_v49 = vpop.f32.mrf.mxu3  ;;  %v1260_v20 = vpop.f32.mrf.mxu0 }
 0x1da   :  { %v1388_v39 = vadd.f32 %v1387_v49, %v1344_v36 }
 0x1db   :  { %v1303_v23 = vpop.f32.mrf.mxu1 }
 0x1dc   :  { %v1304_v19 = vadd.f32 %v1303_v23, %v1260_v20  ;;  %v1757_v22 = vmul.f32 0.2, %v1388_v39  ;;  %vm1653_vm6 = vcmp.ge.f32.partialorder %v1388_v39, 0.0  ;;  %v6102_v20 = vpack.c.bf16 %v4977_v11, %v4975_v2 }
 0x1dd   :  { %v6103_v23 = vpack.c.bf16 %v4986_v16, %v4984_v9  ;;  %v6104_v9 = vpack.c.bf16 %v4671_v29, %v4669_v28  ;;  %v6105_v16 = vpack.c.bf16 %v4698_v60, %v4696_v59 }
 0x1de   :  { %vm1660_vm5 = vcmp.ge.f32.partialorder %v1304_v19, 0.0  ;;  %v1764_v43 = vmul.f32 0.2, %v1304_v19 }
 0x1df   :  { %v1346_v25 = vpop.f32.mrf.mxu2 }
 0x1e0   :  { %v5475_v58 = vsel %vm1660_vm5, %v1304_v19, %v1764_v43  ;;  %v6101_v43 = vpack.c.bf16 %v4664_v18, %v4662_v17 }
 0x1e1   :  { %v1389_v55 = vpop.f32.mrf.mxu3  ;;  %v1263_v8 = vpop.f32.mrf.mxu0 }
 0x1e2   :  { %v1390_v5 = vadd.f32 %v1389_v55, %v1346_v25 }
 0x1e3   :  { %v1306_v47 = vpop.f32.mrf.mxu1 }
 0x1e4   :  { %v5479_v36 = vadd.f32 %v1306_v47, %v1263_v8  ;;  %vm1661_vm7 = vcmp.ge.f32.partialorder %v1390_v5, 0.0  ;;  %v1765_v49 = vmul.f32 0.2, %v1390_v5  ;;  %2456 = vmatmul.bf16.vlgmr.msra.gmra.mxu0 %v6100_v62  ;;  %2542 = vmatmul.bf16.vlgmr.msra.gmra.mxu2 %v6102_v20  ;;  %v5493_v47 = vsel %vm1653_vm6, %v1388_v39, %v1757_v22 }
 0x1e5   :  { %v6107_v22 = vpack.c.bf16 %v5020_v21, %v5018_v3 }
 0x1e6   :  { %2499 = vmatmul.bf16.vlgmr.msra.gmra.mxu1 %v6101_v43  ;;  %2585 = vmatmul.bf16.vlgmr.msra.gmra.mxu3 %v6103_v23  ;;  %v5495_v14 = vsel %vm1661_vm7, %v1390_v5, %v1765_v49  ;;  %v6106_v5 = vpack.c.bf16 %v4993_v12, %v4991_v40 }
 0x1e7   :  { %v1349_v7 = vpop.f32.mrf.mxu2 }
 0x1e9   :  { %v1392_v19 = vpop.f32.mrf.mxu3  ;;  %v1265_v25 = vpop.f32.mrf.mxu0 }
 0x1ea   :  { %v5499_v17 = vadd.f32 %v1392_v19, %v1349_v7 }
 0x1eb   :  { %v1308_v18 = vpop.f32.mrf.mxu1 }
 0x1ef   :  { %v1351_v55 = vpop.f32.mrf.mxu2 }
 0x1f1   :  { %v1394_v2 = vpop.f32.mrf.mxu3  ;;  %v1405_v11 = vpop.f32.mrf.mxu0 }
 0x1f3   :  { %v1448_v8 = vpop.f32.mrf.mxu1 }
 0x1f4   :  { %v1449_v62 = vadd.f32 %v1448_v8, %v1405_v11  ;;  %2461 = vmatmul.bf16.gmra.mxu0 %v6104_v9  ;;  %2547 = vmatmul.bf16.gmra.mxu2 %v6106_v5  ;;  %v6108_v11 = vpack.c.bf16 %v4768_v61, %v4766_v56  ;;  %v6109_v8 = vpack.c.bf16 %v4824_v45, %v4822_v44 }
 0x1f5   :  { %v6111_v5 = vpack.c.bf16 %v5146_v31, %v5144_v35 }
 0x1f6   :  { %2504 = vmatmul.bf16.gmra.mxu1 %v6105_v16  ;;  %2590 = vmatmul.bf16.gmra.mxu3 %v6107_v22  ;;  %v1678_v7 = vmul.f32 0.2, %v1449_v62  ;;  %vm1574_vm8 = vcmp.ge.f32.partialorder %v1449_v62, 0.0 }
 0x1f7   :  { %v1491_v39 = vpop.f32.mrf.mxu2 }
 0x1f8   :  { %v5513_v59 = vsel %vm1574_vm8, %v1449_v62, %v1678_v7  ;;  %v6110_v62 = vpack.c.bf16 %v5090_v34, %v5088_v15 }
 0x1f9   :  { %v1534_v49 = vpop.f32.mrf.mxu3  ;;  %v1407_v43 = vpop.f32.mrf.mxu0 }
 0x1fa   :  { %v1535_v20 = vadd.f32 %v1534_v49, %v1491_v39 }
 0x1fb   :  { %v1450_v23 = vpop.f32.mrf.mxu1 }
 0x1fc   :  { %v1451_v28 = vadd.f32 %v1450_v23, %v1407_v43  ;;  %v1679_v19 = vmul.f32 0.2, %v1535_v20  ;;  %vm1575_vm10 = vcmp.ge.f32.partialorder %v1535_v20, 0.0 }
 0x1fe   :  { %vm1582_vm9 = vcmp.ge.f32.partialorder %v1451_v28, 0.0  ;;  %v1686_v29 = vmul.f32 0.2, %v1451_v28  ;;  %v5528_v9 = vsel %vm1575_vm10, %v1535_v20, %v1679_v19  ;;  %v6112_v19 = vpack.c.bf16 %v4894_v0, %v4892_v63  ;;  %v4063_v63 = vld [vmem:[%s6041_s2 + $0x1b8] sm:$0xff] }
 0x1ff   :  { %v1493_v12 = vpop.f32.mrf.mxu2  ;;  %v6118_v0 = vpack.c.bf16 %v5253_v26, %v5251_v32  ;;  %2706 = vmatpush.bf16.msrb.mxu2 %v4063_v63  ;;  %v4046_v32 = vld [vmem:[%s6041_s2 + $0x130] sm:$0xff]  ;;  %v4052_v63 = vld [vmem:[%s6041_s2 + $0x160] sm:$0xff] }
 0x200   :  { %v5515_v60 = vsel %vm1582_vm9, %v1451_v28, %v1686_v29  ;;  %v4054_v26 = vld [vmem:[%s6041_s2 + $0x170] sm:$0xff] }
 0x201   :  { %v1886_v40 = vpack.c.bf16 %v5515_v60, %v5513_v59  ;;  %v1536_v3 = vpop.f32.mrf.mxu3  ;;  %v1410_v21 = vpop.f32.mrf.mxu0 }
 0x202   :  { %v1537_v25 = vadd.f32 %v1536_v3, %v1493_v12 }
 0x203   :  { %v1453_v18 = vpop.f32.mrf.mxu1 }
 0x204   :  { %v1454_v55 = vadd.f32 %v1453_v18, %v1410_v21  ;;  %vm1583_vm11 = vcmp.ge.f32.partialorder %v1537_v25, 0.0  ;;  %v1687_v2 = vmul.f32 0.2, %v1537_v25  ;;  %2466 = vmatmul.bf16.gmra.mxu0 %v6108_v11  ;;  %2552 = vmatmul.bf16.gmra.mxu2 %v6110_v62  ;;  %v4055_v62 = vld [vmem:[%s6041_s2 + $0x178] sm:$0xff] }
 0x205   :  { %2663 = vmatpush.bf16.msrb.mxu1 %v4055_v62  ;;  %v4044_v62 = vld [vmem:[%s6041_s2 + $0x120] sm:$0xff] }
 0x206   :  { %2509 = vmatmul.bf16.gmra.mxu1 %v6109_v8  ;;  %v5530_v16 = vsel %vm1583_vm11, %v1537_v25, %v1687_v2  ;;  %2595 = vmatmul.bf16.gmra.mxu3 %v6111_v5  ;;  %v1694_v49 = vmul.f32 0.2, %v1454_v55  ;;  %vm1590_vm12 = vcmp.ge.f32.partialorder %v1454_v55, 0.0  ;;  %v6113_v25 = vld [vmem:[#allocation3_spill] sm:$0xff]  ;;  %v6116_v2 = vld [vmem:[#allocation14_spill] sm:$0xff] }
 0x207   :  { %v1887_v56 = vpack.c.bf16 %v5530_v16, %v5528_v9  ;;  %v1496_v61 = vpop.f32.mrf.mxu2  ;;  %v6114_v18 = vpack.c.bf16 %v4931_v50, %v6113_v25  ;;  %v4047_v8 = vld [vmem:[%s6041_s2 + $0x138] sm:$0xff]  ;;  %v6144_v9 = vpack.c.bf16 %v5315_v1, %v5313_v48  ;;  %v6145_v16 = vpack.c.bf16 %v5337_v54, %v5335_v42 }
 0x208   :  { %v5537_v34 = vsel %vm1590_vm12, %v1454_v55, %v1694_v49  ;;  %v6115_v55 = vld [vmem:[#allocation15_spill] sm:$0xff]  ;;  %v4071_v50 = vld [vmem:[%s6041_s2 + $0x1f8] sm:$0xff]  ;;  %2620 = vmatpush.bf16.msrb.mxu0 %v4047_v8 }
 0x209   :  { %v1539_v22 = vpop.f32.mrf.mxu3  ;;  %v1412_v39 = vpop.f32.mrf.mxu0  ;;  %v6117_v11 = vpack.c.bf16 %v6115_v55, %v6116_v2  ;;  %2749 = vmatpush.bf16.msrb.mxu3 %v4071_v50  ;;  %2664 = vmatpush.bf16.msrb.mxu1 %v4054_v26  ;;  %v6119_v26 = vld [vmem:[#allocation5_spill] sm:$0xff] }
 0x20a   :  { %v1540_v44 = vadd.f32 %v1539_v22, %v1496_v61 }
 0x20b   :  { %v1455_v45 = vpop.f32.mrf.mxu1 }
 0x20c   :  { %v1456_v43 = vadd.f32 %v1455_v45, %v1412_v39  ;;  %v1695_v28 = vmul.f32 0.2, %v1540_v44  ;;  %vm1591_vm14 = vcmp.ge.f32.partialorder %v1540_v44, 0.0  ;;  %2621 = vmatpush.bf16.msrb.mxu0 %v4046_v32 }
 0x20e   :  { %vm1598_vm13 = vcmp.ge.f32.partialorder %v1456_v43, 0.0  ;;  %v1702_v15 = vmul.f32 0.2, %v1456_v43  ;;  %v5567_v5 = vsel %vm1591_vm14, %v1540_v44, %v1695_v28  ;;  %v4062_v44 = vld [vmem:[%s6041_s2 + $0x1b0] sm:$0xff] }
 0x20f   :  { %v1498_v23 = vpop.f32.mrf.mxu2  ;;  %2707 = vmatpush.bf16.msrb.mxu2 %v4062_v44  ;;  %v6120_v44 = vld [vmem:[#allocation4_spill] sm:$0xff] }
 0x210   :  { %v5539_v20 = vsel %vm1598_vm13, %v1456_v43, %v1702_v15 }
 0x211   :  { %v1894_v35 = vpack.c.bf16 %v5539_v20, %v5537_v34  ;;  %v1541_v31 = vpop.f32.mrf.mxu3  ;;  %v1415_v7 = vpop.f32.mrf.mxu0  ;;  %v6146_v20 = vld [vmem:[#allocation21_spill] sm:$0xff] }
 0x212   :  { %v1542_v29 = vadd.f32 %v1541_v31, %v1498_v23  ;;  %v4070_v23 = vld [vmem:[%s6041_s2 + $0x1f0] sm:$0xff] }
 0x213   :  { %v1458_v12 = vpop.f32.mrf.mxu1  ;;  %2750 = vmatpush.bf16.msrb.mxu3 %v4070_v23  ;;  %v6122_v23 = vld [vmem:[#allocation7_spill] sm:$0xff] }
 0x214   :  { %v1459_v3 = vadd.f32 %v1458_v12, %v1415_v7  ;;  %vm1599_vm15 = vcmp.ge.f32.partialorder %v1542_v29, 0.0  ;;  %v1703_v21 = vmul.f32 0.2, %v1542_v29  ;;  %2471 = vmatmul.bf16.gmra.mxu0 %v6112_v19  ;;  %2557 = vmatmul.bf16.gmra.mxu2 %v6117_v11  ;;  %v4053_v12 = vld [vmem:[%s6041_s2 + $0x168] sm:$0xff] }
 0x215   :  { %v4069_v19 = vld [vmem:[%s6041_s2 + $0x1e8] sm:$0xff]  ;;  %2665 = vmatpush.bf16.msrb.mxu1 %v4053_v12  ;;  %v4051_v12 = vld [vmem:[%s6041_s2 + $0x158] sm:$0xff] }
 0x216   :  { %2514 = vmatmul.bf16.gmra.mxu1 %v6114_v18  ;;  %2600 = vmatmul.bf16.gmra.mxu3 %v6118_v0  ;;  %v5569_v61 = vsel %vm1599_vm15, %v1542_v29, %v1703_v21  ;;  %v1710_v31 = vmul.f32 0.2, %v1459_v3  ;;  %vm1606_vm0 = vcmp.ge.f32.partialorder %v1459_v3, 0.0  ;;  %v4045_v29 = vld [vmem:[%s6041_s2 + $0x128] sm:$0xff] }
 0x217   :  { %v1895_v22 = vpack.c.bf16 %v5569_v61, %v5567_v5  ;;  %v1501_v39 = vpop.f32.mrf.mxu2  ;;  %v4061_v21 = vld [vmem:[%s6041_s2 + $0x1a8] sm:$0xff]  ;;  %2622 = vmatpush.bf16.msrb.mxu0 %v4045_v29  ;;  %2751 = vmatpush.bf16.msrb.mxu3 %v4069_v19  ;;  %v4043_v29 = vld [vmem:[%s6041_s2 + $0x118] sm:$0xff] }
 0x218   :  { %v5597_v25 = vsel %vm1606_vm0, %v1459_v3, %v1710_v31  ;;  %2708 = vmatpush.bf16.msrb.mxu2 %v4061_v21  ;;  %v4060_v3 = vld [vmem:[%s6041_s2 + $0x1a0] sm:$0xff]  ;;  %v4059_v21 = vld [vmem:[%s6041_s2 + $0x198] sm:$0xff]  ;;  %v6126_v19 = vld [vmem:[#allocation16_spill] sm:$0xff] }
 0x219   :  { %v1544_v45 = vpop.f32.mrf.mxu3  ;;  %v1417_v49 = vpop.f32.mrf.mxu0  ;;  %2666 = vmatpush.bf16.msrb.mxu1 %v4052_v63  ;;  %v6123_v31 = vld [vmem:[#allocation6_spill] sm:$0xff]  ;;  %v6148_v5 = vld [vmem:[#allocation23_spill] sm:$0xff] }
 0x21a   :  { %v1545_v43 = vadd.f32 %v1544_v45, %v1501_v39  ;;  %v6149_v61 = vld [vmem:[#allocation22_spill] sm:$0xff] }
 0x21b   :  { %v1460_v15 = vpop.f32.mrf.mxu1  ;;  %2623 = vmatpush.bf16.msrb.mxu0 %v4044_v62 }
 0x21c   :  { %v1461_v7 = vadd.f32 %v1460_v15, %v1417_v49  ;;  %v1711_v0 = vmul.f32 0.2, %v1545_v43  ;;  %vm1607_vm2 = vcmp.ge.f32.partialorder %v1545_v43, 0.0  ;;  %v4068_v49 = vld [vmem:[%s6041_s2 + $0x1e0] sm:$0xff]  ;;  %v6121_v15 = vpack.c.bf16 %v6119_v26, %v6120_v44  ;;  %2709 = vmatpush.bf16.msrb.mxu2 %v4060_v3  ;;  %v4066_v26 = vld [vmem:[%s6041_s2 + $0x1d0] sm:$0xff] }
 0x21d   :  { %2752 = vmatpush.bf16.msrb.mxu3 %v4068_v49  ;;  %2667 = vmatpush.bf16.msrb.mxu1 %v4051_v12 }
 0x21e   :  { %vm1614_vm1 = vcmp.ge.f32.partialorder %v1461_v7, 0.0  ;;  %v1718_v28 = vmul.f32 0.2, %v1461_v7 }
 0x21f   :  { %v1503_v55 = vpop.f32.mrf.mxu2  ;;  %2624 = vmatpush.bf16.msrb.mxu0 %v4043_v29 }
 0x220   :  { %v5599_v18 = vsel %vm1614_vm1, %v1461_v7, %v1718_v28  ;;  %v6124_v7 = vpack.c.bf16 %v6122_v23, %v6123_v31  ;;  %v6125_v28 = vpack.c.bf16 %v5259_v30, %v5257_v24  ;;  %v4067_v30 = vld [vmem:[%s6041_s2 + $0x1d8] sm:$0xff]  ;;  %2710 = vmatpush.bf16.msrb.mxu2 %v4059_v21  ;;  %v4049_v23 = vld [vmem:[%s6041_s2 + $0x148] sm:$0xff] }
 0x221   :  { %v1902_v2 = vpack.c.bf16 %v5599_v18, %v5597_v25  ;;  %v1546_v11 = vpop.f32.mrf.mxu3  ;;  %v1420_v8 = vpop.f32.mrf.mxu0  ;;  %2753 = vmatpush.bf16.msrb.mxu3 %v4067_v30  ;;  %v4057_v31 = vld [vmem:[%s6041_s2 + $0x188] sm:$0xff]  ;;  %v4040_v30 = vld [vmem:[%s6041_s2 + $0x100] sm:$0xff]  ;;  %v6151_v18 = vld [vmem:[#allocation25_spill] sm:$0xff] }
 0x222   :  { %v1547_v50 = vadd.f32 %v1546_v11, %v1503_v55  ;;  %v6127_v55 = vpack.c.bf16 %v5269_v53, %v6126_v19  ;;  %v5636_v11 = vsel %vm1607_vm2, %v1545_v43, %v1711_v0  ;;  %v4042_v53 = vld [vmem:[%s6041_s2 + $0x110] sm:$0xff] }
 0x223   :  { %v1463_v39 = vpop.f32.mrf.mxu1  ;;  %v4050_v43 = vld [vmem:[%s6041_s2 + $0x150] sm:$0xff]  ;;  %2625 = vmatpush.bf16.msrb.mxu0 %v4042_v53  ;;  %v4056_v53 = vld [vmem:[%s6041_s2 + $0x180] sm:$0xff] }
 0x224   :  { %v1464_v45 = vadd.f32 %v1463_v39, %v1420_v8  ;;  %vm1615_vm3 = vcmp.ge.f32.partialorder %v1547_v50, 0.0  ;;  %v1719_v32 = vmul.f32 0.2, %v1547_v50  ;;  %2476 = vmatmul.bf16.gmra.mxu0 %v6121_v15  ;;  %2562 = vmatmul.bf16.gmra.mxu2 %v6125_v28  ;;  %v4058_v0 = vld [vmem:[%s6041_s2 + $0x190] sm:$0xff]  ;;  %v4041_v15 = vld [vmem:[%s6041_s2 + $0x108] sm:$0xff] }
 0x225   :  { %2668 = vmatpush.bf16.msrb.mxu1 %v4050_v43  ;;  %2711 = vmatpush.bf16.msrb.mxu2 %v4058_v0  ;;  %v4064_v0 = vld [vmem:[%s6041_s2 + $0x1c0] sm:$0xff] }
 0x226   :  { %2519 = vmatmul.bf16.gmra.mxu1 %v6124_v7  ;;  %2605 = vmatmul.bf16.gmra.mxu3 %v6127_v55  ;;  %v5638_v24 = vsel %vm1615_vm3, %v1547_v50, %v1719_v32  ;;  %v1726_v49 = vmul.f32 0.2, %v1464_v45  ;;  %vm1622_vm4 = vcmp.ge.f32.partialorder %v1464_v45, 0.0  ;;  %v4065_v7 = vld [vmem:[%s6041_s2 + $0x1c8] sm:$0xff] }
 0x227   :  { %v1903_v8 = vpack.c.bf16 %v5638_v24, %v5636_v11  ;;  %v1506_v62 = vpop.f32.mrf.mxu2  ;;  %2754 = vmatpush.bf16.msrb.mxu3 %v4066_v26  ;;  %2626 = vmatpush.bf16.msrb.mxu0 %v4041_v15  ;;  %v6132_v15 = vld [vmem:[#allocation11_spill] sm:$0xff]  ;;  %v6154_v24 = vld [vmem:[#allocation26_spill] sm:$0xff] }
 0x228   :  { %v5669_v28 = vsel %vm1622_vm4, %v1464_v45, %v1726_v49  ;;  %v6128_v49 = vld [vmem:[#allocation9_spill] sm:$0xff]  ;;  %vm1668_vm4 = vcmp.ge.f32.partialorder %v5479_v36, 0.0 }
 0x229   :  { %v1549_v63 = vpop.f32.mrf.mxu3  ;;  %v1422_v3 = vpop.f32.mrf.mxu0  ;;  %2669 = vmatpush.bf16.msrb.mxu1 %v4049_v23  ;;  %2712 = vmatpush.bf16.msrb.mxu2 %v4057_v31  ;;  %v6134_v31 = vpack.c.bf16 %v5275_v10, %v5273_v52  ;;  %v6136_v10 = vld [vmem:[#allocation10_spill] sm:$0xff] }
 0x22a   :  { %v1550_v50 = vadd.f32 %v1549_v63, %v1506_v62  ;;  %v4048_v62 = vld [vmem:[%s6041_s2 + $0x140] sm:$0xff]  ;;  %vm1664_vm8 = vcmp.ge.f32.partialorder %v6136_v10, 0.0  ;;  %v1768_v52 = vmul.f32 0.2, %v6136_v10 }
 0x22b   :  { %v1465_v39 = vpop.f32.mrf.mxu1  ;;  %2755 = vmatpush.bf16.msrb.mxu3 %v4065_v7  ;;  %2627 = vmatpush.bf16.msrb.mxu0 %v4040_v30  ;;  %v6135_v7 = vpack.c.bf16 %v5287_v33, %v5285_v38 }
 0x22c   :  { %v1466_v32 = vadd.f32 %v1465_v39, %v1422_v3  ;;  %v1727_v45 = vmul.f32 0.2, %v1550_v50  ;;  %vm1623_vm6 = vcmp.ge.f32.partialorder %v1550_v50, 0.0 }
 0x22d   :  { %2670 = vmatpush.bf16.msrb.mxu1 %v4048_v62  ;;  %2713 = vmatpush.bf16.msrb.mxu2 %v4056_v53  ;;  %v6137_v53 = vld [vmem:[#allocation13_spill] sm:$0xff] }
 0x22e   :  { %vm1630_vm5 = vcmp.ge.f32.partialorder %v1466_v32, 0.0  ;;  %v1734_v44 = vmul.f32 0.2, %v1466_v32  ;;  %vm1665_vm9 = vcmp.ge.f32.partialorder %v6137_v53, 0.0 }
 0x22f   :  { %v1508_v12 = vpop.f32.mrf.mxu2  ;;  %2756 = vmatpush.bf16.msrb.mxu3 %v4064_v0  ;;  %v6139_v0 = vld [vmem:[#allocation18_spill] sm:$0xff] }
 0x230   :  { %v5671_v29 = vsel %vm1630_vm5, %v1466_v32, %v1734_v44  ;;  %v6129_v32 = vld [vmem:[#allocation8_spill] sm:$0xff]  ;;  %vm1667_vm13 = vcmp.ge.f32.partialorder %v6139_v0, 0.0  ;;  %vm1669_vm5 = vcmp.ge.f32.partialorder %v5499_v17, 0.0 }
 0x231   :  { %v1551_v19 = vpop.f32.mrf.mxu3  ;;  %v1425_v55 = vpop.f32.mrf.mxu0  ;;  %v6130_v26 = vpack.c.bf16 %v6128_v49, %v6129_v32  ;;  %v6131_v44 = vld [vmem:[#allocation12_spill] sm:$0xff] }
 0x232   :  { %v1552_v63 = vadd.f32 %v1551_v19, %v1508_v12  ;;  %v6133_v23 = vpack.c.bf16 %v6131_v44, %v6132_v15  ;;  %v5699_v12 = vsel %vm1623_vm6, %v1550_v50, %v1727_v45  ;;  %v1769_v50 = vmul.f32 0.2, %v6137_v53  ;;  %v6138_v45 = vld [vmem:[#allocation17_spill] sm:$0xff] }
 0x233   :  { %v1468_v3 = vpop.f32.mrf.mxu1  ;;  %vm1666_vm11 = vcmp.ge.f32.partialorder %v6138_v45, 0.0  ;;  %v1872_v44 = vsel %vm1664_vm8, %v6136_v10, %v1768_v52  ;;  %vm2803_vm8 = vcmask 1041408  }
 0x234   :  { %v1469_v43 = vadd.f32 %v1468_v3, %v1425_v55  ;;  %vm1631_vm7 = vcmp.ge.f32.partialorder %v1552_v63, 0.0  ;;  %v1735_v39 = vmul.f32 0.2, %v1552_v63  ;;  %2481 = vmatmul.bf16.gmra.mxu0 %v6130_v26  ;;  %2567 = vmatmul.bf16.gmra.mxu2 %v6134_v31  ;;  %v1928_v10 = vpack.c.bf16 %v1872_v44, %v1872_v44 }
 0x236   :  { %2524 = vmatmul.bf16.gmra.mxu1 %v6133_v23  ;;  %2610 = vmatmul.bf16.gmra.mxu3 %v6135_v7  ;;  %v5701_v19 = vsel %vm1631_vm7, %v1552_v63, %v1735_v39  ;;  %v1742_v38 = vmul.f32 0.2, %v1469_v43  ;;  %v1770_v63 = vmul.f32 0.2, %v6138_v45  ;;  %vm1638_vm10 = vcmp.ge.f32.partialorder %v1469_v43, 0.0 }
 0x237   :  { %v1511_v30 = vpop.f32.mrf.mxu2  ;;  %v1771_v39 = vmul.f32 0.2, %v6139_v0  ;;  %v1873_v7 = vsel %vm1665_vm9, %v6137_v53, %v1769_v50 }
 0x238   :  { %v5714_v15 = vsel %vm1638_vm10, %v1469_v43, %v1742_v38  ;;  %v1929_v52 = vpack.c.bf16 %v1873_v7, %v1873_v7 }
 0x239   :  { %v1554_v62 = vpop.f32.mrf.mxu3  ;;  %v1427_v3 = vpop.f32.mrf.mxu0  ;;  %v1875_v6 = vsel %vm1667_vm13, %v6139_v0, %v1771_v39  ;;  %vm3001_vm13 = vcmask 1040384  }
 0x23a   :  { %v1555_v49 = vadd.f32 %v1554_v62, %v1511_v30  ;;  %v1874_v30 = vsel %vm1666_vm11, %v6138_v45, %v1770_v63  ;;  %v1931_v53 = vpack.c.bf16 %v1875_v6, %v1875_v6 }
 0x23b   :  { %v1470_v32 = vpop.f32.mrf.mxu1  ;;  %v1930_v38 = vpack.c.bf16 %v1874_v30, %v1874_v30 }
 0x23c   :  { %v1471_v33 = vadd.f32 %v1470_v32, %v1427_v3  ;;  %v1743_v41 = vmul.f32 0.2, %v1555_v49  ;;  %vm1639_vm14 = vcmp.ge.f32.partialorder %v1555_v49, 0.0 }
 0x23e   :  { %vm1646_vm12 = vcmp.ge.f32.partialorder %v1471_v33, 0.0  ;;  %v1750_v26 = vmul.f32 0.2, %v1471_v33  ;;  %v5723_v50 = vsel %vm1639_vm14, %v1555_v49, %v1743_v41 }
 0x23f   :  { %v1513_v31 = vpop.f32.mrf.mxu2 }
 0x240   :  { %v5716_v23 = vsel %vm1646_vm12, %v1471_v33, %v1750_v26 }
 0x241   :  { %v1918_v62 = vpack.c.bf16 %v5716_v23, %v5714_v15  ;;  %v1556_v3 = vpop.f32.mrf.mxu3  ;;  %v1430_v32 = vpop.f32.mrf.mxu0  ;;  %v6162_v23 = vpack.c.bf16 %v5475_v58, %v5473_v57  ;;  %v1772_v57 = vmul.f32 0.2, %v5479_v36 }
 0x242   :  { %v1557_v55 = vadd.f32 %v1556_v3, %v1513_v31 }
 0x243   :  { %v1473_v21 = vpop.f32.mrf.mxu1 }
 0x244   :  { %v1474_v43 = vadd.f32 %v1473_v21, %v1430_v32  ;;  %vm1647_vm15 = vcmp.ge.f32.partialorder %v1557_v55, 0.0  ;;  %v1751_v33 = vmul.f32 0.2, %v1557_v55  ;;  %2486 = vmatmul.bf16.gmra.mxu0 %v1928_v10  ;;  %2572 = vmatmul.bf16.gmra.mxu2 %v1930_v38 }
 0x246   :  { %2529 = vmatmul.bf16.gmra.mxu1 %v1929_v52  ;;  %2615 = vmatmul.bf16.gmra.mxu3 %v1931_v53  ;;  %v5725_v45 = vsel %vm1647_vm15, %v1557_v55, %v1751_v33  ;;  %v1758_v31 = vmul.f32 0.2, %v1474_v43  ;;  %vm1654_vm0 = vcmp.ge.f32.partialorder %v1474_v43, 0.0 }
 0x247   :  { %v1919_v63 = vpack.c.bf16 %v5725_v45, %v5723_v50  ;;  %v1516_v0 = vpop.f32.mrf.mxu2 }
 0x248   :  { %v5729_v30 = vsel %vm1654_vm0, %v1474_v43, %v1758_v31  ;;  %v6140_v43 = vpack.c.bf16 %v5299_v51, %v5297_v27 }
 0x249   :  { %v1559_v39 = vpop.f32.mrf.mxu3  ;;  %v1432_v26 = vpop.f32.mrf.mxu0 }
 0x24a   :  { %v1560_v21 = vadd.f32 %v1559_v39, %v1516_v0  ;;  %v6141_v0 = vld [vmem:[#allocation20_spill] sm:$0xff]  ;;  %v6142_v39 = vld [vmem:[#allocation19_spill] sm:$0xff] }
 0x24b   :  { %v1475_v44 = vpop.f32.mrf.mxu1 }
 0x24c   :  { %v1476_v7 = vadd.f32 %v1475_v44, %v1432_v26  ;;  %v1759_v10 = vmul.f32 0.2, %v1560_v21  ;;  %vm1655_vm2 = vcmp.ge.f32.partialorder %v1560_v21, 0.0  ;;  %v6143_v26 = vpack.c.bf16 %v6141_v0, %v6142_v39 }
 0x24e   :  { %vm1662_vm1 = vcmp.ge.f32.partialorder %v1476_v7, 0.0  ;;  %v1766_v6 = vmul.f32 0.2, %v1476_v7  ;;  %v5749_v44 = vsel %vm1655_vm2, %v1560_v21, %v1759_v10 }
 0x24f   :  { %v1518_v41 = vpop.f32.mrf.mxu2 }
 0x250   :  { %v5731_v3 = vsel %vm1662_vm1, %v1476_v7, %v1766_v6 }
 0x251   :  { %v1926_v55 = vpack.c.bf16 %v5731_v3, %v5729_v30  ;;  %v1561_v49 = vpop.f32.mrf.mxu3  ;;  %v1435_v32 = vpop.f32.mrf.mxu0  ;;  %v1876_v3 = vsel %vm1668_vm4, %v5479_v36, %v1772_v57 }
 0x252   :  { %v1562_v52 = vadd.f32 %v1561_v49, %v1518_v41 }
 0x253   :  { %v1478_v38 = vpop.f32.mrf.mxu1 }
 0x254   :  { %v5735_v33 = vadd.f32 %v1478_v38, %v1435_v32  ;;  %vm1663_vm3 = vcmp.ge.f32.partialorder %v1562_v52, 0.0  ;;  %v1767_v53 = vmul.f32 0.2, %v1562_v52  ;;  %2628 = vmatmul.bf16.vlgmr.msrb.gmra.mxu0 %v6140_v43  ;;  %2714 = vmatmul.bf16.vlgmr.msrb.gmra.mxu2 %v1886_v40 }
 0x256   :  { %2671 = vmatmul.bf16.vlgmr.msrb.gmra.mxu1 %v6143_v26  ;;  %2757 = vmatmul.bf16.vlgmr.msrb.gmra.mxu3 %v1887_v56  ;;  %v5751_v31 = vsel %vm1663_vm3, %v1562_v52, %v1767_v53  ;;  %vm1670_vm6 = vcmp.ge.f32.partialorder %v5735_v33, 0.0 }
 0x257   :  { %v1927_v27 = vpack.c.bf16 %v5751_v31, %v5749_v44  ;;  %v1521_v51 = vpop.f32.mrf.mxu2 }
 0x259   :  { %v1564_v7 = vpop.f32.mrf.mxu3  ;;  %v1437_v6 = vpop.f32.mrf.mxu0 }
 0x25a   :  { %v5755_v41 = vadd.f32 %v1564_v7, %v1521_v51 }
 0x25b   :  { %v1480_v49 = vpop.f32.mrf.mxu1 }
 0x25c   :  { %v1775_v30 = vmul.f32 0.2, %v5755_v41  ;;  %vm1671_vm7 = vcmp.ge.f32.partialorder %v5755_v41, 0.0 }
 0x25f   :  { %v1523_v32 = vpop.f32.mrf.mxu2 }
 0x261   :  { %v1566_v59 = vpop.f32.mrf.mxu3  ;;  %v2457_v60 = vpop.f32.mrf.mxu0 }
 0x263   :  { %v2500_v40 = vpop.f32.mrf.mxu1 }
 0x264   :  { %v2501_v38 = vadd.f32 %v2500_v40, %v2457_v60  ;;  %2633 = vmatmul.bf16.gmra.mxu0 %v6144_v9  ;;  %2719 = vmatmul.bf16.gmra.mxu2 %v1894_v35  ;;  %v6147_v35 = vpack.c.bf16 %v5367_v4, %v6146_v20 }
 0x266   :  { %2676 = vmatmul.bf16.gmra.mxu1 %v6145_v16  ;;  %2762 = vmatmul.bf16.gmra.mxu3 %v1895_v22  ;;  %v6150_v22 = vpack.c.bf16 %v6148_v5, %v6149_v61 }
 0x267   :  { %v2543_v56 = vpop.f32.mrf.mxu2 }
 0x268   :  { %v2544_v21 = vadd.f32 %v2543_v56, %v2501_v38 }
 0x269   :  { %v2586_v10 = vpop.f32.mrf.mxu3  ;;  %v2459_v52 = vpop.f32.mrf.mxu0 }
 0x26a   :  { %v5769_v43 = vadd.f32 %v2586_v10, %v2544_v21  ;;  %v6156_v21 = vpack.c.bf16 %v5671_v29, %v5669_v28  ;;  %v6157_v10 = vpack.c.bf16 %v5701_v19, %v5699_v12  ;;  %v6158_v29 = vpack.c.bf16 %v5459_v37, %v5457_v46  ;;  %v6159_v12 = vld [vmem:[#allocation28_spill] sm:$0xff]  ;;  %v6160_v19 = vld [vmem:[#allocation27_spill] sm:$0xff] }
 0x26b   :  { %v2502_v53 = vpop.f32.mrf.mxu1  ;;  %v6161_v61 = vpack.c.bf16 %v6159_v12, %v6160_v19 }
 0x26c   :  { %v2503_v48 = vadd.f32 %v2502_v53, %v2459_v52 }
 0x26f   :  { %v2545_v1 = vpop.f32.mrf.mxu2 }
 0x270   :  { %v2546_v0 = vadd.f32 %v2545_v1, %v2503_v48 }
 0x271   :  { %v2588_v42 = vpop.f32.mrf.mxu3  ;;  %v2462_v54 = vpop.f32.mrf.mxu0 }
 0x272   :  { %v5771_v26 = vadd.f32 %v2588_v42, %v2546_v0 }
 0x273   :  { %v2505_v39 = vpop.f32.mrf.mxu1 }
 0x274   :  { %v2506_v34 = vadd.f32 %v2505_v39, %v2462_v54  ;;  %2638 = vmatmul.bf16.gmra.mxu0 %v6147_v35  ;;  %2724 = vmatmul.bf16.gmra.mxu2 %v1902_v2  ;;  %v6152_v2 = vld [vmem:[#allocation24_spill] sm:$0xff] }
 0x275   :  { %v6153_v11 = vpack.c.bf16 %v6151_v18, %v6152_v2 }
 0x276   :  { %2681 = vmatmul.bf16.gmra.mxu1 %v6150_v22  ;;  %2767 = vmatmul.bf16.gmra.mxu3 %v1903_v8  ;;  %v6155_v8 = vpack.c.bf16 %v5453_v13, %v6154_v24  ;;  %v1879_v24 = vsel %vm1671_vm7, %v5755_v41, %v1775_v30 }
 0x277   :  { %v2548_v51 = vpop.f32.mrf.mxu2 }
 0x278   :  { %v2549_v7 = vadd.f32 %v2548_v51, %v2506_v34 }
 0x279   :  { %v2591_v6 = vpop.f32.mrf.mxu3  ;;  %v2464_v49 = vpop.f32.mrf.mxu0 }
 0x27a   :  { %v5785_v59 = vadd.f32 %v2591_v6, %v2549_v7 }
 0x27b   :  { %v2507_v32 = vpop.f32.mrf.mxu1 }
 0x27c   :  { %v2508_v4 = vadd.f32 %v2507_v32, %v2464_v49 }
 0x27f   :  { %v2550_v60 = vpop.f32.mrf.mxu2 }
 0x280   :  { %v2551_v40 = vadd.f32 %v2550_v60, %v2508_v4 }
 0x281   :  { %v2593_v38 = vpop.f32.mrf.mxu3  ;;  %v2467_v9 = vpop.f32.mrf.mxu0 }
 0x282   :  { %v5787_v56 = vadd.f32 %v2593_v38, %v2551_v40 }
 0x283   :  { %v2510_v16 = vpop.f32.mrf.mxu1 }
 0x284   :  { %v2511_v25 = vadd.f32 %v2510_v16, %v2467_v9  ;;  %2643 = vmatmul.bf16.gmra.mxu0 %v6153_v11  ;;  %2729 = vmatmul.bf16.gmra.mxu2 %v6156_v21  ;;  %v1932_v21 = vpack.c.bf16 %v1876_v3, %v1876_v3 }
 0x286   :  { %2686 = vmatmul.bf16.gmra.mxu1 %v6155_v8  ;;  %2772 = vmatmul.bf16.gmra.mxu3 %v6157_v10 }
 0x287   :  { %v2553_v52 = vpop.f32.mrf.mxu2 }
 0x288   :  { %v2554_v53 = vadd.f32 %v2553_v52, %v2511_v25 }
 0x289   :  { %v2596_v48 = vpop.f32.mrf.mxu3  ;;  %v2469_v1 = vpop.f32.mrf.mxu0 }
 0x28a   :  { %v5801_v42 = vadd.f32 %v2596_v48, %v2554_v53 }
 0x28b   :  { %v2512_v0 = vpop.f32.mrf.mxu1 }
 0x28c   :  { %v2513_v54 = vadd.f32 %v2512_v0, %v2469_v1  ;;  %v1935_v1 = vpack.c.bf16 %v1879_v24, %v1879_v24 }
 0x28f   :  { %v2555_v39 = vpop.f32.mrf.mxu2 }
 0x290   :  { %v2556_v34 = vadd.f32 %v2555_v39, %v2513_v54 }
 0x291   :  { %v2598_v13 = vpop.f32.mrf.mxu3  ;;  %v2472_v20 = vpop.f32.mrf.mxu0 }
 0x292   :  { %v5803_v5 = vadd.f32 %v2598_v13, %v2556_v34 }
 0x293   :  { %v2515_v35 = vpop.f32.mrf.mxu1 }
 0x294   :  { %v2516_v28 = vadd.f32 %v2515_v35, %v2472_v20  ;;  %2648 = vmatmul.bf16.gmra.mxu0 %v6158_v29  ;;  %2734 = vmatmul.bf16.gmra.mxu2 %v1918_v62  ;;  %v6163_v62 = vpack.c.bf16 %v5495_v14, %v5493_v47  ;;  %v1773_v47 = vmul.f32 0.2, %v5499_v17  ;;  %v1774_v14 = vmul.f32 0.2, %v5735_v33 }
 0x296   :  { %2691 = vmatmul.bf16.gmra.mxu1 %v6161_v61  ;;  %2777 = vmatmul.bf16.gmra.mxu3 %v1919_v63  ;;  %v1877_v44 = vsel %vm1669_vm5, %v5499_v17, %v1773_v47  ;;  %v1878_v31 = vsel %vm1670_vm6, %v5735_v33, %v1774_v14 }
 0x297   :  { %v2558_v22 = vpop.f32.mrf.mxu2  ;;  %v1933_v53 = vpack.c.bf16 %v1877_v44, %v1877_v44  ;;  %v1934_v48 = vpack.c.bf16 %v1878_v31, %v1878_v31 }
 0x298   :  { %v2559_v51 = vadd.f32 %v2558_v22, %v2516_v28 }
 0x299   :  { %v2601_v7 = vpop.f32.mrf.mxu3  ;;  %v2474_v6 = vpop.f32.mrf.mxu0 }
 0x29a   :  { %v5817_v32 = vadd.f32 %v2601_v7, %v2559_v51 }
 0x29b   :  { %v2517_v49 = vpop.f32.mrf.mxu1 }
 0x29c   :  { %v2518_v46 = vadd.f32 %v2517_v49, %v2474_v6 }
 0x29f   :  { %v2560_v37 = vpop.f32.mrf.mxu2 }
 0x2a0   :  { %v2561_v4 = vadd.f32 %v2560_v37, %v2518_v46 }
 0x2a1   :  { %v2603_v60 = vpop.f32.mrf.mxu3  ;;  %v2477_v40 = vpop.f32.mrf.mxu0 }
 0x2a2   :  { %v5819_v9 = vadd.f32 %v2603_v60, %v2561_v4 }
 0x2a3   :  { %v2520_v38 = vpop.f32.mrf.mxu1 }
 0x2a4   :  { %v2521_v15 = vadd.f32 %v2520_v38, %v2477_v40  ;;  %2653 = vmatmul.bf16.gmra.mxu0 %v6162_v23  ;;  %2739 = vmatmul.bf16.gmra.mxu2 %v1926_v55 }
 0x2a6   :  { %2696 = vmatmul.bf16.gmra.mxu1 %v6163_v62  ;;  %2782 = vmatmul.bf16.gmra.mxu3 %v1927_v27 }
 0x2a7   :  { %v2563_v50 = vpop.f32.mrf.mxu2 }
 0x2a8   :  { %v2564_v45 = vadd.f32 %v2563_v50, %v2521_v15 }
 0x2a9   :  { %v2606_v63 = vpop.f32.mrf.mxu3  ;;  %v2479_v16 = vpop.f32.mrf.mxu0 }
 0x2aa   :  { %v5834_v58 = vadd.f32 %v2606_v63, %v2564_v45 }
 0x2ab   :  { %v2522_v25 = vpop.f32.mrf.mxu1 }
 0x2ac   :  { %v2523_v18 = vadd.f32 %v2522_v25, %v2479_v16 }
 0x2af   :  { %v2565_v55 = vpop.f32.mrf.mxu2 }
 0x2b0   :  { %v2566_v27 = vadd.f32 %v2565_v55, %v2523_v18 }
 0x2b1   :  { %v2608_v2 = vpop.f32.mrf.mxu3  ;;  %v2482_v11 = vpop.f32.mrf.mxu0 }
 0x2b2   :  { %v5847_v10 = vadd.f32 %v2608_v2, %v2566_v27 }
 0x2b3   :  { %v2525_v8 = vpop.f32.mrf.mxu1 }
 0x2b4   :  { %v2526_v52 = vadd.f32 %v2525_v8, %v2482_v11  ;;  %2658 = vmatmul.bf16.gmra.mxu0 %v1932_v21  ;;  %2744 = vmatmul.bf16.gmra.mxu2 %v1934_v48 }
 0x2b6   :  { %2701 = vmatmul.bf16.gmra.mxu1 %v1933_v53  ;;  %2787 = vmatmul.bf16.gmra.mxu3 %v1935_v1 }
 0x2b7   :  { %v2568_v36 = vpop.f32.mrf.mxu2 }
 0x2b8   :  { %v2569_v17 = vadd.f32 %v2568_v36, %v2526_v52 }
 0x2b9   :  { %v2611_v33 = vpop.f32.mrf.mxu3  ;;  %v2484_v0 = vpop.f32.mrf.mxu0 }
 0x2ba   :  { %v5849_v39 = vadd.f32 %v2611_v33, %v2569_v17 }
 0x2bb   :  { %v2527_v54 = vpop.f32.mrf.mxu1 }
 0x2bc   :  { %v2528_v41 = vadd.f32 %v2527_v54, %v2484_v0 }
 0x2bf   :  { %v2570_v34 = vpop.f32.mrf.mxu2 }
 0x2c0   :  { %v2571_v13 = vadd.f32 %v2570_v34, %v2528_v41 }
 0x2c1   :  { %v2613_v20 = vpop.f32.mrf.mxu3  ;;  %v2487_v35 = vpop.f32.mrf.mxu0 }
 0x2c2   :  { %v5851_v29 = vadd.f32 %v2613_v20, %v2571_v13 }
 0x2c3   :  { %v2530_v28 = vpop.f32.mrf.mxu1 }
 0x2c4   :  { %v2531_v12 = vadd.f32 %v2530_v28, %v2487_v35 }
 0x2c7   :  { %v2573_v19 = vpop.f32.mrf.mxu2 }
 0x2c8   :  { %v2574_v61 = vadd.f32 %v2573_v19, %v2531_v12 }
 0x2c9   :  { %v2616_v22 = vpop.f32.mrf.mxu3  ;;  %v2489_v51 = vpop.f32.mrf.mxu0 }
 0x2ca   :  { %v5853_v6 = vadd.f32 %v2616_v22, %v2574_v61 }
 0x2cb   :  { %v2532_v7 = vpop.f32.mrf.mxu1 }
 0x2cf   :  { %v2575_v49 = vpop.f32.mrf.mxu2 }
 0x2d1   :  { %v2618_v46 = vpop.f32.mrf.mxu3  ;;  %v2629_v37 = vpop.f32.mrf.mxu0 }
 0x2d2   :  { %v2630_v4 = vadd.f32 %v2629_v37, %v5769_v43 }
 0x2d3   :  { %v2672_v60 = vpop.f32.mrf.mxu1 }
 0x2d4   :  { %v2673_v40 = vadd.f32 %v2672_v60, %v2630_v4 }
 0x2d7   :  { %v2715_v38 = vpop.f32.mrf.mxu2 }
 0x2d8   :  { %v2716_v15 = vadd.f32 %v2715_v38, %v2673_v40 }
 0x2d9   :  { %v2758_v23 = vpop.f32.mrf.mxu3  ;;  %v2631_v62 = vpop.f32.mrf.mxu0 }
 0x2da   :  { %v2632_v50 = vadd.f32 %v2631_v62, %v5771_v26  ;;  %v5857_v63 = vadd.f32 %v2758_v23, %v2716_v15 }
 0x2db   :  { %v2674_v45 = vpop.f32.mrf.mxu1 }
 0x2dc   :  { %v2675_v16 = vadd.f32 %v2674_v45, %v2632_v50 }
 0x2df   :  { %v2717_v25 = vpop.f32.mrf.mxu2 }
 0x2e0   :  { %v2718_v57 = vadd.f32 %v2717_v25, %v2675_v16 }
 0x2e1   :  { %v2760_v18 = vpop.f32.mrf.mxu3  ;;  %v2634_v47 = vpop.f32.mrf.mxu0 }
 0x2e2   :  { %v2635_v14 = vadd.f32 %v2634_v47, %v5785_v59  ;;  %v5860_v43 = vadd.f32 %v2760_v18, %v2718_v57 }
 0x2e3   :  { %v2677_v30 = vpop.f32.mrf.mxu1 }
 0x2e4   :  { %v2678_v3 = vadd.f32 %v2677_v30, %v2635_v14  ;;  %v2792_v55 = vadd.f32 %v5860_v43, %v5857_v63 }
 0x2e7   :  { %v2720_v44 = vpop.f32.mrf.mxu2 }
 0x2e8   :  { %v2721_v31 = vadd.f32 %v2720_v44, %v2678_v3 }
 0x2e9   :  { %v2763_v26 = vpop.f32.mrf.mxu3  ;;  %v2636_v27 = vpop.f32.mrf.mxu0 }
 0x2ea   :  { %v5864_v11 = vadd.f32 %v2763_v26, %v2721_v31  ;;  %v2637_v24 = vadd.f32 %v2636_v27, %v5787_v56 }
 0x2eb   :  { %v2679_v2 = vpop.f32.mrf.mxu1 }
 0x2ec   :  { %v2793_v8 = vadd.f32 %v2792_v55, %v5864_v11  ;;  %v2680_v21 = vadd.f32 %v2679_v2, %v2637_v24 }
 0x2ef   :  { %v2722_v59 = vpop.f32.mrf.mxu2 }
 0x2f0   :  { %v2723_v52 = vadd.f32 %v2722_v59, %v2680_v21 }
 0x2f1   :  { %v2765_v53 = vpop.f32.mrf.mxu3  ;;  %v2639_v48 = vpop.f32.mrf.mxu0 }
 0x2f2   :  { %v5868_v36 = vadd.f32 %v2765_v53, %v2723_v52  ;;  %v2640_v17 = vadd.f32 %v2639_v48, %v5801_v42 }
 0x2f3   :  { %v2682_v1 = vpop.f32.mrf.mxu1 }
 0x2f4   :  { %v2794_v33 = vadd.f32 %v2793_v8, %v5868_v36  ;;  %v2683_v0 = vadd.f32 %v2682_v1, %v2640_v17 }
 0x2f7   :  { %v2725_v54 = vpop.f32.mrf.mxu2 }
 0x2f8   :  { %v2726_v41 = vadd.f32 %v2725_v54, %v2683_v0 }
 0x2f9   :  { %v2768_v34 = vpop.f32.mrf.mxu3  ;;  %v2641_v13 = vpop.f32.mrf.mxu0 }
 0x2fa   :  { %v5872_v20 = vadd.f32 %v2768_v34, %v2726_v41  ;;  %v2642_v35 = vadd.f32 %v2641_v13, %v5803_v5 }
 0x2fb   :  { %v2684_v56 = vpop.f32.mrf.mxu1 }
 0x2fc   :  { %v2795_v28 = vadd.f32 %v2794_v33, %v5872_v20  ;;  %v2685_v12 = vadd.f32 %v2684_v56, %v2642_v35 }
 0x2ff   :  { %v2727_v19 = vpop.f32.mrf.mxu2 }
 0x300   :  { %v2728_v61 = vadd.f32 %v2727_v19, %v2685_v12  ;;  %v4084_v12 = vmov 98.0  }
 0x301   :  { %v2770_v22 = vpop.f32.mrf.mxu3  ;;  %v2644_v51 = vpop.f32.mrf.mxu0  ;;  %4076 = vrcp.f32 %v4084_v12 }
 0x302   :  { %v5876_v7 = vadd.f32 %v2770_v22, %v2728_v61  ;;  %v2645_v49 = vadd.f32 %v2644_v51, %v5817_v32 }
 0x303   :  { %v2687_v42 = vpop.f32.mrf.mxu1 }
 0x304   :  { %v2796_v46 = vadd.f32 %v2795_v28, %v5876_v7  ;;  %v2688_v37 = vadd.f32 %v2687_v42, %v2645_v49 }
 0x307   :  { %v2730_v4 = vpop.f32.mrf.mxu2 }
 0x308   :  { %v2731_v60 = vadd.f32 %v2730_v4, %v2688_v37 }
 0x309   :  { %v2773_v40 = vpop.f32.mrf.mxu3  ;;  %v2646_v38 = vpop.f32.mrf.mxu0 }
 0x30a   :  { %v5880_v15 = vadd.f32 %v2773_v40, %v2731_v60  ;;  %v2647_v23 = vadd.f32 %v2646_v38, %v5819_v9 }
 0x30b   :  { %v2689_v5 = vpop.f32.mrf.mxu1 }
 0x30c   :  { %v2797_v62 = vadd.f32 %v2796_v46, %v5880_v15  ;;  %v2690_v50 = vadd.f32 %v2689_v5, %v2647_v23  ;;  %v4077_v46 = vpop.eup %4076 }
 0x30d   :  { %v2813_v38 = vmul.f32 98.0, %v4077_v46  ;;  %vm2817_vm9 = vweird.f32 %v4077_v46 }
 0x30f   :  { %v2732_v45 = vpop.f32.mrf.mxu2 }
 0x310   :  { %v2733_v16 = vadd.f32 %v2732_v45, %v2690_v50  ;;  %v2814_v50 = vsub.f32 1.0, %v2813_v38 }
 0x311   :  { %v2775_v25 = vpop.f32.mrf.mxu3  ;;  %v2649_v57 = vpop.f32.mrf.mxu0 }
 0x312   :  { %v5884_v18 = vadd.f32 %v2775_v25, %v2733_v16  ;;  %v2650_v47 = vadd.f32 %v2649_v57, %v5834_v58  ;;  %v2815_v57 = vmul.f32 %v4077_v46, %v2814_v50 }
 0x313   :  { %v2692_v32 = vpop.f32.mrf.mxu1 }
 0x314   :  { %v2798_v14 = vadd.f32 %v2797_v62, %v5884_v18  ;;  %v2693_v30 = vadd.f32 %v2692_v32, %v2650_v47 }
 0x317   :  { %v2735_v3 = vpop.f32.mrf.mxu2 }
 0x318   :  { %v2736_v55 = vadd.f32 %v2735_v3, %v2693_v30 }
 0x319   :  { %v2778_v44 = vpop.f32.mrf.mxu3  ;;  %v2651_v31 = vpop.f32.mrf.mxu0 }
 0x31a   :  { %v5888_v26 = vadd.f32 %v2778_v44, %v2736_v55  ;;  %v2652_v27 = vadd.f32 %v2651_v31, %v5847_v10 }
 0x31b   :  { %v2694_v9 = vpop.f32.mrf.mxu1 }
 0x31c   :  { %v2799_v2 = vadd.f32 %v2798_v14, %v5888_v26  ;;  %v2695_v24 = vadd.f32 %v2694_v9, %v2652_v27  ;;  %v2816_v14 = vadd.f32 %v4077_v46, %v2815_v57 }
 0x31e   :  { %v2818_v55 = vsel %vm2817_vm9, %v4077_v46, %v2816_v14 }
 0x31f   :  { %v2737_v8 = vpop.f32.mrf.mxu2 }
 0x320   :  { %v2738_v21 = vadd.f32 %v2737_v8, %v2695_v24 }
 0x321   :  { %v2780_v59 = vpop.f32.mrf.mxu3  ;;  %v2654_v52 = vpop.f32.mrf.mxu0 }
 0x322   :  { %v2781_v53 = vadd.f32 %v2780_v59, %v2738_v21  ;;  %v2655_v48 = vadd.f32 %v2654_v52, %v5849_v39 }
 0x323   :  { %v2697_v58 = vpop.f32.mrf.mxu1 }
 0x324   :  { %v2800_v1 = vadd.f32 %v2799_v2, %v2781_v53  ;;  %v2698_v17 = vadd.f32 %v2697_v58, %v2655_v48 }
 0x327   :  { %v2740_v33 = vpop.f32.mrf.mxu2 }
 0x328   :  { %v2741_v0 = vadd.f32 %v2740_v33, %v2698_v17 }
 0x329   :  { %v2783_v54 = vpop.f32.mrf.mxu3  ;;  %v2656_v41 = vpop.f32.mrf.mxu0 }
 0x32a   :  { %v2784_v13 = vadd.f32 %v2783_v54, %v2741_v0  ;;  %v2657_v10 = vadd.f32 %v2656_v41, %v5851_v29 }
 0x32b   :  { %v2699_v34 = vpop.f32.mrf.mxu1 }
 0x32c   :  { %v2801_v56 = vadd.f32 %v2800_v1, %v2784_v13  ;;  %v2700_v35 = vadd.f32 %v2699_v34, %v2657_v10 }
 0x32f   :  { %v2742_v28 = vpop.f32.mrf.mxu2 }
 0x330   :  { %v2743_v19 = vadd.f32 %v2742_v28, %v2700_v35 }
 0x331   :  { %v2785_v61 = vpop.f32.mrf.mxu3  ;;  %v2659_v22 = vpop.f32.mrf.mxu0 }
 0x332   :  { %v2786_v39 = vadd.f32 %v2785_v61, %v2743_v19  ;;  %v2660_v42 = vadd.f32 %v2659_v22, %v5853_v6 }
 0x333   :  { %v2702_v51 = vpop.f32.mrf.mxu1 }
 0x334   :  { %v2802_v49 = vadd.f32 %v2801_v56, %v2786_v39  ;;  %v2703_v37 = vadd.f32 %v2702_v51, %v2660_v42 }
 0x337   :  { %v2745_v4 = vpop.f32.mrf.mxu2 }
 0x338   :  { %v2746_v60 = vadd.f32 %v2745_v4, %v2703_v37 }
 0x339   :  { %v2788_v40 = vpop.f32.mrf.mxu3  ;;  %v2661_v29 = vpop.f32.mrf.mxu0 }
 0x33a   :  { %v2789_v23 = vadd.f32 %v2788_v40, %v2746_v60 }
 0x33b   :  { %v2704_v5 = vpop.f32.mrf.mxu1 }
 0x33c   :  { %v2804_v62 = vsel %vm2803_vm8, %v2789_v23, 0.0 }
 0x33d   :  { %v2805_v45 = vadd.f32 %v2804_v62, %v2802_v49 }
 0x33f   :  { %v2806_v16 = vrot.slane %v2805_v45, 4  ;;  %v2747_v25 = vpop.f32.mrf.mxu2 }
 0x340   :  { %v5933_v25 = vld [vmem:[%s6042_s3] ss:$0 sm:$0xff] }
 0x341   :  { %v2790_v32 = vpop.f32.mrf.mxu3  ;;  %v2807_v6 = vadd.f32 %v2806_v16, %v2805_v45 }
 0x343   :  { %v2808_v47 = vrot.slane %v2807_v6, 2 }
 0x345   :  { %v2809_v30 = vadd.f32 %v2808_v47, %v2807_v6  ;;  %v5941_v6 = vld [vmem:[%s6043_s4] ss:$0 sm:$0xff] }
 0x347   :  { %v2810_v3 = vrot.slane %v2809_v30, 1 }
 0x349   :  { %v2811_v44 = vadd.f32 %v2810_v3, %v2809_v30 }
 0x34b   :  { %v2819_v31 = vmul.f32 %v2818_v55, %v2811_v44 }
 0x34d   :  { %v5897_v9 = vsub.f32 %v5857_v63, %v2819_v31  ;;  %v5900_v27 = vsub.f32 %v5860_v43, %v2819_v31  ;;  %v5903_v2 = vsub.f32 %v5864_v11, %v2819_v31  ;;  %v5906_v24 = vsub.f32 %v5868_v36, %v2819_v31 }
 0x34e   :  { %v5909_v8 = vsub.f32 %v5872_v20, %v2819_v31  ;;  %v5912_v21 = vsub.f32 %v5876_v7, %v2819_v31  ;;  %v2826_v59 = vsub.f32 %v5880_v15, %v2819_v31  ;;  %v2827_v63 = vsub.f32 %v5884_v18, %v2819_v31 }
 0x34f   :  { %v2828_v52 = vsub.f32 %v5888_v26, %v2819_v31  ;;  %v2829_v43 = vsub.f32 %v2781_v53, %v2819_v31  ;;  %v2830_v58 = vsub.f32 %v2784_v13, %v2819_v31  ;;  %v2831_v48 = vsub.f32 %v2786_v39, %v2819_v31 }
 0x350   :  { %v2832_v11 = vsub.f32 %v2789_v23, %v2819_v31  ;;  %v2833_v36 = vmul.f32 %v5897_v9, %v5897_v9  ;;  %v2834_v20 = vmul.f32 %v5900_v27, %v5900_v27  ;;  %v2835_v7 = vmul.f32 %v5903_v2, %v5903_v2 }
 0x351   :  { %v2836_v15 = vmul.f32 %v5906_v24, %v5906_v24  ;;  %v2837_v26 = vmul.f32 %v5909_v8, %v5909_v8  ;;  %v2838_v17 = vmul.f32 %v5912_v21, %v5912_v21  ;;  %v2839_v0 = vmul.f32 %v2826_v59, %v2826_v59 }
 0x352   :  { %v2846_v1 = vadd.f32 %v2834_v20, %v2833_v36  ;;  %v2840_v41 = vmul.f32 %v2827_v63, %v2827_v63  ;;  %v2841_v13 = vmul.f32 %v2828_v52, %v2828_v52  ;;  %v2842_v56 = vmul.f32 %v2829_v43, %v2829_v43 }
 0x353   :  { %v2843_v28 = vmul.f32 %v2830_v58, %v2830_v58  ;;  %v2845_v19 = vmul.f32 %v2832_v11, %v2832_v11  ;;  %v2844_v61 = vmul.f32 %v2831_v48, %v2831_v48 }
 0x354   :  { %v2847_v18 = vadd.f32 %v2846_v1, %v2835_v7 }
 0x355   :  { %v2857_v39 = vsel %vm2803_vm8, %v2845_v19, 0.0 }
 0x356   :  { %v2848_v53 = vadd.f32 %v2847_v18, %v2836_v15  ;;  %v2975_v15 = vld [vmem:[%s6044_s5 + $0x60] sm:$0x3]  ;;  %v2973_v18 = vld [vmem:[%s6044_s5 + $0x50] sm:$0xff] }
 0x358   :  { %v2849_v33 = vadd.f32 %v2848_v53, %v2837_v26 }
 0x35a   :  { %v2850_v54 = vadd.f32 %v2849_v33, %v2838_v17 }
 0x35c   :  { %v2851_v34 = vadd.f32 %v2850_v54, %v2839_v0  ;;  %v2971_v54 = vld [vmem:[%s6044_s5 + $0x40] sm:$0xff] }
 0x35e   :  { %v2852_v10 = vadd.f32 %v2851_v34, %v2840_v41 }
 0x360   :  { %v2853_v35 = vadd.f32 %v2852_v10, %v2841_v13 }
 0x362   :  { %v2854_v12 = vadd.f32 %v2853_v35, %v2842_v56  ;;  %v2972_v35 = vld [vmem:[%s6044_s5 + $0x48] sm:$0xff] }
 0x364   :  { %v2855_v22 = vadd.f32 %v2854_v12, %v2843_v28 }
 0x366   :  { %v2856_v51 = vadd.f32 %v2855_v22, %v2844_v61 }
 0x368   :  { %v2858_v42 = vadd.f32 %v2857_v39, %v2856_v51 }
 0x36a   :  { %v2859_v49 = vrot.slane %v2858_v42, 4 }
 0x36c   :  { %v2860_v46 = vadd.f32 %v2859_v49, %v2858_v42 }
 0x36e   :  { %v2861_v37 = vrot.slane %v2860_v46, 2 }
 0x370   :  { %v2862_v4 = vadd.f32 %v2861_v37, %v2860_v46 }
 0x372   :  { %v2863_v60 = vrot.slane %v2862_v4, 1 }
 0x374   :  { %v2864_v40 = vadd.f32 %v2863_v60, %v2862_v4  ;;  %v2969_v4 = vld [vmem:[%s6044_s5 + $0x30] sm:$0xff] }
 0x376   :  { %v2865_v38 = vmul.f32 %v2864_v40, %v2818_v55 }
 0x378   :  { %v2866_v29 = vadd.f32 1e-05, %v2865_v38  ;;  %v2970_v38 = vld [vmem:[%s6044_s5 + $0x38] sm:$0xff] }
 0x37a   :  { %4078 = vrsqrt.f32 %v2866_v29  ;;  %vm2873_vm11 = vweird.f32 %v2866_v29 }
 0x380   :  { %v4079_v5 = vpop.eup %4078 }
 0x381   :  { %v2868_v23 = vmul.f32 %v4079_v5, %v2866_v29  ;;  %vm2874_vm10 = vweird.f32 %v4079_v5 }
 0x382   :  { %vm2875_vm12 = vmor %vm2873_vm11, %vm2874_vm10 }
 0x383   :  { %v2869_v62 = vmul.f32 %v4079_v5, %v2868_v23 }
 0x385   :  { %v2870_v50 = vmul.f32 0.5, %v2869_v62 }
 0x387   :  { %v2871_v45 = vsub.f32 1.5, %v2870_v50 }
 0x389   :  { %v2872_v16 = vmul.f32 %v4079_v5, %v2871_v45 }
 0x38b   :  { %v5935_v57 = vsel %vm2875_vm12, %v4079_v5, %v2872_v16  ;;  %vm2997_vm12 = vcmask 801792  }
 0x38c   :  { %v2889_v32 = vmul.f32 %v5935_v57, %v2832_v11  ;;  %v2887_v47 = vmul.f32 %v5935_v57, %v2830_v58  ;;  %v2888_v14 = vmul.f32 %v5935_v57, %v2831_v48  ;;  %v2885_v30 = vmul.f32 %v5935_v57, %v2828_v52 }
 0x38d   :  { %v2886_v3 = vmul.f32 %v5935_v57, %v2829_v43  ;;  %v2883_v55 = vmul.f32 %v5935_v57, %v2826_v59  ;;  %v2884_v44 = vmul.f32 %v5935_v57, %v2827_v63  ;;  %v2881_v31 = vmul.f32 %v5935_v57, %v5909_v8 }
 0x38e   :  { %v2906_v11 = vmul.f32 %v5933_v25, %v2889_v32  ;;  %v2904_v36 = vmul.f32 %v5933_v25, %v2887_v47  ;;  %v2905_v58 = vmul.f32 %v5933_v25, %v2888_v14  ;;  %v2902_v48 = vmul.f32 %v5933_v25, %v2885_v30 }
 0x38f   :  { %v2903_v52 = vmul.f32 %v5933_v25, %v2886_v3  ;;  %v2900_v43 = vmul.f32 %v5933_v25, %v2883_v55  ;;  %v2901_v59 = vmul.f32 %v5933_v25, %v2884_v44  ;;  %v2882_v63 = vmul.f32 %v5935_v57, %v5912_v21  ;;  %v2974_v21 = vld [vmem:[%s6044_s5 + $0x58] sm:$0xff]  ;;  %v2967_v3 = vld [vmem:[%s6044_s5 + $0x20] sm:$0xff] }
 0x390   :  { %v2923_v8 = vadd.f32 %v5941_v6, %v2906_v11  ;;  %v2921_v20 = vadd.f32 %v5941_v6, %v2904_v36  ;;  %v2922_v7 = vadd.f32 %v5941_v6, %v2905_v58  ;;  %v2919_v1 = vadd.f32 %v5941_v6, %v2902_v48 }
 0x391   :  { %v2920_v26 = vadd.f32 %v5941_v6, %v2903_v52  ;;  %v2917_v53 = vadd.f32 %v5941_v6, %v2900_v43  ;;  %v2918_v17 = vadd.f32 %v5941_v6, %v2901_v59  ;;  %v2898_v33 = vmul.f32 %v5933_v25, %v2881_v31  ;;  %v2968_v31 = vld [vmem:[%s6044_s5 + $0x28] sm:$0xff] }
 0x392   :  { %vm2936_vm14 = vcmp.ge.f32.partialorder %v2923_v8, 0.0  ;;  %v2949_v0 = vmul.f32 0.2, %v2923_v8  ;;  %vm2934_vm15 = vcmp.ge.f32.partialorder %v2921_v20, 0.0  ;;  %vm2935_vm0 = vcmp.ge.f32.partialorder %v2922_v7, 0.0 }
 0x393   :  { %v2947_v41 = vmul.f32 0.2, %v2921_v20  ;;  %v2948_v34 = vmul.f32 0.2, %v2922_v7  ;;  %vm2932_vm1 = vcmp.ge.f32.partialorder %v2919_v1, 0.0  ;;  %vm2933_vm2 = vcmp.ge.f32.partialorder %v2920_v26, 0.0 }
 0x394   :  { %v2962_v13 = vsel %vm2936_vm14, %v2923_v8, %v2949_v0  ;;  %v2945_v10 = vmul.f32 0.2, %v2919_v1  ;;  %v2946_v56 = vmul.f32 0.2, %v2920_v26  ;;  %vm2930_vm3 = vcmp.ge.f32.partialorder %v2917_v53, 0.0 }
 0x395   :  { %v2988_v28 = vmul.f32 %v2975_v15, %v2962_v13  ;;  %v2960_v12 = vsel %vm2934_vm15, %v2921_v20, %v2947_v41  ;;  %v2961_v19 = vsel %vm2935_vm0, %v2922_v7, %v2948_v34  ;;  %vm2931_vm4 = vcmp.ge.f32.partialorder %v2918_v17, 0.0  ;;  %v2963_v41 = vld [vmem:[%s6044_s5] sm:$0xff]  ;;  %v2964_v34 = vld [vmem:[%s6044_s5 + $0x8] sm:$0xff] }
 0x396   :  { %v2986_v61 = vmul.f32 %v2973_v18, %v2960_v12  ;;  %v2987_v22 = vmul.f32 %v2974_v21, %v2961_v19  ;;  %v2958_v51 = vsel %vm2932_vm1, %v2919_v1, %v2945_v10  ;;  %v2959_v39 = vsel %vm2933_vm2, %v2920_v26, %v2946_v56  ;;  %v2965_v26 = vld [vmem:[%s6044_s5 + $0x10] sm:$0xff] }
 0x397   :  { %v2995_v42 = vpack.c.bf16 %v2988_v28, %v2988_v28  ;;  %v2984_v49 = vmul.f32 %v2971_v54, %v2958_v51  ;;  %v2985_v46 = vmul.f32 %v2972_v35, %v2959_v39  ;;  %v2943_v37 = vmul.f32 0.2, %v2917_v53  ;;  %v2996_v28 = vld [vmem:[%s6045_s6] sm:$0x1] }
 0x398   :  { %v2994_v60 = vpack.c.bf16 %v2987_v22, %v2986_v61  ;;  %v2944_v40 = vmul.f32 0.2, %v2918_v17  ;;  %v2899_v29 = vmul.f32 %v5933_v25, %v2882_v63  ;;  %v2915_v5 = vadd.f32 %v5941_v6, %v2898_v33 }
 0x399   :  { %v3003_v23 = vsel %vm3001_vm13, %v2995_v42, 0  ;;  %v2993_v62 = vpack.c.bf16 %v2985_v46, %v2984_v49  ;;  %v2956_v50 = vsel %vm2930_vm3, %v2917_v53, %v2943_v37  ;;  %v2879_v45 = vmul.f32 %v5935_v57, %v5903_v2 }
 0x39a   :  { %3006 = vmatpush.bf16.msra.mxu0 %v3003_v23  ;;  %v2957_v16 = vsel %vm2931_vm4, %v2918_v17, %v2944_v40  ;;  %v2982_v32 = vmul.f32 %v2969_v4, %v2956_v50  ;;  %v2916_v47 = vadd.f32 %v5941_v6, %v2899_v29  ;;  %vm2928_vm5 = vcmp.ge.f32.partialorder %v2915_v5, 0.0 }
 0x39b   :  { %v2983_v14 = vmul.f32 %v2970_v38, %v2957_v16  ;;  %v2941_v30 = vmul.f32 0.2, %v2915_v5  ;;  %v2880_v55 = vmul.f32 %v5935_v57, %v5906_v24  ;;  %v2896_v44 = vmul.f32 %v5933_v25, %v2879_v45 }
 0x39c   :  { %vm2929_vm6 = vcmp.ge.f32.partialorder %v2916_v47, 0.0  ;;  %v2942_v2 = vmul.f32 0.2, %v2916_v47  ;;  %v2877_v11 = vmul.f32 %v5935_v57, %v5897_v9  ;;  %v2878_v36 = vmul.f32 %v5935_v57, %v5900_v27 }
 0x39d   :  { %v2992_v58 = vpack.c.bf16 %v2983_v14, %v2982_v32  ;;  %v2954_v48 = vsel %vm2928_vm5, %v2915_v5, %v2941_v30  ;;  %v2897_v52 = vmul.f32 %v5933_v25, %v2880_v55  ;;  %v2913_v24 = vadd.f32 %v5941_v6, %v2896_v44 }
 0x39e   :  { %3007 = vmatpush.bf16.msra.mxu0 %v2994_v60  ;;  %v2955_v43 = vsel %vm2929_vm6, %v2916_v47, %v2942_v2  ;;  %v2980_v59 = vmul.f32 %v2967_v3, %v2954_v48  ;;  %v2894_v63 = vmul.f32 %v5933_v25, %v2877_v11  ;;  %v2895_v8 = vmul.f32 %v5933_v25, %v2878_v36  ;;  %v2966_v25 = vld [vmem:[%s6044_s5 + $0x18] sm:$0xff] }
 0x39f   :  { %v2981_v20 = vmul.f32 %v2968_v31, %v2955_v43  ;;  %v2914_v7 = vadd.f32 %v5941_v6, %v2897_v52  ;;  %v2939_v9 = vmul.f32 0.2, %v2913_v24  ;;  %vm2926_vm7 = vcmp.ge.f32.partialorder %v2913_v24, 0.0 }
 0x3a0   :  { %v2911_v27 = vadd.f32 %v5941_v6, %v2894_v63  ;;  %v2912_v57 = vadd.f32 %v5941_v6, %v2895_v8  ;;  %v13_v12 = vstv %s6046_s7  ;;  %vm3045_vm15 = vcmask 1024  }
 0x3a1   :  { %v2991_v1 = vpack.c.bf16 %v2981_v20, %v2980_v59  ;;  %v2940_v15 = vmul.f32 0.2, %v2914_v7  ;;  %vm2927_vm9 = vcmp.ge.f32.partialorder %v2914_v7, 0.0  ;;  %v2952_v18 = vsel %vm2926_vm7, %v2913_v24, %v2939_v9  ;;  %14 = vst [vmem:[#allocation2] sm:$0x1] %v13_v12 }
 0x3a2   :  { %3008 = vmatpush.bf16.msra.mxu0 %v2993_v62  ;;  %v2937_v53 = vmul.f32 0.2, %v2911_v27  ;;  %v2938_v17 = vmul.f32 0.2, %v2912_v57  ;;  %vm2924_vm10 = vcmp.ge.f32.partialorder %v2911_v27, 0.0  ;;  %vm2925_vm11 = vcmp.ge.f32.partialorder %v2912_v57, 0.0 }
 0x3a3   :  { %v2953_v21 = vsel %vm2927_vm9, %v2914_v7, %v2940_v15  ;;  %v2978_v33 = vmul.f32 %v2965_v26, %v2952_v18 }
 0x3a4   :  { %v2979_v6 = vmul.f32 %v2966_v25, %v2953_v21  ;;  %v2950_v0 = vsel %vm2924_vm10, %v2911_v27, %v2937_v53  ;;  %v2951_v54 = vsel %vm2925_vm11, %v2912_v57, %v2938_v17 }
 0x3a5   :  { %v2976_v10 = vmul.f32 %v2963_v41, %v2950_v0  ;;  %v2977_v56 = vmul.f32 %v2964_v34, %v2951_v54 }
 0x3a6   :  { %3009 = vmatpush.bf16.msra.mxu0 %v2992_v58  ;;  %v2990_v13 = vpack.c.bf16 %v2979_v6, %v2978_v33 }
 0x3a7   :  { %v2989_v35 = vpack.c.bf16 %v2977_v56, %v2976_v10 }
 0x3a8   :  { %v4075_v51 = vld [vmem:[#allocation2] ss:$0 sm:$0xff] }
 0x3aa   :  { %3010 = vmatpush.bf16.msra.mxu0 %v2991_v1 }
 0x3ae   :  { %3011 = vmatpush.bf16.msra.mxu0 %v2990_v13 }
 0x3b2   :  { %3012 = vmatpush.bf16.msra.mxu0 %v2989_v35 }
 0x3b5   :  { %3867 = vmatmul.msk.bf16.vlgmr.msra.gmra.mxu0 %vm2997_vm12, %v2996_v28 }
 0x432   :  { %v3014_v19 = vpop.f32.mrf.mxu0 }
 0x433   :  { %v3018_v61 = vsel %vm2803_vm8, %v3014_v19, 0.0 }
 0x434   :  { %3019 = vadd.xlane.f32.xlu0 %v3018_v61 }
 0x43a   :  { %v3016_v22 = vpop.f32.mrf.mxu0 }
 0x4a7   :  { %v3020_v39 = vpop.xlane.xlu0 %3019 }
 0x4a8   :  { %v3025_v42 = vadd.f32 %v4075_v51, %v3020_v39 }
 0x4aa   :  { %v3026_v49 = vsub.f32 0.0, %v3025_v42 }
 0x4ac   :  { %v3027_v46 = vmul.f32 1.442695, %v3026_v49 }
 0x4ae   :  { %4080 = vpow2.f32 %v3027_v46 }
 0x4b4   :  { %v4081_v37 = vpop.eup %4080 }
 0x4b5   :  { %v3029_v4 = vadd.f32 1.0, %v4081_v37 }
 0x4b7   :  { %4082 = vrcp.f32 %v3029_v4  ;;  %v3041_v29 = vand.u32 2147483648, %v3029_v4  ;;  %v3039_v23 = vand.u32 2147483647, %v3029_v4  ;;  %vm3035_vm8 = vweird.f32 %v3029_v4 }
 0x4b9   :  { %v3042_v50 = vor.u32 1.1754944e-38, %v3041_v29  ;;  %vm3040_vm0 = vcmp.eq.f32.partialorder %v3039_v23, 8.507059e+37 }
 0x4bd   :  { %v4083_v60 = vpop.eup %4082 }
 0x4be   :  { %v3031_v40 = vmul.f32 %v4083_v60, %v3029_v4  ;;  %vm3036_vm13 = vweird.f32 %v4083_v60 }
 0x4bf   :  { %vm3037_vm14 = vmor %vm3035_vm8, %vm3036_vm13 }
 0x4c0   :  { %v3032_v38 = vsub.f32 1.0, %v3031_v40 }
 0x4c2   :  { %v3033_v5 = vmul.f32 %v4083_v60, %v3032_v38 }
 0x4c4   :  { %v3034_v62 = vadd.f32 %v4083_v60, %v3033_v5 }
 0x4c6   :  { %v3038_v45 = vsel %vm3037_vm14, %v4083_v60, %v3034_v62 }
 0x4c7   :  { %v3043_v16 = vsel %vm3040_vm0, %v3042_v50, %v3038_v45 }
 0x4c8   :  { %3046 = vst.msk [vmem:[%s6047_s8] sm:$0x3] %vm3045_vm15, %v3043_v16 }

</bundles_post_ra>
